<compile_context>
chip_gen: v6e
topology: v6e:2x2x1
jax: 0.10.0
libtpu: 0.0.40
codegen_flags: <defaults>
</compile_context>

<pallas_src>
import math
from functools import partial

import numpy as np
import jax
import jax.numpy as jnp
from jax import lax
from jax.experimental import pallas as pl
from jax.experimental.pallas import tpu as pltpu


# ----------------------------------------------------------------------------
# Fused per-tree-level Pallas kernel (one N-tile per grid step)
# ----------------------------------------------------------------------------

def _tree_level_kernel(x_ref, ww_ref, wb_ref, xcat_ref, wih_ref, b_ref, whh_ref,
                       h0_ref, c0_ref, fcf_ref, fcr_ref, cmask_ref, last_ref,
                       out_ref, xproj_scr, h_scr, c_scr, bf_scr, hsel_scr,
                       *, T, NT, D, unroll):
    """One tree level, one tile of NT nodes.

    Fused hidden layout (width HH = 2*4*D): [fwd(f,i,u,o) | bwd(f,i,u,o)].
    Fused gate layout (width 4*HH):         [i | f | g | o], each HH wide.
    """
    HH = 8 * D                     # 2 directions x 4 branch modules x D
    mdt = wih_ref.dtype            # matmul operand dtype (f32 or bf16)
    f32 = jnp.float32

    # Node input projection  W x + b  ->  [NT, 4D], branch-major (f, i, u, o).
    wx = jnp.dot(x_ref[...].astype(mdt), ww_ref[...],
                 preferred_element_type=f32) + wb_ref[...]

    # Hoisted child-input projection for all timesteps / directions / modules
    # (bias folded in) -> the serial recurrence below only does h @ Whh.
    xw = wih_ref[...]
    bb = b_ref[...]

    def pre(t, carry):
        xproj_scr[t] = jnp.dot(xcat_ref[t].astype(mdt), xw,
                               preferred_element_type=f32) + bb
        return carry

    lax.fori_loop(0, T, pre, 0, unroll=unroll)

    # Recurrence state in VMEM scratch (bounded vreg pressure at NT=128).
    h_scr[...] = jnp.broadcast_to(h0_ref[...], (NT, HH))
    c_scr[...] = jnp.broadcast_to(c0_ref[...], (NT, HH))
    bf_scr[...] = jnp.zeros((NT, D), f32)
    hsel_scr[...] = jnp.zeros((NT, HH), f32)

    whh = whh_ref[...]             # hoisted out of the hot loop
    fcf = fcf_ref[...]             # only the U_f head stays in the loop
    last = last_ref[...]           # [NT, 1] int32: last valid child index
    wf = wx[:, 0:D]

    def step(t, carry):
        h = h_scr[...]
        c = c_scr[...]
        gates = xproj_scr[t] + jnp.dot(h.astype(mdt), whh,
                                       preferred_element_type=f32)
        i = jax.nn.sigmoid(gates[:, 0 * HH:1 * HH])
        f = jax.nn.sigmoid(gates[:, 1 * HH:2 * HH])
        g = jnp.tanh(gates[:, 2 * HH:3 * HH])
        o = jax.nn.sigmoid(gates[:, 3 * HH:4 * HH])
        c_new = f * c + i * g
        h_new = o * jnp.tanh(c_new)
        h_scr[...] = h_new
        c_scr[...] = c_new
        # U_f branch: masked sum over children (mask pre-folded into cmask).
        u_f = jnp.dot(h_new.astype(mdt), fcf, preferred_element_type=f32)
        bf_scr[...] = bf_scr[...] + jax.nn.sigmoid(wf + u_f) * cmask_ref[t]
        # i/u/o branches use the last valid child -> select h now (lane dense),
        # apply the U_i/U_u/U_o heads once after the loop.
        sel_t = (last == t).astype(f32)                       # [NT, 1]
        hsel_scr[...] = hsel_scr[...] + sel_t * h_new
        return carry

    lax.fori_loop(0, T, step, 0, unroll=unroll)

    # U_i / U_u / U_o heads applied once, off the serial critical path.
    last_u = jnp.dot(hsel_scr[...].astype(mdt), fcr_ref[...],
                     preferred_element_type=f32)              # [NT, 3D]
    branch_f = bf_scr[...]
    branch_i = jax.nn.sigmoid(last_u[:, 0:D] + wx[:, 1 * D:2 * D])
    branch_u = jnp.tanh(last_u[:, D:2 * D] + wx[:, 2 * D:3 * D])
    branch_o = jax.nn.sigmoid(last_u[:, 2 * D:3 * D] + wx[:, 3 * D:4 * D])
    new_c = branch_i * branch_u + branch_f
    new_h = branch_o * jnp.tanh(new_c)

    # Lane-dense output slab: [h | c | zero-pad] -> unmasked stores.
    ow = out_ref.shape[-1]
    if ow > 2 * D:
        pad = jnp.zeros((NT, ow - 2 * D), f32)
        out_ref[...] = jnp.concatenate([new_h, new_c, pad], axis=-1)
    else:
        out_ref[...] = jnp.concatenate([new_h, new_c], axis=-1)


def _tree_level_call(x, xcat, cmask, last_col, fused, *, T, N, NT, D):
    HH = 8 * D
    GW = 4 * HH
    OW = ((2 * D + 127) // 128) * 128          # lane-dense output width
    unroll = max(1, min(T, 4))                 # partial unroll: LLO visibility
    kernel = partial(_tree_level_kernel, T=T, NT=NT, D=D, unroll=unroll)
    full2d = lambda i: (0, 0)
    return pl.pallas_call(
        kernel,
        out_shape=jax.ShapeDtypeStruct((N, OW), jnp.float32),
        grid=(N // NT,),
        in_specs=[
            pl.BlockSpec((NT, x.shape[1]), lambda i: (i, 0)),        # x
            pl.BlockSpec(fused["W_w"].shape, full2d),                # W_w
            pl.BlockSpec(fused["W_b"].shape, full2d),                # W_b
            pl.BlockSpec((T, NT, 2 * D), lambda i: (0, i, 0)),       # xcat
            pl.BlockSpec(fused["wih"].shape, full2d),                # wih
            pl.BlockSpec(fused["b"].shape, full2d),                  # b
            pl.BlockSpec(fused["whh"].shape, full2d),                # whh
            pl.BlockSpec(fused["h0"].shape, full2d),                 # h0
            pl.BlockSpec(fused["c0"].shape, full2d),                 # c0
            pl.BlockSpec(fused["fc_f"].shape, full2d),               # fc (U_f)
            pl.BlockSpec(fused["fc_r"].shape, full2d),               # fc (U_i/u/o)
            pl.BlockSpec((T, NT, D), lambda i: (0, i, 0)),           # cmask
            pl.BlockSpec((NT, 1), lambda i: (i, 0)),                 # last child
        ],
        out_specs=pl.BlockSpec((NT, OW), lambda i: (i, 0)),
        scratch_shapes=[
            pltpu.VMEM((T, NT, GW), jnp.float32),   # hoisted x-projection
            pltpu.VMEM((NT, HH), jnp.float32),      # h state
            pltpu.VMEM((NT, HH), jnp.float32),      # c state
            pltpu.VMEM((NT, D), jnp.float32),       # branch_f accumulator
            pltpu.VMEM((NT, HH), jnp.float32),      # selected last-child h
        ],
        compiler_params=pltpu.CompilerParams(
            dimension_semantics=("parallel",),
            vmem_limit_bytes=32 * 1024 * 1024),
    )(x, fused["W_w"], fused["W_b"], xcat, fused["wih"], fused["b"],
      fused["whh"], fused["h0"], fused["c0"], fused["fc_f"], fused["fc_r"],
      cmask, last_col)


# ----------------------------------------------------------------------------
# Per-level glue (jitted; fixed shapes -> compiles exactly once per dtype)
# ----------------------------------------------------------------------------

@partial(jax.jit, static_argnames=("dim_out",))
def forward_step_pallas(fused, x, h_tensor, c_tensor, indice, t_real, *, dim_out):
    D = dim_out
    N, T = indice.shape            # N = fixed bucket (multiple of 8 / of NT)
    NT = min(128, N)

    mask_bool = indice != -1
    mask = mask_bool.astype(jnp.float32)                     # [N, T]
    length = jnp.sum(mask, axis=1).astype(jnp.int32)         # [N]
    h2 = jnp.where(mask_bool, indice, 0)
    # TODO(synk): move this gather + reversal into the kernel (scalar prefetch
    # / manual DMA) to avoid the [N, T, 2D] HBM round trip per level.
    h = h_tensor[h2]                                         # [N, T, D]
    c = c_tensor[h2]                                         # [N, T, D]

    # Backward input = per-row flip of the valid prefix, zeros afterwards
    # (mirrors the reference's x_back construction).
    idx = length[:, None] - 1 - jnp.arange(T, dtype=jnp.int32)[None, :]
    valid = idx >= 0
    h_back = jnp.where(
        valid[:, :, None],
        jnp.take_along_axis(h, jnp.where(valid, idx, 0)[:, :, None], axis=1),
        0.0)

    xcat = jnp.transpose(jnp.concatenate([h, h_back], axis=-1), (1, 0, 2))  # [T,N,2D]
    cmask = jnp.transpose(c, (1, 0, 2)) * jnp.transpose(mask)[:, :, None]   # [T,N,D]
    # torch: y[arange(N), length-1]; length==0 wraps to the last real child slot
    last = jnp.where(length > 0, length - 1, t_real - 1).astype(jnp.int32)
    last_col = last[:, None]                                                # [N,1]

    hc = _tree_level_call(x, xcat, cmask, last_col, fused, T=T, N=N, NT=NT, D=D)
    return hc[:, :D], hc[:, D:2 * D]


def shido_forward_pallas(fused, tensors, indices, dim_out):
    """Tree-level loop. Levels are bucketed to one (N, T) shape; the h/c
    buffers keep a fixed (1 + n_bucket, D) shape, so the jitted step (and its
    single Pallas kernel) compiles exactly once per dtype."""
    D = dim_out
    n_max = max(int(i.shape[0]) for i in indices)
    n_bucket = max(8, ((n_max + 7) // 8) * 8)
    if n_bucket > 128:                         # multiple of the 128-row N tile
        n_bucket = ((n_bucket + 127) // 128) * 128
    t_bucket = max(int(i.shape[1]) for i in indices)

    h_buf = jnp.concatenate([fused["h_init"], jnp.zeros((n_bucket, D), jnp.float32)], 0)
    c_buf = jnp.concatenate([fused["c_init"], jnp.zeros((n_bucket, D), jnp.float32)], 0)
    res_h, res_c = [], []
    for indice, x in zip(indices, tensors):
        n, t = indice.shape
        ind_p = jnp.pad(indice, ((0, n_bucket - n), (0, t_bucket - t)),
                        constant_values=-1)
        x_p = jnp.pad(x, ((0, n_bucket - n), (0, 0)))
        nh, nc = forward_step_pallas(fused, x_p, h_buf, c_buf, ind_p,
                                     jnp.asarray(t, jnp.int32), dim_out=D)
        res_h.append(nh[:n])
        res_c.append(nc[:n])
        h_buf = jnp.concatenate([fused["h_init"], nh], axis=0)   # fixed shape
        c_buf = jnp.concatenate([fused["c_init"], nc], axis=0)
    return res_h, res_c


# ----------------------------------------------------------------------------
# Parameters: per-module (reference layout) + fused packing for the kernel
# ----------------------------------------------------------------------------

def _unif(key, shape, fan):
    bound = 1.0 / math.sqrt(fan)
    return jax.random.uniform(key, shape, jnp.float32, -bound, bound)


def init_bilstm_params(key, dim):
    ks = jax.random.split(key, 13)
    p = {}
    p["h_init_f"] = jax.random.normal(ks[0], (1, dim), jnp.float32) * 0.01
    p["c_init_f"] = jax.random.normal(ks[1], (1, dim), jnp.float32) * 0.01
    p["h_init_b"] = jax.random.normal(ks[2], (1, dim), jnp.float32) * 0.01
    p["c_init_b"] = jax.random.normal(ks[3], (1, dim), jnp.float32) * 0.01
    # torch LSTM weights [4D, D] stored transposed as [D, 4D]; b = b_ih + b_hh
    p["wih_f"] = _unif(ks[4], (dim, 4 * dim), dim)
    p["whh_f"] = _unif(ks[5], (dim, 4 * dim), dim)
    p["b_f"] = _unif(ks[6], (1, 4 * dim), dim) + _unif(ks[7], (1, 4 * dim), dim)
    p["wih_b"] = _unif(ks[8], (dim, 4 * dim), dim)
    p["whh_b"] = _unif(ks[9], (dim, 4 * dim), dim)
    p["b_b"] = _unif(ks[10], (1, 4 * dim), dim) + _unif(ks[11], (1, 4 * dim), dim)
    # fc: Linear(2*dim, dim, bias=False), stored transposed as [2D, D]
    p["fc_w"] = _unif(ks[12], (2 * dim, dim), 2 * dim)
    return p


def init_shido_params(key, dim_in, dim_out):
    ks = jax.random.split(key, 6)
    return {
        "U_f": init_bilstm_params(ks[0], dim_out),
        "U_i": init_bilstm_params(ks[1], dim_out),
        "U_u": init_bilstm_params(ks[2], dim_out),
        "U_o": init_bilstm_params(ks[3], dim_out),
        "W_w": _unif(ks[4], (dim_in, 4 * dim_out), dim_in),
        "W_b": _unif(ks[5], (1, 4 * dim_out), dim_in),
        "h_init": jnp.zeros((1, dim_out), jnp.float32),
        "c_init": jnp.zeros((1, dim_out), jnp.float32),
    }


def build_fused_params(params, dim_out, matmul_dtype=jnp.float32):
    """Pack the 4 BiLSTM modules x 2 directions into single fused weights.

    Hidden layout (HH = 2*4*D): index  d*4*D + m*D + c   (d=dir, m=module).
    Gate layout (4*HH):         index  g*HH + d*4*D + m*D + c  (g in i,f,g,o).
    fc heads: columns [U_f | U_i | U_u | U_o], split into fc_f and fc_r.
    """
    D = dim_out
    H = 4 * D
    HH = 2 * H
    GW = 4 * HH
    wih_c = np.zeros((2 * D, GW), np.float32)
    whh_c = np.zeros((HH, GW), np.float32)
    b_c = np.zeros((1, GW), np.float32)
    fc_c = np.zeros((HH, 4 * D), np.float32)
    h0_c = np.zeros((1, HH), np.float32)
    c0_c = np.zeros((1, HH), np.float32)
    for m, name in enumerate(("U_f", "U_i", "U_u", "U_o")):
        p = params[name]
        fc = np.asarray(p["fc_w"])                       # [2D, D]
        for d, sfx in enumerate(("f", "b")):
            wih = np.asarray(p["wih_" + sfx])            # [D, 4D] gate-major
            whh = np.asarray(p["whh_" + sfx])            # [D, 4D]
            b = np.asarray(p["b_" + sfx]).reshape(-1)    # [4D]
            hs = d * H + m * D
            for g in range(4):
                cs = g * HH + d * H + m * D
                wih_c[d * D:(d + 1) * D, cs:cs + D] = wih[:, g * D:(g + 1) * D]
                whh_c[hs:hs + D, cs:cs + D] = whh[:, g * D:(g + 1) * D]
                b_c[0, cs:cs + D] = b[g * D:(g + 1) * D]
            h0_c[0, hs:hs + D] = np.asarray(p["h_init_" + sfx])[0]
            c0_c[0, hs:hs + D] = np.asarray(p["c_init_" + sfx])[0]
            fc_c[hs:hs + D, m * D:(m + 1) * D] = fc[d * D:(d + 1) * D, :]
    return {
        "W_w": jnp.asarray(np.asarray(params["W_w"]), matmul_dtype),
        "W_b": jnp.asarray(params["W_b"], jnp.float32),
        "wih": jnp.asarray(wih_c, matmul_dtype),
        "whh": jnp.asarray(whh_c, matmul_dtype),
        "b": jnp.asarray(b_c, jnp.float32),
        "fc_f": jnp.asarray(fc_c[:, :D], matmul_dtype),       # U_f head
        "fc_r": jnp.asarray(fc_c[:, D:], matmul_dtype),       # U_i/U_u/U_o heads
        "h0": jnp.asarray(h0_c, jnp.float32),
        "c0": jnp.asarray(c0_c, jnp.float32),
        "h_init": params["h_init"],
        "c_init": params["c_init"],
    }


# ----------------------------------------------------------------------------
# Pure-JAX reference (mirrors the PyTorch module, per-module weights)
# ----------------------------------------------------------------------------

def _lstm_ref(x_tm, wih, whh, b, h0, c0, D):
    def step(carry, x_t):
        h, c = carry
        gates = x_t @ wih + h @ whh + b
        i = jax.nn.sigmoid(gates[:, 0 * D:1 * D])
        f = jax.nn.sigmoid(gates[:, 1 * D:2 * D])
        g = jnp.tanh(gates[:, 2 * D:3 * D])
        o = jax.nn.sigmoid(gates[:, 3 * D:4 * D])
        c = f * c + i * g
        h = o * jnp.tanh(c)
        return (h, c), h
    _, ys = lax.scan(step, (h0, c0), x_tm)
    return ys


def _bilstm_ref(p, h, length, return_seq, D):
    N, T, _ = h.shape
    idx = length[:, None] - 1 - jnp.arange(T, dtype=jnp.int32)[None, :]
    valid = idx >= 0
    hb = jnp.where(
        valid[:, :, None],
        jnp.take_along_axis(h, jnp.where(valid, idx, 0)[:, :, None], axis=1), 0.0)
    xf = jnp.transpose(h, (1, 0, 2))
    xb = jnp.transpose(hb, (1, 0, 2))
    yf = _lstm_ref(xf, p["wih_f"], p["whh_f"], p["b_f"],
                   jnp.tile(p["h_init_f"], (N, 1)), jnp.tile(p["c_init_f"], (N, 1)), D)
    yb = _lstm_ref(xb, p["wih_b"], p["whh_b"], p["b_b"],
                   jnp.tile(p["h_init_b"], (N, 1)), jnp.tile(p["c_init_b"], (N, 1)), D)
    y = jnp.transpose(jnp.concatenate([yf, yb], -1), (1, 0, 2))   # [N, T, 2D]
    if return_seq:
        return y @ p["fc_w"]
    last = jnp.mod(length - 1, T)
    y_last = jnp.take_along_axis(y, last[:, None, None], axis=1)[:, 0, :]
    return y_last @ p["fc_w"]


def _forward_step_ref(params, x, h_tensor, c_tensor, indice, D):
    mask_bool = indice != -1
    mask = mask_bool.astype(jnp.float32)
    length = jnp.sum(mask, axis=1).astype(jnp.int32)
    h2 = jnp.where(mask_bool, indice, 0)
    h = h_tensor[h2]
    c = c_tensor[h2]
    Wx = x @ params["W_w"] + params["W_b"]
    wf, wi = Wx[:, 0:D], Wx[:, D:2 * D]
    wu, wo = Wx[:, 2 * D:3 * D], Wx[:, 3 * D:4 * D]
    bf_k = jax.nn.sigmoid(wf[:, None, :] + _bilstm_ref(params["U_f"], h, length, True, D))
    branch_f = jnp.sum(bf_k * c * mask[:, :, None], axis=1)
    branch_i = jax.nn.sigmoid(_bilstm_ref(params["U_i"], h, length, False, D) + wi)
    branch_u = jnp.tanh(_bilstm_ref(params["U_u"], h, length, False, D) + wu)
    branch_o = jax.nn.sigmoid(_bilstm_ref(params["U_o"], h, length, False, D) + wo)
    new_c = branch_i * branch_u + branch_f
    new_h = branch_o * jnp.tanh(new_c)
    return new_h, new_c


def shido_forward_ref(params, tensors, indices, dim_out):
    h_tensor = params["h_init"]
    c_tensor = params["c_init"]
    res_h, res_c = [], []
    for indice, x in zip(indices, tensors):
        nh, nc = _forward_step_ref(params, x, h_tensor, c_tensor, indice, dim_out)
        res_h.append(nh)
        res_c.append(nc)
        h_tensor = jnp.concatenate([params["h_init"], nh], axis=0)
        c_tensor = jnp.concatenate([params["c_init"], nc], axis=0)
    return res_h, res_c


# ----------------------------------------------------------------------------
# Demo
# ----------------------------------------------------------------------------

if __name__ == "__main__":
    dim_in, dim_out = 16, 32
    key = jax.random.PRNGKey(0)
    kp, k0, k1, k2 = jax.random.split(key, 4)

    params = init_shido_params(kp, dim_in, dim_out)

    # Tree with three levels: 4 leaves -> 2 internal nodes -> 1 root.
    # indices are row indices into the previous level's h_tensor (row 0 is the
    # h_init/c_init row; -1 means "no child" / padding).
    tensors = [
        jax.random.normal(k0, (4, dim_in), jnp.float32),   # level 0: leaves
        jax.random.normal(k1, (2, dim_in), jnp.float32),   # level 1
        jax.random.normal(k2, (1, dim_in), jnp.float32),   # level 2: root
    ]
    indices = [
        jnp.full((4, 2), -1, dtype=jnp.int32),
        jnp.array([[1, 2, -1], [3, 4, -1]], dtype=jnp.int32),
        jnp.array([[1, 2]], dtype=jnp.int32),
    ]

    ref_h, ref_c = shido_forward_ref(params, tensors, indices, dim_out)

    # --- f32 matmul operands: checked against the pure-JAX reference ----------
    fused_f32 = build_fused_params(params, dim_out, jnp.float32)
    res_h, res_c = shido_forward_pallas(fused_f32, tensors, indices, dim_out)
    for out, ref in zip(res_h + res_c, ref_h + ref_c):
        out = jax.block_until_ready(out)
        assert out.shape == ref.shape
        assert bool(jnp.all(jnp.isfinite(out)))
        assert bool(jnp.allclose(out, ref, rtol=2e-2, atol=2e-2)), \
            float(jnp.max(jnp.abs(out - ref)))

    # --- bf16 matmul operands (v5e/v6e/v7x MXU path); f32 accumulation/state --
    fused_bf16 = build_fused_params(params, dim_out, jnp.bfloat16)
    res_h16, res_c16 = shido_forward_pallas(fused_bf16, tensors, indices, dim_out)
    for out, ref in zip(res_h16 + res_c16, ref_h + ref_c):
        out = jax.block_until_ready(out)
        assert out.shape == ref.shape
        assert bool(jnp.all(jnp.isfinite(out)))
        assert bool(jnp.allclose(out, ref, rtol=1e-1, atol=1e-1)), \
            float(jnp.max(jnp.abs(out - ref)))

    print("KERNEL_OK")
</pallas_src>

<mosaic_0001>
module attributes {stable_mosaic.version = 11 : i64} {
  func.func @_tree_level_kernel(%arg0: i32, %arg1: memref<8x16xf32, #tpu.memory_space<vmem>>, %arg2: memref<16x128xf32, #tpu.memory_space<vmem>>, %arg3: memref<1x128xf32, #tpu.memory_space<vmem>>, %arg4: memref<3x8x64xf32, #tpu.memory_space<vmem>>, %arg5: memref<64x1024xf32, #tpu.memory_space<vmem>>, %arg6: memref<1x1024xf32, #tpu.memory_space<vmem>>, %arg7: memref<256x1024xf32, #tpu.memory_space<vmem>>, %arg8: memref<1x256xf32, #tpu.memory_space<vmem>>, %arg9: memref<1x256xf32, #tpu.memory_space<vmem>>, %arg10: memref<256x32xf32, #tpu.memory_space<vmem>>, %arg11: memref<256x96xf32, #tpu.memory_space<vmem>>, %arg12: memref<3x8x32xf32, #tpu.memory_space<vmem>>, %arg13: memref<8x1xi32, #tpu.memory_space<vmem>>, %arg14: memref<8x128xf32, #tpu.memory_space<vmem>>, %arg15: memref<3x8x1024xf32, #tpu.memory_space<vmem>>, %arg16: memref<8x256xf32, #tpu.memory_space<vmem>>, %arg17: memref<8x256xf32, #tpu.memory_space<vmem>>, %arg18: memref<8x32xf32, #tpu.memory_space<vmem>>, %arg19: memref<8x256xf32, #tpu.memory_space<vmem>>) attributes {dimension_semantics = [#tpu.dimension_semantics<parallel>], iteration_bounds = array<i64: 1>, scalar_prefetch = 0 : i64, scratch_operands = 5 : i64, tpu.core_type = #tpu.core_type<tc>, window_params = [{transform_indices = @transform_0, window_bounds = array<i64: 8, 16>}, {pipeline_mode = #tpu.pipeline_mode<synchronous>, transform_indices = @transform_1, window_bounds = array<i64: 16, 128>}, {pipeline_mode = #tpu.pipeline_mode<synchronous>, transform_indices = @transform_2, window_bounds = array<i64: 1, 128>}, {transform_indices = @transform_3, window_bounds = array<i64: 3, 8, 64>}, {pipeline_mode = #tpu.pipeline_mode<synchronous>, transform_indices = @transform_4, window_bounds = array<i64: 64, 1024>}, {pipeline_mode = #tpu.pipeline_mode<synchronous>, transform_indices = @transform_5, window_bounds = array<i64: 1, 1024>}, {pipeline_mode = #tpu.pipeline_mode<synchronous>, transform_indices = @transform_6, window_bounds = array<i64: 256, 1024>}, {pipeline_mode = #tpu.pipeline_mode<synchronous>, transform_indices = @transform_7, window_bounds = array<i64: 1, 256>}, {pipeline_mode = #tpu.pipeline_mode<synchronous>, transform_indices = @transform_8, window_bounds = array<i64: 1, 256>}, {pipeline_mode = #tpu.pipeline_mode<synchronous>, transform_indices = @transform_9, window_bounds = array<i64: 256, 32>}, {pipeline_mode = #tpu.pipeline_mode<synchronous>, transform_indices = @transform_10, window_bounds = array<i64: 256, 96>}, {transform_indices = @transform_11, window_bounds = array<i64: 3, 8, 32>}, {transform_indices = @transform_12, window_bounds = array<i64: 8, 1>}, {transform_indices = @transform_13, window_bounds = array<i64: 8, 128>}]} {
    %c0 = arith.constant 0 : index
    %c0_0 = arith.constant 0 : index
    %0 = vector.load %arg1[%c0, %c0_0] : memref<8x16xf32, #tpu.memory_space<vmem>>, vector<8x16xf32>
    %c0_1 = arith.constant 0 : index
    %c0_2 = arith.constant 0 : index
    %1 = vector.load %arg2[%c0_1, %c0_2] : memref<16x128xf32, #tpu.memory_space<vmem>>, vector<16x128xf32>
    %cst = arith.constant dense<0.000000e+00> : vector<8x128xf32>
    %2 = tpu.matmul %0, %1, %cst {dimension_numbers = #tpu.dot_dimension_numbers<[1], [0], [0], [1], [0, 0, 1, 1], [], []>} : vector<8x16xf32>, vector<16x128xf32>, vector<8x128xf32> -> vector<8x128xf32>
    %c0_3 = arith.constant 0 : index
    %c0_4 = arith.constant 0 : index
    %3 = vector.load %arg3[%c0_3, %c0_4] : memref<1x128xf32, #tpu.memory_space<vmem>>, vector<1x128xf32>
    %4 = vector.broadcast %3 : vector<1x128xf32> to vector<8x128xf32>
    %5 = arith.addf %2, %4 : vector<8x128xf32>
    %c0_5 = arith.constant 0 : index
    %c0_6 = arith.constant 0 : index
    %6 = vector.load %arg5[%c0_5, %c0_6] : memref<64x1024xf32, #tpu.memory_space<vmem>>, vector<64x1024xf32>
    %c0_7 = arith.constant 0 : index
    %c0_8 = arith.constant 0 : index
    %7 = vector.load %arg6[%c0_7, %c0_8] : memref<1x1024xf32, #tpu.memory_space<vmem>>, vector<1x1024xf32>
    %c0_i32 = arith.constant 0 : i32
    %8 = arith.index_cast %c0_i32 : i32 to index
    %c0_9 = arith.constant 0 : index
    %c0_10 = arith.constant 0 : index
    %9 = vector.load %arg4[%8, %c0_9, %c0_10] : memref<3x8x64xf32, #tpu.memory_space<vmem>>, vector<1x8x64xf32>
    %10 = vector.shape_cast %9 : vector<1x8x64xf32> to vector<8x64xf32>
    %cst_11 = arith.constant dense<0.000000e+00> : vector<8x1024xf32>
    %11 = tpu.matmul %10, %6, %cst_11 {dimension_numbers = #tpu.dot_dimension_numbers<[1], [0], [0], [1], [0, 0, 1, 1], [], []>} : vector<8x64xf32>, vector<64x1024xf32>, vector<8x1024xf32> -> vector<8x1024xf32>
    %12 = vector.broadcast %7 : vector<1x1024xf32> to vector<8x1024xf32>
    %13 = arith.addf %11, %12 : vector<8x1024xf32>
    %14 = arith.index_cast %c0_i32 : i32 to index
    %c0_12 = arith.constant 0 : index
    %c0_13 = arith.constant 0 : index
    %15 = vector.load %arg15[%14, %c0_12, %c0_13] : memref<3x8x1024xf32, #tpu.memory_space<vmem>>, vector<1x8x1024xf32>
    %16 = vector.shape_cast %15 : vector<1x8x1024xf32> to vector<8x1024xf32>
    %17 = vector.shape_cast %13 : vector<8x1024xf32> to vector<1x8x1024xf32>
    tpu.vector_store %arg15[%14, %c0_12, %c0_13], %17 {strides = array<i32>} : memref<3x8x1024xf32, #tpu.memory_space<vmem>>, vector<1x8x1024xf32>,
    %c1_i32 = arith.constant 1 : i32
    %18 = arith.index_cast %c1_i32 : i32 to index
    %c0_14 = arith.constant 0 : index
    %c0_15 = arith.constant 0 : index
    %19 = vector.load %arg4[%18, %c0_14, %c0_15] : memref<3x8x64xf32, #tpu.memory_space<vmem>>, vector<1x8x64xf32>
    %20 = vector.shape_cast %19 : vector<1x8x64xf32> to vector<8x64xf32>
    %cst_16 = arith.constant dense<0.000000e+00> : vector<8x1024xf32>
    %21 = tpu.matmul %20, %6, %cst_16 {dimension_numbers = #tpu.dot_dimension_numbers<[1], [0], [0], [1], [0, 0, 1, 1], [], []>} : vector<8x64xf32>, vector<64x1024xf32>, vector<8x1024xf32> -> vector<8x1024xf32>
    %22 = vector.broadcast %7 : vector<1x1024xf32> to vector<8x1024xf32>
    %23 = arith.addf %21, %22 : vector<8x1024xf32>
    %24 = arith.index_cast %c1_i32 : i32 to index
    %c0_17 = arith.constant 0 : index
    %c0_18 = arith.constant 0 : index
    %25 = vector.load %arg15[%24, %c0_17, %c0_18] : memref<3x8x1024xf32, #tpu.memory_space<vmem>>, vector<1x8x1024xf32>
    %26 = vector.shape_cast %25 : vector<1x8x1024xf32> to vector<8x1024xf32>
    %27 = vector.shape_cast %23 : vector<8x1024xf32> to vector<1x8x1024xf32>
    tpu.vector_store %arg15[%24, %c0_17, %c0_18], %27 {strides = array<i32>} : memref<3x8x1024xf32, #tpu.memory_space<vmem>>, vector<1x8x1024xf32>,
    %c2_i32 = arith.constant 2 : i32
    %28 = arith.index_cast %c2_i32 : i32 to index
    %c0_19 = arith.constant 0 : index
    %c0_20 = arith.constant 0 : index
    %29 = vector.load %arg4[%28, %c0_19, %c0_20] : memref<3x8x64xf32, #tpu.memory_space<vmem>>, vector<1x8x64xf32>
    %30 = vector.shape_cast %29 : vector<1x8x64xf32> to vector<8x64xf32>
    %cst_21 = arith.constant dense<0.000000e+00> : vector<8x1024xf32>
    %31 = tpu.matmul %30, %6, %cst_21 {dimension_numbers = #tpu.dot_dimension_numbers<[1], [0], [0], [1], [0, 0, 1, 1], [], []>} : vector<8x64xf32>, vector<64x1024xf32>, vector<8x1024xf32> -> vector<8x1024xf32>
    %32 = vector.broadcast %7 : vector<1x1024xf32> to vector<8x1024xf32>
    %33 = arith.addf %31, %32 : vector<8x1024xf32>
    %34 = arith.index_cast %c2_i32 : i32 to index
    %c0_22 = arith.constant 0 : index
    %c0_23 = arith.constant 0 : index
    %35 = vector.load %arg15[%34, %c0_22, %c0_23] : memref<3x8x1024xf32, #tpu.memory_space<vmem>>, vector<1x8x1024xf32>
    %36 = vector.shape_cast %35 : vector<1x8x1024xf32> to vector<8x1024xf32>
    %37 = vector.shape_cast %33 : vector<8x1024xf32> to vector<1x8x1024xf32>
    tpu.vector_store %arg15[%34, %c0_22, %c0_23], %37 {strides = array<i32>} : memref<3x8x1024xf32, #tpu.memory_space<vmem>>, vector<1x8x1024xf32>,
    %c3_i32 = arith.constant 3 : i32
    %c0_24 = arith.constant 0 : index
    %c0_25 = arith.constant 0 : index
    %38 = vector.load %arg8[%c0_24, %c0_25] : memref<1x256xf32, #tpu.memory_space<vmem>>, vector<1x256xf32>
    %39 = vector.shape_cast %38 : vector<1x256xf32> to vector<1x256xf32>
    %40 = vector.broadcast %39 : vector<1x256xf32> to vector<8x256xf32>
    %c0_26 = arith.constant 0 : index
    %c0_27 = arith.constant 0 : index
    %41 = vector.load %arg16[%c0_26, %c0_27] : memref<8x256xf32, #tpu.memory_space<vmem>>, vector<8x256xf32>
    tpu.vector_store %arg16[%c0_26, %c0_27], %40 {strides = array<i32>} : memref<8x256xf32, #tpu.memory_space<vmem>>, vector<8x256xf32>,
    %c0_28 = arith.constant 0 : index
    %c0_29 = arith.constant 0 : index
    %42 = vector.load %arg9[%c0_28, %c0_29] : memref<1x256xf32, #tpu.memory_space<vmem>>, vector<1x256xf32>
    %43 = vector.shape_cast %42 : vector<1x256xf32> to vector<1x256xf32>
    %44 = vector.broadcast %43 : vector<1x256xf32> to vector<8x256xf32>
    %c0_30 = arith.constant 0 : index
    %c0_31 = arith.constant 0 : index
    %45 = vector.load %arg17[%c0_30, %c0_31] : memref<8x256xf32, #tpu.memory_space<vmem>>, vector<8x256xf32>
    tpu.vector_store %arg17[%c0_30, %c0_31], %44 {strides = array<i32>} : memref<8x256xf32, #tpu.memory_space<vmem>>, vector<8x256xf32>,
    %cst_32 = arith.constant 0.000000e+00 : f32
    %46 = vector.broadcast %cst_32 : f32 to vector<8x32xf32>
    %c0_33 = arith.constant 0 : index
    %c0_34 = arith.constant 0 : index
    %47 = vector.load %arg18[%c0_33, %c0_34] : memref<8x32xf32, #tpu.memory_space<vmem>>, vector<8x32xf32>
    tpu.vector_store %arg18[%c0_33, %c0_34], %46 {strides = array<i32>} : memref<8x32xf32, #tpu.memory_space<vmem>>, vector<8x32xf32>,
    %cst_35 = arith.constant 0.000000e+00 : f32
    %48 = vector.broadcast %cst_35 : f32 to vector<8x256xf32>
    %c0_36 = arith.constant 0 : index
    %c0_37 = arith.constant 0 : index
    %49 = vector.load %arg19[%c0_36, %c0_37] : memref<8x256xf32, #tpu.memory_space<vmem>>, vector<8x256xf32>
    tpu.vector_store %arg19[%c0_36, %c0_37], %48 {strides = array<i32>} : memref<8x256xf32, #tpu.memory_space<vmem>>, vector<8x256xf32>,
    %c0_38 = arith.constant 0 : index
    %c0_39 = arith.constant 0 : index
    %50 = vector.load %arg7[%c0_38, %c0_39] : memref<256x1024xf32, #tpu.memory_space<vmem>>, vector<256x1024xf32>
    %c0_40 = arith.constant 0 : index
    %c0_41 = arith.constant 0 : index
    %51 = vector.load %arg10[%c0_40, %c0_41] : memref<256x32xf32, #tpu.memory_space<vmem>>, vector<256x32xf32>
    %c0_42 = arith.constant 0 : index
    %c0_43 = arith.constant 0 : index
    %52 = vector.load %arg13[%c0_42, %c0_43] : memref<8x1xi32, #tpu.memory_space<vmem>>, vector<8x1xi32>
    %53 = vector.extract_strided_slice %5 {offsets = [0, 0], sizes = [8, 32], strides = [1, 1]} : vector<8x128xf32> to vector<8x32xf32>
    %c0_i32_44 = arith.constant 0 : i32
    %c0_45 = arith.constant 0 : index
    %c0_46 = arith.constant 0 : index
    %54 = vector.load %arg16[%c0_45, %c0_46] : memref<8x256xf32, #tpu.memory_space<vmem>>, vector<8x256xf32>
    %c0_47 = arith.constant 0 : index
    %c0_48 = arith.constant 0 : index
    %55 = vector.load %arg17[%c0_47, %c0_48] : memref<8x256xf32, #tpu.memory_space<vmem>>, vector<8x256xf32>
    %56 = arith.index_cast %c0_i32_44 : i32 to index
    %c0_49 = arith.constant 0 : index
    %c0_50 = arith.constant 0 : index
    %57 = vector.load %arg15[%56, %c0_49, %c0_50] : memref<3x8x1024xf32, #tpu.memory_space<vmem>>, vector<1x8x1024xf32>
    %58 = vector.shape_cast %57 : vector<1x8x1024xf32> to vector<8x1024xf32>
    %cst_51 = arith.constant dense<0.000000e+00> : vector<8x1024xf32>
    %59 = tpu.matmul %54, %50, %cst_51 {dimension_numbers = #tpu.dot_dimension_numbers<[1], [0], [0], [1], [0, 0, 1, 1], [], []>} : vector<8x256xf32>, vector<256x1024xf32>, vector<8x1024xf32> -> vector<8x1024xf32>
    %60 = arith.addf %58, %59 : vector<8x1024xf32>
    %61 = vector.extract_strided_slice %60 {offsets = [0, 0], sizes = [8, 256], strides = [1, 1]} : vector<8x1024xf32> to vector<8x256xf32>
    %62 = arith.negf %61 : vector<8x256xf32>
    %63 = math.exp %62 : vector<8x256xf32>
    %cst_52 = arith.constant 1.000000e+00 : f32
    %64 = vector.broadcast %cst_52 : f32 to vector<8x256xf32>
    %65 = arith.addf %64, %63 : vector<8x256xf32>
    %66 = arith.divf %64, %65 : vector<8x256xf32>
    %67 = vector.extract_strided_slice %60 {offsets = [0, 256], sizes = [8, 256], strides = [1, 1]} : vector<8x1024xf32> to vector<8x256xf32>
    %68 = arith.negf %67 : vector<8x256xf32>
    %69 = math.exp %68 : vector<8x256xf32>
    %cst_53 = arith.constant 1.000000e+00 : f32
    %70 = vector.broadcast %cst_53 : f32 to vector<8x256xf32>
    %71 = arith.addf %70, %69 : vector<8x256xf32>
    %72 = arith.divf %70, %71 : vector<8x256xf32>
    %73 = vector.extract_strided_slice %60 {offsets = [0, 512], sizes = [8, 256], strides = [1, 1]} : vector<8x1024xf32> to vector<8x256xf32>
    %74 = math.tanh %73 : vector<8x256xf32>
    %75 = vector.extract_strided_slice %60 {offsets = [0, 768], sizes = [8, 256], strides = [1, 1]} : vector<8x1024xf32> to vector<8x256xf32>
    %76 = arith.negf %75 : vector<8x256xf32>
    %77 = math.exp %76 : vector<8x256xf32>
    %cst_54 = arith.constant 1.000000e+00 : f32
    %78 = vector.broadcast %cst_54 : f32 to vector<8x256xf32>
    %79 = arith.addf %78, %77 : vector<8x256xf32>
    %80 = arith.divf %78, %79 : vector<8x256xf32>
    %81 = arith.mulf %72, %55 : vector<8x256xf32>
    %82 = arith.mulf %66, %74 : vector<8x256xf32>
    %83 = arith.addf %81, %82 : vector<8x256xf32>
    %84 = math.tanh %83 : vector<8x256xf32>
    %85 = arith.mulf %80, %84 : vector<8x256xf32>
    %c0_55 = arith.constant 0 : index
    %c0_56 = arith.constant 0 : index
    %86 = vector.load %arg16[%c0_55, %c0_56] : memref<8x256xf32, #tpu.memory_space<vmem>>, vector<8x256xf32>
    tpu.vector_store %arg16[%c0_55, %c0_56], %85 {strides = array<i32>} : memref<8x256xf32, #tpu.memory_space<vmem>>, vector<8x256xf32>,
    %c0_57 = arith.constant 0 : index
    %c0_58 = arith.constant 0 : index
    %87 = vector.load %arg17[%c0_57, %c0_58] : memref<8x256xf32, #tpu.memory_space<vmem>>, vector<8x256xf32>
    tpu.vector_store %arg17[%c0_57, %c0_58], %83 {strides = array<i32>} : memref<8x256xf32, #tpu.memory_space<vmem>>, vector<8x256xf32>,
    %cst_59 = arith.constant dense<0.000000e+00> : vector<8x32xf32>
    %88 = tpu.matmul %85, %51, %cst_59 {dimension_numbers = #tpu.dot_dimension_numbers<[1], [0], [0], [1], [0, 0, 1, 1], [], []>} : vector<8x256xf32>, vector<256x32xf32>, vector<8x32xf32> -> vector<8x32xf32>
    %c0_60 = arith.constant 0 : index
    %c0_61 = arith.constant 0 : index
    %89 = vector.load %arg18[%c0_60, %c0_61] : memref<8x32xf32, #tpu.memory_space<vmem>>, vector<8x32xf32>
    %90 = arith.addf %53, %88 : vector<8x32xf32>
    %91 = arith.negf %90 : vector<8x32xf32>
    %92 = math.exp %91 : vector<8x32xf32>
    %cst_62 = arith.constant 1.000000e+00 : f32
    %93 = vector.broadcast %cst_62 : f32 to vector<8x32xf32>
    %94 = arith.addf %93, %92 : vector<8x32xf32>
    %95 = arith.divf %93, %94 : vector<8x32xf32>
    %96 = arith.index_cast %c0_i32_44 : i32 to index
    %c0_63 = arith.constant 0 : index
    %c0_64 = arith.constant 0 : index
    %97 = vector.load %arg12[%96, %c0_63, %c0_64] : memref<3x8x32xf32, #tpu.memory_space<vmem>>, vector<1x8x32xf32>
    %98 = vector.shape_cast %97 : vector<1x8x32xf32> to vector<8x32xf32>
    %99 = arith.mulf %95, %98 : vector<8x32xf32>
    %100 = arith.addf %89, %99 : vector<8x32xf32>
    %c0_65 = arith.constant 0 : index
    %c0_66 = arith.constant 0 : index
    %101 = vector.load %arg18[%c0_65, %c0_66] : memref<8x32xf32, #tpu.memory_space<vmem>>, vector<8x32xf32>
    tpu.vector_store %arg18[%c0_65, %c0_66], %100 {strides = array<i32>} : memref<8x32xf32, #tpu.memory_space<vmem>>, vector<8x32xf32>,
    %102 = vector.broadcast %c0_i32_44 : i32 to vector<8x1xi32>
    %103 = arith.cmpi eq, %52, %102 : vector<8x1xi32>
    %104 = arith.extui %103 : vector<8x1xi1> to vector<8x1xi32>
    %105 = arith.sitofp %104 : vector<8x1xi32> to vector<8x1xf32>
    %c0_67 = arith.constant 0 : index
    %c0_68 = arith.constant 0 : index
    %106 = vector.load %arg19[%c0_67, %c0_68] : memref<8x256xf32, #tpu.memory_space<vmem>>, vector<8x256xf32>
    %107 = vector.broadcast %105 : vector<8x1xf32> to vector<8x256xf32>
    %108 = arith.mulf %107, %85 : vector<8x256xf32>
    %109 = arith.addf %106, %108 : vector<8x256xf32>
    %c0_69 = arith.constant 0 : index
    %c0_70 = arith.constant 0 : index
    %110 = vector.load %arg19[%c0_69, %c0_70] : memref<8x256xf32, #tpu.memory_space<vmem>>, vector<8x256xf32>
    tpu.vector_store %arg19[%c0_69, %c0_70], %109 {strides = array<i32>} : memref<8x256xf32, #tpu.memory_space<vmem>>, vector<8x256xf32>,
    %c1_i32_71 = arith.constant 1 : i32
    %c0_72 = arith.constant 0 : index
    %c0_73 = arith.constant 0 : index
    %111 = vector.load %arg16[%c0_72, %c0_73] : memref<8x256xf32, #tpu.memory_space<vmem>>, vector<8x256xf32>
    %c0_74 = arith.constant 0 : index
    %c0_75 = arith.constant 0 : index
    %112 = vector.load %arg17[%c0_74, %c0_75] : memref<8x256xf32, #tpu.memory_space<vmem>>, vector<8x256xf32>
    %113 = arith.index_cast %c1_i32_71 : i32 to index
    %c0_76 = arith.constant 0 : index
    %c0_77 = arith.constant 0 : index
    %114 = vector.load %arg15[%113, %c0_76, %c0_77] : memref<3x8x1024xf32, #tpu.memory_space<vmem>>, vector<1x8x1024xf32>
    %115 = vector.shape_cast %114 : vector<1x8x1024xf32> to vector<8x1024xf32>
    %cst_78 = arith.constant dense<0.000000e+00> : vector<8x1024xf32>
    %116 = tpu.matmul %111, %50, %cst_78 {dimension_numbers = #tpu.dot_dimension_numbers<[1], [0], [0], [1], [0, 0, 1, 1], [], []>} : vector<8x256xf32>, vector<256x1024xf32>, vector<8x1024xf32> -> vector<8x1024xf32>
    %117 = arith.addf %115, %116 : vector<8x1024xf32>
    %118 = vector.extract_strided_slice %117 {offsets = [0, 0], sizes = [8, 256], strides = [1, 1]} : vector<8x1024xf32> to vector<8x256xf32>
    %119 = arith.negf %118 : vector<8x256xf32>
    %120 = math.exp %119 : vector<8x256xf32>
    %cst_79 = arith.constant 1.000000e+00 : f32
    %121 = vector.broadcast %cst_79 : f32 to vector<8x256xf32>
    %122 = arith.addf %121, %120 : vector<8x256xf32>
    %123 = arith.divf %121, %122 : vector<8x256xf32>
    %124 = vector.extract_strided_slice %117 {offsets = [0, 256], sizes = [8, 256], strides = [1, 1]} : vector<8x1024xf32> to vector<8x256xf32>
    %125 = arith.negf %124 : vector<8x256xf32>
    %126 = math.exp %125 : vector<8x256xf32>
    %cst_80 = arith.constant 1.000000e+00 : f32
    %127 = vector.broadcast %cst_80 : f32 to vector<8x256xf32>
    %128 = arith.addf %127, %126 : vector<8x256xf32>
    %129 = arith.divf %127, %128 : vector<8x256xf32>
    %130 = vector.extract_strided_slice %117 {offsets = [0, 512], sizes = [8, 256], strides = [1, 1]} : vector<8x1024xf32> to vector<8x256xf32>
    %131 = math.tanh %130 : vector<8x256xf32>
    %132 = vector.extract_strided_slice %117 {offsets = [0, 768], sizes = [8, 256], strides = [1, 1]} : vector<8x1024xf32> to vector<8x256xf32>
    %133 = arith.negf %132 : vector<8x256xf32>
    %134 = math.exp %133 : vector<8x256xf32>
    %cst_81 = arith.constant 1.000000e+00 : f32
    %135 = vector.broadcast %cst_81 : f32 to vector<8x256xf32>
    %136 = arith.addf %135, %134 : vector<8x256xf32>
    %137 = arith.divf %135, %136 : vector<8x256xf32>
    %138 = arith.mulf %129, %112 : vector<8x256xf32>
    %139 = arith.mulf %123, %131 : vector<8x256xf32>
    %140 = arith.addf %138, %139 : vector<8x256xf32>
    %141 = math.tanh %140 : vector<8x256xf32>
    %142 = arith.mulf %137, %141 : vector<8x256xf32>
    %c0_82 = arith.constant 0 : index
    %c0_83 = arith.constant 0 : index
    %143 = vector.load %arg16[%c0_82, %c0_83] : memref<8x256xf32, #tpu.memory_space<vmem>>, vector<8x256xf32>
    tpu.vector_store %arg16[%c0_82, %c0_83], %142 {strides = array<i32>} : memref<8x256xf32, #tpu.memory_space<vmem>>, vector<8x256xf32>,
    %c0_84 = arith.constant 0 : index
    %c0_85 = arith.constant 0 : index
    %144 = vector.load %arg17[%c0_84, %c0_85] : memref<8x256xf32, #tpu.memory_space<vmem>>, vector<8x256xf32>
    tpu.vector_store %arg17[%c0_84, %c0_85], %140 {strides = array<i32>} : memref<8x256xf32, #tpu.memory_space<vmem>>, vector<8x256xf32>,
    %cst_86 = arith.constant dense<0.000000e+00> : vector<8x32xf32>
    %145 = tpu.matmul %142, %51, %cst_86 {dimension_numbers = #tpu.dot_dimension_numbers<[1], [0], [0], [1], [0, 0, 1, 1], [], []>} : vector<8x256xf32>, vector<256x32xf32>, vector<8x32xf32> -> vector<8x32xf32>
    %c0_87 = arith.constant 0 : index
    %c0_88 = arith.constant 0 : index
    %146 = vector.load %arg18[%c0_87, %c0_88] : memref<8x32xf32, #tpu.memory_space<vmem>>, vector<8x32xf32>
    %147 = arith.addf %53, %145 : vector<8x32xf32>
    %148 = arith.negf %147 : vector<8x32xf32>
    %149 = math.exp %148 : vector<8x32xf32>
    %cst_89 = arith.constant 1.000000e+00 : f32
    %150 = vector.broadcast %cst_89 : f32 to vector<8x32xf32>
    %151 = arith.addf %150, %149 : vector<8x32xf32>
    %152 = arith.divf %150, %151 : vector<8x32xf32>
    %153 = arith.index_cast %c1_i32_71 : i32 to index
    %c0_90 = arith.constant 0 : index
    %c0_91 = arith.constant 0 : index
    %154 = vector.load %arg12[%153, %c0_90, %c0_91] : memref<3x8x32xf32, #tpu.memory_space<vmem>>, vector<1x8x32xf32>
    %155 = vector.shape_cast %154 : vector<1x8x32xf32> to vector<8x32xf32>
    %156 = arith.mulf %152, %155 : vector<8x32xf32>
    %157 = arith.addf %146, %156 : vector<8x32xf32>
    %c0_92 = arith.constant 0 : index
    %c0_93 = arith.constant 0 : index
    %158 = vector.load %arg18[%c0_92, %c0_93] : memref<8x32xf32, #tpu.memory_space<vmem>>, vector<8x32xf32>
    tpu.vector_store %arg18[%c0_92, %c0_93], %157 {strides = array<i32>} : memref<8x32xf32, #tpu.memory_space<vmem>>, vector<8x32xf32>,
    %159 = vector.broadcast %c1_i32_71 : i32 to vector<8x1xi32>
    %160 = arith.cmpi eq, %52, %159 : vector<8x1xi32>
    %161 = arith.extui %160 : vector<8x1xi1> to vector<8x1xi32>
    %162 = arith.sitofp %161 : vector<8x1xi32> to vector<8x1xf32>
    %c0_94 = arith.constant 0 : index
    %c0_95 = arith.constant 0 : index
    %163 = vector.load %arg19[%c0_94, %c0_95] : memref<8x256xf32, #tpu.memory_space<vmem>>, vector<8x256xf32>
    %164 = vector.broadcast %162 : vector<8x1xf32> to vector<8x256xf32>
    %165 = arith.mulf %164, %142 : vector<8x256xf32>
    %166 = arith.addf %163, %165 : vector<8x256xf32>
    %c0_96 = arith.constant 0 : index
    %c0_97 = arith.constant 0 : index
    %167 = vector.load %arg19[%c0_96, %c0_97] : memref<8x256xf32, #tpu.memory_space<vmem>>, vector<8x256xf32>
    tpu.vector_store %arg19[%c0_96, %c0_97], %166 {strides = array<i32>} : memref<8x256xf32, #tpu.memory_space<vmem>>, vector<8x256xf32>,
    %c2_i32_98 = arith.constant 2 : i32
    %c0_99 = arith.constant 0 : index
    %c0_100 = arith.constant 0 : index
    %168 = vector.load %arg16[%c0_99, %c0_100] : memref<8x256xf32, #tpu.memory_space<vmem>>, vector<8x256xf32>
    %c0_101 = arith.constant 0 : index
    %c0_102 = arith.constant 0 : index
    %169 = vector.load %arg17[%c0_101, %c0_102] : memref<8x256xf32, #tpu.memory_space<vmem>>, vector<8x256xf32>
    %170 = arith.index_cast %c2_i32_98 : i32 to index
    %c0_103 = arith.constant 0 : index
    %c0_104 = arith.constant 0 : index
    %171 = vector.load %arg15[%170, %c0_103, %c0_104] : memref<3x8x1024xf32, #tpu.memory_space<vmem>>, vector<1x8x1024xf32>
    %172 = vector.shape_cast %171 : vector<1x8x1024xf32> to vector<8x1024xf32>
    %cst_105 = arith.constant dense<0.000000e+00> : vector<8x1024xf32>
    %173 = tpu.matmul %168, %50, %cst_105 {dimension_numbers = #tpu.dot_dimension_numbers<[1], [0], [0], [1], [0, 0, 1, 1], [], []>} : vector<8x256xf32>, vector<256x1024xf32>, vector<8x1024xf32> -> vector<8x1024xf32>
    %174 = arith.addf %172, %173 : vector<8x1024xf32>
    %175 = vector.extract_strided_slice %174 {offsets = [0, 0], sizes = [8, 256], strides = [1, 1]} : vector<8x1024xf32> to vector<8x256xf32>
    %176 = arith.negf %175 : vector<8x256xf32>
    %177 = math.exp %176 : vector<8x256xf32>
    %cst_106 = arith.constant 1.000000e+00 : f32
    %178 = vector.broadcast %cst_106 : f32 to vector<8x256xf32>
    %179 = arith.addf %178, %177 : vector<8x256xf32>
    %180 = arith.divf %178, %179 : vector<8x256xf32>
    %181 = vector.extract_strided_slice %174 {offsets = [0, 256], sizes = [8, 256], strides = [1, 1]} : vector<8x1024xf32> to vector<8x256xf32>
    %182 = arith.negf %181 : vector<8x256xf32>
    %183 = math.exp %182 : vector<8x256xf32>
    %cst_107 = arith.constant 1.000000e+00 : f32
    %184 = vector.broadcast %cst_107 : f32 to vector<8x256xf32>
    %185 = arith.addf %184, %183 : vector<8x256xf32>
    %186 = arith.divf %184, %185 : vector<8x256xf32>
    %187 = vector.extract_strided_slice %174 {offsets = [0, 512], sizes = [8, 256], strides = [1, 1]} : vector<8x1024xf32> to vector<8x256xf32>
    %188 = math.tanh %187 : vector<8x256xf32>
    %189 = vector.extract_strided_slice %174 {offsets = [0, 768], sizes = [8, 256], strides = [1, 1]} : vector<8x1024xf32> to vector<8x256xf32>
    %190 = arith.negf %189 : vector<8x256xf32>
    %191 = math.exp %190 : vector<8x256xf32>
    %cst_108 = arith.constant 1.000000e+00 : f32
    %192 = vector.broadcast %cst_108 : f32 to vector<8x256xf32>
    %193 = arith.addf %192, %191 : vector<8x256xf32>
    %194 = arith.divf %192, %193 : vector<8x256xf32>
    %195 = arith.mulf %186, %169 : vector<8x256xf32>
    %196 = arith.mulf %180, %188 : vector<8x256xf32>
    %197 = arith.addf %195, %196 : vector<8x256xf32>
    %198 = math.tanh %197 : vector<8x256xf32>
    %199 = arith.mulf %194, %198 : vector<8x256xf32>
    %c0_109 = arith.constant 0 : index
    %c0_110 = arith.constant 0 : index
    %200 = vector.load %arg16[%c0_109, %c0_110] : memref<8x256xf32, #tpu.memory_space<vmem>>, vector<8x256xf32>
    tpu.vector_store %arg16[%c0_109, %c0_110], %199 {strides = array<i32>} : memref<8x256xf32, #tpu.memory_space<vmem>>, vector<8x256xf32>,
    %c0_111 = arith.constant 0 : index
    %c0_112 = arith.constant 0 : index
    %201 = vector.load %arg17[%c0_111, %c0_112] : memref<8x256xf32, #tpu.memory_space<vmem>>, vector<8x256xf32>
    tpu.vector_store %arg17[%c0_111, %c0_112], %197 {strides = array<i32>} : memref<8x256xf32, #tpu.memory_space<vmem>>, vector<8x256xf32>,
    %cst_113 = arith.constant dense<0.000000e+00> : vector<8x32xf32>
    %202 = tpu.matmul %199, %51, %cst_113 {dimension_numbers = #tpu.dot_dimension_numbers<[1], [0], [0], [1], [0, 0, 1, 1], [], []>} : vector<8x256xf32>, vector<256x32xf32>, vector<8x32xf32> -> vector<8x32xf32>
    %c0_114 = arith.constant 0 : index
    %c0_115 = arith.constant 0 : index
    %203 = vector.load %arg18[%c0_114, %c0_115] : memref<8x32xf32, #tpu.memory_space<vmem>>, vector<8x32xf32>
    %204 = arith.addf %53, %202 : vector<8x32xf32>
    %205 = arith.negf %204 : vector<8x32xf32>
    %206 = math.exp %205 : vector<8x32xf32>
    %cst_116 = arith.constant 1.000000e+00 : f32
    %207 = vector.broadcast %cst_116 : f32 to vector<8x32xf32>
    %208 = arith.addf %207, %206 : vector<8x32xf32>
    %209 = arith.divf %207, %208 : vector<8x32xf32>
    %210 = arith.index_cast %c2_i32_98 : i32 to index
    %c0_117 = arith.constant 0 : index
    %c0_118 = arith.constant 0 : index
    %211 = vector.load %arg12[%210, %c0_117, %c0_118] : memref<3x8x32xf32, #tpu.memory_space<vmem>>, vector<1x8x32xf32>
    %212 = vector.shape_cast %211 : vector<1x8x32xf32> to vector<8x32xf32>
    %213 = arith.mulf %209, %212 : vector<8x32xf32>
    %214 = arith.addf %203, %213 : vector<8x32xf32>
    %c0_119 = arith.constant 0 : index
    %c0_120 = arith.constant 0 : index
    %215 = vector.load %arg18[%c0_119, %c0_120] : memref<8x32xf32, #tpu.memory_space<vmem>>, vector<8x32xf32>
    tpu.vector_store %arg18[%c0_119, %c0_120], %214 {strides = array<i32>} : memref<8x32xf32, #tpu.memory_space<vmem>>, vector<8x32xf32>,
    %216 = vector.broadcast %c2_i32_98 : i32 to vector<8x1xi32>
    %217 = arith.cmpi eq, %52, %216 : vector<8x1xi32>
    %218 = arith.extui %217 : vector<8x1xi1> to vector<8x1xi32>
    %219 = arith.sitofp %218 : vector<8x1xi32> to vector<8x1xf32>
    %c0_121 = arith.constant 0 : index
    %c0_122 = arith.constant 0 : index
    %220 = vector.load %arg19[%c0_121, %c0_122] : memref<8x256xf32, #tpu.memory_space<vmem>>, vector<8x256xf32>
    %221 = vector.broadcast %219 : vector<8x1xf32> to vector<8x256xf32>
    %222 = arith.mulf %221, %199 : vector<8x256xf32>
    %223 = arith.addf %220, %222 : vector<8x256xf32>
    %c0_123 = arith.constant 0 : index
    %c0_124 = arith.constant 0 : index
    %224 = vector.load %arg19[%c0_123, %c0_124] : memref<8x256xf32, #tpu.memory_space<vmem>>, vector<8x256xf32>
    tpu.vector_store %arg19[%c0_123, %c0_124], %223 {strides = array<i32>} : memref<8x256xf32, #tpu.memory_space<vmem>>, vector<8x256xf32>,
    %c3_i32_125 = arith.constant 3 : i32
    %c0_126 = arith.constant 0 : index
    %c0_127 = arith.constant 0 : index
    %225 = vector.load %arg19[%c0_126, %c0_127] : memref<8x256xf32, #tpu.memory_space<vmem>>, vector<8x256xf32>
    %c0_128 = arith.constant 0 : index
    %c0_129 = arith.constant 0 : index
    %226 = vector.load %arg11[%c0_128, %c0_129] : memref<256x96xf32, #tpu.memory_space<vmem>>, vector<256x96xf32>
    %cst_130 = arith.constant dense<0.000000e+00> : vector<8x96xf32>
    %227 = tpu.matmul %225, %226, %cst_130 {dimension_numbers = #tpu.dot_dimension_numbers<[1], [0], [0], [1], [0, 0, 1, 1], [], []>} : vector<8x256xf32>, vector<256x96xf32>, vector<8x96xf32> -> vector<8x96xf32>
    %c0_131 = arith.constant 0 : index
    %c0_132 = arith.constant 0 : index
    %228 = vector.load %arg18[%c0_131, %c0_132] : memref<8x32xf32, #tpu.memory_space<vmem>>, vector<8x32xf32>
    %229 = vector.extract_strided_slice %227 {offsets = [0, 0], sizes = [8, 32], strides = [1, 1]} : vector<8x96xf32> to vector<8x32xf32>
    %230 = vector.extract_strided_slice %5 {offsets = [0, 32], sizes = [8, 32], strides = [1, 1]} : vector<8x128xf32> to vector<8x32xf32>
    %231 = arith.addf %229, %230 : vector<8x32xf32>
    %232 = arith.negf %231 : vector<8x32xf32>
    %233 = math.exp %232 : vector<8x32xf32>
    %cst_133 = arith.constant 1.000000e+00 : f32
    %234 = vector.broadcast %cst_133 : f32 to vector<8x32xf32>
    %235 = arith.addf %234, %233 : vector<8x32xf32>
    %236 = arith.divf %234, %235 : vector<8x32xf32>
    %237 = vector.extract_strided_slice %227 {offsets = [0, 32], sizes = [8, 32], strides = [1, 1]} : vector<8x96xf32> to vector<8x32xf32>
    %238 = vector.extract_strided_slice %5 {offsets = [0, 64], sizes = [8, 32], strides = [1, 1]} : vector<8x128xf32> to vector<8x32xf32>
    %239 = arith.addf %237, %238 : vector<8x32xf32>
    %240 = math.tanh %239 : vector<8x32xf32>
    %241 = vector.extract_strided_slice %227 {offsets = [0, 64], sizes = [8, 32], strides = [1, 1]} : vector<8x96xf32> to vector<8x32xf32>
    %242 = vector.extract_strided_slice %5 {offsets = [0, 96], sizes = [8, 32], strides = [1, 1]} : vector<8x128xf32> to vector<8x32xf32>
    %243 = arith.addf %241, %242 : vector<8x32xf32>
    %244 = arith.negf %243 : vector<8x32xf32>
    %245 = math.exp %244 : vector<8x32xf32>
    %cst_134 = arith.constant 1.000000e+00 : f32
    %246 = vector.broadcast %cst_134 : f32 to vector<8x32xf32>
    %247 = arith.addf %246, %245 : vector<8x32xf32>
    %248 = arith.divf %246, %247 : vector<8x32xf32>
    %249 = arith.mulf %236, %240 : vector<8x32xf32>
    %250 = arith.addf %249, %228 : vector<8x32xf32>
    %251 = math.tanh %250 : vector<8x32xf32>
    %252 = arith.mulf %248, %251 : vector<8x32xf32>
    %cst_135 = arith.constant 0.000000e+00 : f32
    %253 = vector.broadcast %cst_135 : f32 to vector<8x64xf32>
    %254 = tpu.concatenate %252, %250, %253 in 1 : vector<8x32xf32>, vector<8x32xf32>, vector<8x64xf32> -> vector<8x128xf32>
    %c0_136 = arith.constant 0 : index
    %c0_137 = arith.constant 0 : index
    %255 = vector.load %arg14[%c0_136, %c0_137] : memref<8x128xf32, #tpu.memory_space<vmem>>, vector<8x128xf32>
    tpu.vector_store %arg14[%c0_136, %c0_137], %254 {strides = array<i32>} : memref<8x128xf32, #tpu.memory_space<vmem>>, vector<8x128xf32>,
    return
  }
  func.func @transform_0(%arg0: i32) -> (i32, i32) {
    %c0_i32 = arith.constant 0 : i32
    %c0_i32_0 = arith.constant 0 : i32
    return %arg0, %c0_i32 : i32, i32
  }
  func.func @transform_1(%arg0: i32) -> (i32, i32) {
    %c0_i32 = arith.constant 0 : i32
    %c0_i32_0 = arith.constant 0 : i32
    %c0_i32_1 = arith.constant 0 : i32
    return %c0_i32, %c0_i32_0 : i32, i32
  }
  func.func @transform_2(%arg0: i32) -> (i32, i32) {
    %c0_i32 = arith.constant 0 : i32
    %c0_i32_0 = arith.constant 0 : i32
    %c0_i32_1 = arith.constant 0 : i32
    return %c0_i32, %c0_i32_0 : i32, i32
  }
  func.func @transform_3(%arg0: i32) -> (i32, i32, i32) {
    %c0_i32 = arith.constant 0 : i32
    %c0_i32_0 = arith.constant 0 : i32
    %c0_i32_1 = arith.constant 0 : i32
    return %c0_i32, %arg0, %c0_i32_0 : i32, i32, i32
  }
  func.func @transform_4(%arg0: i32) -> (i32, i32) {
    %c0_i32 = arith.constant 0 : i32
    %c0_i32_0 = arith.constant 0 : i32
    %c0_i32_1 = arith.constant 0 : i32
    return %c0_i32, %c0_i32_0 : i32, i32
  }
  func.func @transform_5(%arg0: i32) -> (i32, i32) {
    %c0_i32 = arith.constant 0 : i32
    %c0_i32_0 = arith.constant 0 : i32
    %c0_i32_1 = arith.constant 0 : i32
    return %c0_i32, %c0_i32_0 : i32, i32
  }
  func.func @transform_6(%arg0: i32) -> (i32, i32) {
    %c0_i32 = arith.constant 0 : i32
    %c0_i32_0 = arith.constant 0 : i32
    %c0_i32_1 = arith.constant 0 : i32
    return %c0_i32, %c0_i32_0 : i32, i32
  }
  func.func @transform_7(%arg0: i32) -> (i32, i32) {
    %c0_i32 = arith.constant 0 : i32
    %c0_i32_0 = arith.constant 0 : i32
    %c0_i32_1 = arith.constant 0 : i32
    return %c0_i32, %c0_i32_0 : i32, i32
  }
  func.func @transform_8(%arg0: i32) -> (i32, i32) {
    %c0_i32 = arith.constant 0 : i32
    %c0_i32_0 = arith.constant 0 : i32
    %c0_i32_1 = arith.constant 0 : i32
    return %c0_i32, %c0_i32_0 : i32, i32
  }
  func.func @transform_9(%arg0: i32) -> (i32, i32) {
    %c0_i32 = arith.constant 0 : i32
    %c0_i32_0 = arith.constant 0 : i32
    %c0_i32_1 = arith.constant 0 : i32
    return %c0_i32, %c0_i32_0 : i32, i32
  }
  func.func @transform_10(%arg0: i32) -> (i32, i32) {
    %c0_i32 = arith.constant 0 : i32
    %c0_i32_0 = arith.constant 0 : i32
    %c0_i32_1 = arith.constant 0 : i32
    return %c0_i32, %c0_i32_0 : i32, i32
  }
  func.func @transform_11(%arg0: i32) -> (i32, i32, i32) {
    %c0_i32 = arith.constant 0 : i32
    %c0_i32_0 = arith.constant 0 : i32
    %c0_i32_1 = arith.constant 0 : i32
    return %c0_i32, %arg0, %c0_i32_0 : i32, i32, i32
  }
  func.func @transform_12(%arg0: i32) -> (i32, i32) {
    %c0_i32 = arith.constant 0 : i32
    %c0_i32_0 = arith.constant 0 : i32
    return %arg0, %c0_i32 : i32, i32
  }
  func.func @transform_13(%arg0: i32) -> (i32, i32) {
    %c0_i32 = arith.constant 0 : i32
    %c0_i32_0 = arith.constant 0 : i32
    return %arg0, %c0_i32 : i32, i32
  }
}

</mosaic_0001>

<bundles_post_ra>
// kernel: forward_step_pallas.1
= control target key start
LH: loop header
LB: loop body
LE: loop exit
PB: predicated region body
PF: predicated region fallthrough
CT: control target
= control target key end

     0   :  { %18 = vsyncpa [#allocation8], 0  ;;  %s3605_s25 = smov [#allocation7]   ;;  %s5917_s0 = inlined_call_operand.vmem [shape: f32[8,16], index: 0, kind: input, shape index: {}]   ;;  %s5918_s1 = inlined_call_operand.vmem [shape: f32[16,128], index: 1, kind: input, shape index: {}]   ;;  %s5919_s2 = inlined_call_operand.vmem [shape: f32[1,128], index: 2, kind: input, shape index: {}]   ;;  %s5920_s3 = inlined_call_operand.vmem [shape: f32[3,8,64], index: 3, kind: input, shape index: {}]   ;;  %s5921_s4 = inlined_call_operand.vmem [shape: f32[64,1024], index: 4, kind: input, shape index: {}]   ;;  %s5922_s5 = inlined_call_operand.vmem [shape: f32[1,1024], index: 5, kind: input, shape index: {}]   ;;  %s5923_s6 = inlined_call_operand.hbm [shape: f32[256,1024], index: 6, kind: input, shape index: {}]   ;;  %s5924_s7 = inlined_call_operand.vmem [shape: f32[1,256], index: 7, kind: input, shape index: {}]   ;;  %s5925_s8 = inlined_call_operand.vmem [shape: f32[1,256], index: 8, kind: input, shape index: {}]   ;;  %s5926_s9 = inlined_call_operand.vmem [shape: f32[256,32], index: 9, kind: input, shape index: {}]   ;;  %s5927_s10 = inlined_call_operand.vmem [shape: f32[256,96], index: 10, kind: input, shape index: {}]   ;;  %s5928_s11 = inlined_call_operand.vmem [shape: f32[3,8,32], index: 11, kind: input, shape index: {}]   ;;  %s5929_s12 = inlined_call_operand.vmem [shape: s32[8,1], index: 12, kind: input, shape index: {}]   ;;  %s5930_s13 = inlined_call_operand.vmem [shape: f32[8,128], index: 13, kind: output, shape index: {}]  }
   0x1   :  { %s36_s26 = sshll.u32 %s3605_s25, 4  ;;  %s37_s26 = int_to_ptr.vmem [resolvable:$true] %s36_s26 }
   0x2   :  { %s3591_s27 = scalar_lea.vmem %s37_s26, 32768  ;;  %p3596_p1 = scmp.lt.s32.totalorder %s37_s26, %s37_s26 }
   0x3   :  { %p3592_p0 = scmp.ne.s32.totalorder %s37_s26, %s3591_s27  ;;  %p3597_p2 = scmp.lt.s32.totalorder %s3591_s27, %s3591_s27 }
   0x5   :  { %p3598_p3 = por %p3597_p2, %p3596_p1 }
   0x7   :  { %p3599_p4 = pnand %p3598_p3, %p3592_p0 }
   0x9   :  { %3602 = shalt.err (!%p3599_p4)
}
   0xa   :  { %s3606_s28 = smov 1024   ;;  %s3607_s29 = smov 64  }
   0xb   :  { %42 = dma.hbm_to_vmem [thread:$0]  %s5923_s6, 32768, %s37_s26, [#allocation8], %s3606_s28, %s3606_s28, %s3607_s29  }
   0xc   :  { %3603 = dma.done.wait [#allocation8], 32768  }
   0xd   :  { %3604 = vsyncadd [#allocation8], 4294934528  ;;  %v5931_v0 = vmov 0.0   ;;  %vm3609_vm0 = vmmov 0   ;;  %v60_v1 = vld [vmem:[%s5918_s1 + $0x8] sm:$0xff]  ;;  %v3701_v3 = vld [vmem:[%s5921_s4 + $0x1c0] sm:$0xff] }
   0xe   :  { %3157 = vmatprep.subr.mxu0 %v5931_v0  ;;  %3161 = vmatprep.mubr.msk.f32.mxu0 %vm3609_vm0, %v5931_v0  ;;  %v3696_v2 = vld [vmem:[%s5921_s4 + $0x1c8] sm:$0xff]  ;;  %v59_v4 = vld [vmem:[%s5918_s1] sm:$0xff]  ;;  %vm68_vm1 = vcmask 130048   ;;  %v3725_v8 = vld [vmem:[%s5921_s4 + $0x1d8] sm:$0xff]  ;;  %vm249_vm2 = vcmask 523264   ;;  %vm1169_vm5 = vcmask 261120  }
   0xf   :  { %317 = vmatprep.mubr.f32.mxu1 %v5931_v0  ;;  %3158 = vmatpush3.msra.mxu0 %v60_v1  ;;  %v3710_v5 = vld [vmem:[%s5921_s4 + $0x188] sm:$0xff]  ;;  %v58_v6 = vld [vmem:[%s5917_s0] sm:$0xff]  ;;  %v3736_v10 = vld [vmem:[%s5921_s4 + $0x1d0] sm:$0xff] }
  0x10   :  { %269 = vmatprep.subr.mxu1 %v3696_v2  ;;  %3159 = vmatprep.subr.mxu0 %v5931_v0  ;;  %v3720_v7 = vld [vmem:[%s5921_s4 + $0x180] sm:$0xff]  ;;  %v3730_v9 = vld [vmem:[%s5921_s4 + $0x148] sm:$0xff]  ;;  %v3747_v12 = vld [vmem:[%s5921_s4 + $0x198] sm:$0xff] }
  0x11   :  { %270 = vmatpush1.msra.mxu1 %v3701_v3  ;;  %3160 = vmatpush3.msra.mxu0 %v59_v4  ;;  %v3741_v11 = vld [vmem:[%s5921_s4 + $0x140] sm:$0xff]  ;;  %v3752_v13 = vld [vmem:[%s5921_s4 + $0x108] sm:$0xff]  ;;  %v3759_v14 = vld [vmem:[%s5921_s4 + $0x190] sm:$0xff] }
  0x12   :  { %271 = vmatprep.subr.mxu1 %v3710_v5  ;;  %3162 = vmatmul.mubr.msk.f32.vlgmr.msra.gmra.mxu0 %vm68_vm1, %v58_v6  ;;  %v3764_v15 = vld [vmem:[%s5921_s4 + $0x100] sm:$0xff]  ;;  %v3771_v16 = vld [vmem:[%s5921_s4 + $0x158] sm:$0xff]  ;;  %v3776_v17 = vld [vmem:[%s5921_s4 + $0xc8] sm:$0xff] }
  0x13   :  { %272 = vmatpush1.msra.mxu1 %v3720_v7  ;;  %340 = vmatprep.subr.mxu0 %v3725_v8  ;;  %v3783_v18 = vld [vmem:[%s5921_s4 + $0x150] sm:$0xff]  ;;  %v3788_v19 = vld [vmem:[%s5921_s4 + $0xc0] sm:$0xff]  ;;  %v3795_v20 = vld [vmem:[%s5921_s4 + $0x118] sm:$0xff] }
  0x14   :  { %273 = vmatprep.subr.mxu1 %v3730_v9  ;;  %341 = vmatpush1.msra.mxu0 %v3736_v10  ;;  %v3800_v21 = vld [vmem:[%s5921_s4 + $0x88] sm:$0xff]  ;;  %v3807_v22 = vld [vmem:[%s5921_s4 + $0x110] sm:$0xff]  ;;  %v3812_v23 = vld [vmem:[%s5921_s4 + $0x80] sm:$0xff] }
  0x15   :  { %274 = vmatpush1.msra.mxu1 %v3741_v11  ;;  %342 = vmatprep.subr.mxu0 %v3747_v12  ;;  %v3819_v24 = vld [vmem:[%s5921_s4 + $0xd8] sm:$0xff]  ;;  %v3824_v25 = vld [vmem:[%s5921_s4 + $0x48] sm:$0xff]  ;;  %v3831_v26 = vld [vmem:[%s5921_s4 + $0xd0] sm:$0xff] }
  0x16   :  { %275 = vmatprep.subr.mxu1 %v3752_v13  ;;  %343 = vmatpush1.msra.mxu0 %v3759_v14  ;;  %v3836_v27 = vld [vmem:[%s5921_s4 + $0x40] sm:$0xff]  ;;  %v3843_v28 = vld [vmem:[%s5921_s4 + $0x98] sm:$0xff]  ;;  %v3848_v29 = vld [vmem:[%s5921_s4 + $0x8] sm:$0xff] }
  0x17   :  { %276 = vmatpush1.msra.mxu1 %v3764_v15  ;;  %344 = vmatprep.subr.mxu0 %v3771_v16  ;;  %v3855_v30 = vld [vmem:[%s5921_s4 + $0x90] sm:$0xff]  ;;  %v3860_v31 = vld [vmem:[%s5921_s4] sm:$0xff]  ;;  %v3867_v32 = vld [vmem:[%s5921_s4 + $0x58] sm:$0xff] }
  0x18   :  { %277 = vmatprep.subr.mxu1 %v3776_v17  ;;  %345 = vmatpush1.msra.mxu0 %v3783_v18  ;;  %v3872_v33 = vld [vmem:[%s5921_s4 + $0x1e8] sm:$0xff]  ;;  %v3879_v34 = vld [vmem:[%s5921_s4 + $0x50] sm:$0xff]  ;;  %v3884_v35 = vld [vmem:[%s5920_s3] sm:$0xff] }
  0x19   :  { %278 = vmatpush1.msra.mxu1 %v3788_v19  ;;  %346 = vmatprep.subr.mxu0 %v3795_v20  ;;  %v3891_v36 = vld [vmem:[%s5921_s4 + $0x18] sm:$0xff]  ;;  %v3896_v37 = vld [vmem:[%s5921_s4 + $0x1e0] sm:$0xff]  ;;  %v3903_v38 = vld [vmem:[%s5921_s4 + $0x10] sm:$0xff] }
  0x1a   :  { %279 = vmatprep.subr.mxu1 %v3800_v21  ;;  %347 = vmatpush1.msra.mxu0 %v3807_v22  ;;  %v3911_v39 = vld [vmem:[%s5921_s4 + $0x1a8] sm:$0xff]  ;;  %v3918_v40 = vld [vmem:[%s5921_s4 + $0x1a0] sm:$0xff]  ;;  %v3923_v41 = vld [vmem:[%s5921_s4 + $0x1f8] sm:$0xff] }
  0x1b   :  { %280 = vmatpush1.msra.mxu1 %v3812_v23  ;;  %348 = vmatprep.subr.mxu0 %v3819_v24  ;;  %v3930_v42 = vld [vmem:[%s5921_s4 + $0x168] sm:$0xff]  ;;  %v3935_v43 = vld [vmem:[%s5921_s4 + $0x1f0] sm:$0xff]  ;;  %v3943_v44 = vld [vmem:[%s5921_s4 + $0x160] sm:$0xff] }
  0x1c   :  { %281 = vmatprep.subr.mxu1 %v3824_v25  ;;  %349 = vmatpush1.msra.mxu0 %v3831_v26  ;;  %v3948_v45 = vld [vmem:[%s5921_s4 + $0x1b8] sm:$0xff]  ;;  %v3955_v46 = vld [vmem:[%s5921_s4 + $0x128] sm:$0xff]  ;;  %v3960_v47 = vld [vmem:[%s5921_s4 + $0x1b0] sm:$0xff] }
  0x1d   :  { %282 = vmatpush1.msra.mxu1 %v3836_v27  ;;  %350 = vmatprep.subr.mxu0 %v3843_v28  ;;  %v3967_v48 = vld [vmem:[%s5921_s4 + $0x120] sm:$0xff]  ;;  %v3972_v49 = vld [vmem:[%s5921_s4 + $0x178] sm:$0xff]  ;;  %v3979_v50 = vld [vmem:[%s5921_s4 + $0xe8] sm:$0xff] }
  0x1e   :  { %283 = vmatprep.subr.mxu1 %v3848_v29  ;;  %351 = vmatpush1.msra.mxu0 %v3855_v30  ;;  %6131 = vst [vmem:[#allocation10_spill] sm:$0xff] %v3972_v49  ;;  %6132 = vst [vmem:[#allocation11_spill] sm:$0xff] %v3979_v50  ;;  %v3984_v51 = vld [vmem:[%s5921_s4 + $0x170] sm:$0xff]  ;;  %v3991_v52 = vld [vmem:[%s5921_s4 + $0xe0] sm:$0xff] }
  0x1f   :  { %284 = vmatpush1.msra.mxu1 %v3860_v31  ;;  %352 = vmatprep.subr.mxu0 %v3867_v32  ;;  %v3996_v53 = vld [vmem:[%s5921_s4 + $0x138] sm:$0xff]  ;;  %v4003_v54 = vld [vmem:[%s5921_s4 + $0xa8] sm:$0xff]  ;;  %v4008_v55 = vld [vmem:[%s5921_s4 + $0x130] sm:$0xff] }
  0x20   :  { %411 = vmatprep.subr.mxu1 %v3872_v33  ;;  %353 = vmatpush1.msra.mxu0 %v3879_v34  ;;  %v4015_v56 = vld [vmem:[%s5921_s4 + $0xa0] sm:$0xff]  ;;  %v4020_v57 = vld [vmem:[%s5921_s4 + $0xf8] sm:$0xff]  ;;  %v4027_v58 = vld [vmem:[%s5921_s4 + $0x68] sm:$0xff] }
  0x21   :  { %2973 = vmatmul.mubr.msk.f32.vlgmr.msra.gmra.mxu1 %vm249_vm2, %v3884_v35  ;;  %354 = vmatprep.subr.mxu0 %v3891_v36  ;;  %v4032_v59 = vld [vmem:[%s5921_s4 + $0xf0] sm:$0xff]  ;;  %v4039_v60 = vld [vmem:[%s5921_s4 + $0x60] sm:$0xff]  ;;  %v4044_v61 = vld [vmem:[%s5921_s4 + $0xb8] sm:$0xff] }
  0x22   :  { %412 = vmatpush1.msra.mxu1 %v3896_v37  ;;  %355 = vmatpush1.msra.mxu0 %v3903_v38  ;;  %6133 = vst [vmem:[#allocation12_spill] sm:$0xff] %v4039_v60  ;;  %6134 = vst [vmem:[#allocation13_spill] sm:$0xff] %v4044_v61  ;;  %v4051_v62 = vld [vmem:[%s5921_s4 + $0x28] sm:$0xff]  ;;  %v4056_v63 = vld [vmem:[%s5921_s4 + $0xb0] sm:$0xff] }
  0x23   :  { %388 = vmatprep.mubr.f32.mxu0 %v5931_v0  ;;  %413 = vmatprep.subr.mxu1 %v3911_v39  ;;  %v4063_v1 = vld [vmem:[%s5921_s4 + $0x20] sm:$0xff]  ;;  %v4068_v4 = vld [vmem:[%s5921_s4 + $0x78] sm:$0xff]  ;;  %v4075_v6 = vld [vmem:[%s5921_s4 + $0x70] sm:$0xff] }
  0x24   :  { %2974 = vmatmul.mubr.msk.f32.vlgmr.msra.gmra.mxu0 %vm249_vm2, %v3884_v35  ;;  %414 = vmatpush1.msra.mxu1 %v3918_v40  ;;  %v4084_v0 = vld [vmem:[%s5921_s4 + $0x38] sm:$0xff] }
  0x25   :  { %482 = vmatprep.subr.mxu0 %v3923_v41  ;;  %415 = vmatprep.subr.mxu1 %v3930_v42 }
  0x26   :  { %483 = vmatpush1.msra.mxu0 %v3935_v43  ;;  %416 = vmatpush1.msra.mxu1 %v3943_v44 }
  0x27   :  { %484 = vmatprep.subr.mxu0 %v3948_v45  ;;  %417 = vmatprep.subr.mxu1 %v3955_v46 }
  0x28   :  { %485 = vmatpush1.msra.mxu0 %v3960_v47  ;;  %418 = vmatpush1.msra.mxu1 %v3967_v48 }
  0x29   :  { %486 = vmatprep.subr.mxu0 %v3972_v49  ;;  %419 = vmatprep.subr.mxu1 %v3979_v50 }
  0x2a   :  { %487 = vmatpush1.msra.mxu0 %v3984_v51  ;;  %420 = vmatpush1.msra.mxu1 %v3991_v52 }
  0x2b   :  { %488 = vmatprep.subr.mxu0 %v3996_v53  ;;  %421 = vmatprep.subr.mxu1 %v4003_v54 }
  0x2c   :  { %489 = vmatpush1.msra.mxu0 %v4008_v55  ;;  %422 = vmatpush1.msra.mxu1 %v4015_v56 }
  0x2d   :  { %490 = vmatprep.subr.mxu0 %v4020_v57  ;;  %423 = vmatprep.subr.mxu1 %v4027_v58 }
  0x2e   :  { %491 = vmatpush1.msra.mxu0 %v4032_v59  ;;  %424 = vmatpush1.msra.mxu1 %v4039_v60  ;;  %v6135_v60 = vmov 0.0  }
  0x2f   :  { %492 = vmatprep.subr.mxu0 %v4044_v61  ;;  %425 = vmatprep.subr.mxu1 %v4051_v62  ;;  %v4091_v61 = vld [vmem:[%s5921_s4 + $0x30] sm:$0xff]  ;;  %1170 = vst.msk [vmem:[#allocation5] sm:$0xff] %vm1169_vm5, %v6135_v60 }
  0x30   :  { %493 = vmatpush1.msra.mxu0 %v4056_v63  ;;  %426 = vmatpush1.msra.mxu1 %v4063_v1 }
  0x31   :  { %494 = vmatprep.subr.mxu0 %v4068_v4  ;;  %459 = vmatprep.mubr.f32.mxu1 %v6135_v60 }
  0x32   :  { %495 = vmatpush1.msra.mxu0 %v4075_v6  ;;  %566 = vmatprep.subr.mxu1 %v3696_v2 }
  0x33   :  { %2975 = vmatmul.mubr.msk.f32.vlgmr.msra.gmra.mxu1 %vm249_vm2, %v3884_v35  ;;  %496 = vmatprep.subr.mxu0 %v4084_v0 }
  0x34   :  { %567 = vmatpush1.msra.mxu1 %v3701_v3  ;;  %497 = vmatpush1.msra.mxu0 %v4091_v61 }
  0x35   :  { %530 = vmatprep.mubr.f32.mxu0 %v6135_v60  ;;  %568 = vmatprep.subr.mxu1 %v3710_v5 }
  0x36   :  { %2976 = vmatmul.mubr.msk.f32.vlgmr.msra.gmra.mxu0 %vm249_vm2, %v3884_v35  ;;  %569 = vmatpush1.msra.mxu1 %v3720_v7  ;;  %v2977_v35 = vld [vmem:[%s5920_s3 + $0x8] sm:$0xff] }
  0x37   :  { %637 = vmatprep.subr.mxu0 %v3725_v8  ;;  %570 = vmatprep.subr.mxu1 %v3730_v9 }
  0x38   :  { %638 = vmatpush1.msra.mxu0 %v3736_v10  ;;  %571 = vmatpush1.msra.mxu1 %v3741_v11 }
  0x39   :  { %639 = vmatprep.subr.mxu0 %v3747_v12  ;;  %572 = vmatprep.subr.mxu1 %v3752_v13 }
  0x3a   :  { %640 = vmatpush1.msra.mxu0 %v3759_v14  ;;  %573 = vmatpush1.msra.mxu1 %v3764_v15 }
  0x3b   :  { %641 = vmatprep.subr.mxu0 %v3771_v16  ;;  %574 = vmatprep.subr.mxu1 %v3776_v17 }
  0x3c   :  { %642 = vmatpush1.msra.mxu0 %v3783_v18  ;;  %575 = vmatpush1.msra.mxu1 %v3788_v19 }
  0x3d   :  { %643 = vmatprep.subr.mxu0 %v3795_v20  ;;  %576 = vmatprep.subr.mxu1 %v3800_v21 }
  0x3e   :  { %644 = vmatpush1.msra.mxu0 %v3807_v22  ;;  %577 = vmatpush1.msra.mxu1 %v3812_v23 }
  0x3f   :  { %645 = vmatprep.subr.mxu0 %v3819_v24  ;;  %578 = vmatprep.subr.mxu1 %v3824_v25 }
  0x40   :  { %646 = vmatpush1.msra.mxu0 %v3831_v26  ;;  %579 = vmatpush1.msra.mxu1 %v3836_v27 }
  0x41   :  { %647 = vmatprep.subr.mxu0 %v3843_v28  ;;  %580 = vmatprep.subr.mxu1 %v3848_v29 }
  0x42   :  { %648 = vmatpush1.msra.mxu0 %v3855_v30  ;;  %581 = vmatpush1.msra.mxu1 %v3860_v31 }
  0x43   :  { %649 = vmatprep.subr.mxu0 %v3867_v32  ;;  %614 = vmatprep.mubr.f32.mxu1 %v6135_v60 }
  0x44   :  { %650 = vmatpush1.msra.mxu0 %v3879_v34  ;;  %708 = vmatprep.subr.mxu1 %v3872_v33 }
  0x45   :  { %2978 = vmatmul.mubr.msk.f32.vlgmr.msra.gmra.mxu1 %vm249_vm2, %v2977_v35  ;;  %651 = vmatprep.subr.mxu0 %v3891_v36 }
  0x46   :  { %709 = vmatpush1.msra.mxu1 %v3896_v37  ;;  %652 = vmatpush1.msra.mxu0 %v3903_v38 }
  0x47   :  { %685 = vmatprep.mubr.f32.mxu0 %v6135_v60  ;;  %710 = vmatprep.subr.mxu1 %v3911_v39 }
  0x48   :  { %2979 = vmatmul.mubr.msk.f32.vlgmr.msra.gmra.mxu0 %vm249_vm2, %v2977_v35  ;;  %711 = vmatpush1.msra.mxu1 %v3918_v40 }
  0x49   :  { %779 = vmatprep.subr.mxu0 %v3923_v41  ;;  %712 = vmatprep.subr.mxu1 %v3930_v42 }
  0x4a   :  { %780 = vmatpush1.msra.mxu0 %v3935_v43  ;;  %713 = vmatpush1.msra.mxu1 %v3943_v44 }
  0x4b   :  { %781 = vmatprep.subr.mxu0 %v3948_v45  ;;  %714 = vmatprep.subr.mxu1 %v3955_v46 }
  0x4c   :  { %782 = vmatpush1.msra.mxu0 %v3960_v47  ;;  %715 = vmatpush1.msra.mxu1 %v3967_v48 }
  0x4d   :  { %783 = vmatprep.subr.mxu0 %v3972_v49  ;;  %716 = vmatprep.subr.mxu1 %v3979_v50  ;;  %v6136_v49 = vld [vmem:[#allocation12_spill] sm:$0xff]  ;;  %v6137_v50 = vld [vmem:[#allocation13_spill] sm:$0xff] }
  0x4e   :  { %784 = vmatpush1.msra.mxu0 %v3984_v51  ;;  %717 = vmatpush1.msra.mxu1 %v3991_v52 }
  0x4f   :  { %785 = vmatprep.subr.mxu0 %v3996_v53  ;;  %718 = vmatprep.subr.mxu1 %v4003_v54 }
  0x50   :  { %786 = vmatpush1.msra.mxu0 %v4008_v55  ;;  %719 = vmatpush1.msra.mxu1 %v4015_v56 }
  0x51   :  { %787 = vmatprep.subr.mxu0 %v4020_v57  ;;  %720 = vmatprep.subr.mxu1 %v4027_v58 }
  0x52   :  { %788 = vmatpush1.msra.mxu0 %v4032_v59  ;;  %721 = vmatpush1.msra.mxu1 %v6136_v49 }
  0x53   :  { %789 = vmatprep.subr.mxu0 %v6137_v50  ;;  %722 = vmatprep.subr.mxu1 %v4051_v62 }
  0x54   :  { %790 = vmatpush1.msra.mxu0 %v4056_v63  ;;  %723 = vmatpush1.msra.mxu1 %v4063_v1 }
  0x55   :  { %791 = vmatprep.subr.mxu0 %v4068_v4  ;;  %756 = vmatprep.mubr.f32.mxu1 %v6135_v60 }
  0x56   :  { %792 = vmatpush1.msra.mxu0 %v4075_v6  ;;  %864 = vmatprep.subr.mxu1 %v3696_v2  ;;  %v2982_v2 = vld [vmem:[%s5920_s3 + $0x10] sm:$0xff] }
  0x57   :  { %2980 = vmatmul.mubr.msk.f32.vlgmr.msra.gmra.mxu1 %vm249_vm2, %v2977_v35  ;;  %793 = vmatprep.subr.mxu0 %v4084_v0 }
  0x58   :  { %865 = vmatpush1.msra.mxu1 %v3701_v3  ;;  %794 = vmatpush1.msra.mxu0 %v4091_v61  ;;  %v6138_v3 = vld [vmem:[#allocation10_spill] sm:$0xff] }
  0x59   :  { %827 = vmatprep.mubr.f32.mxu0 %v6135_v60  ;;  %866 = vmatprep.subr.mxu1 %v3710_v5  ;;  %v6139_v5 = vld [vmem:[#allocation11_spill] sm:$0xff] }
  0x5a   :  { %2981 = vmatmul.mubr.msk.f32.vlgmr.msra.gmra.mxu0 %vm249_vm2, %v2977_v35  ;;  %867 = vmatpush1.msra.mxu1 %v3720_v7  ;;  %v1294_v7 = vld [vmem:[#allocation7 + $0x3c8] sm:$0xff]  ;;  %v4299_v35 = vld [vmem:[#allocation7] sm:$0xff] }
  0x5b   :  { %935 = vmatprep.subr.mxu0 %v3725_v8  ;;  %868 = vmatprep.subr.mxu1 %v3730_v9  ;;  %v1293_v8 = vld [vmem:[#allocation7 + $0x3c0] sm:$0xff]  ;;  %v1286_v9 = vld [vmem:[#allocation7 + $0x388] sm:$0xff] }
  0x5c   :  { %936 = vmatpush1.msra.mxu0 %v3736_v10  ;;  %869 = vmatpush1.msra.mxu1 %v3741_v11  ;;  %v1285_v10 = vld [vmem:[#allocation7 + $0x380] sm:$0xff]  ;;  %v1296_v11 = vld [vmem:[#allocation7 + $0x3d8] sm:$0xff] }
  0x5d   :  { %937 = vmatprep.subr.mxu0 %v3747_v12  ;;  %870 = vmatprep.subr.mxu1 %v3752_v13  ;;  %v1278_v12 = vld [vmem:[#allocation7 + $0x348] sm:$0xff]  ;;  %v1295_v13 = vld [vmem:[#allocation7 + $0x3d0] sm:$0xff] }
  0x5e   :  { %938 = vmatpush1.msra.mxu0 %v3759_v14  ;;  %871 = vmatpush1.msra.mxu1 %v3764_v15  ;;  %v1277_v14 = vld [vmem:[#allocation7 + $0x340] sm:$0xff]  ;;  %v1288_v15 = vld [vmem:[#allocation7 + $0x398] sm:$0xff] }
  0x5f   :  { %939 = vmatprep.subr.mxu0 %v3771_v16  ;;  %872 = vmatprep.subr.mxu1 %v3776_v17  ;;  %v1270_v16 = vld [vmem:[#allocation7 + $0x308] sm:$0xff]  ;;  %v1287_v17 = vld [vmem:[#allocation7 + $0x390] sm:$0xff] }
  0x60   :  { %940 = vmatpush1.msra.mxu0 %v3783_v18  ;;  %873 = vmatpush1.msra.mxu1 %v3788_v19  ;;  %v1280_v18 = vld [vmem:[#allocation7 + $0x358] sm:$0xff]  ;;  %v1262_v19 = vld [vmem:[#allocation7 + $0x2c8] sm:$0xff] }
  0x61   :  { %941 = vmatprep.subr.mxu0 %v3795_v20  ;;  %874 = vmatprep.subr.mxu1 %v3800_v21  ;;  %v1279_v20 = vld [vmem:[#allocation7 + $0x350] sm:$0xff]  ;;  %v1261_v21 = vld [vmem:[#allocation7 + $0x2c0] sm:$0xff] }
  0x62   :  { %942 = vmatpush1.msra.mxu0 %v3807_v22  ;;  %875 = vmatpush1.msra.mxu1 %v3812_v23  ;;  %v1272_v22 = vld [vmem:[#allocation7 + $0x318] sm:$0xff]  ;;  %v1254_v23 = vld [vmem:[#allocation7 + $0x288] sm:$0xff] }
  0x63   :  { %943 = vmatprep.subr.mxu0 %v3819_v24  ;;  %876 = vmatprep.subr.mxu1 %v3824_v25  ;;  %v1271_v24 = vld [vmem:[#allocation7 + $0x310] sm:$0xff]  ;;  %v1253_v25 = vld [vmem:[#allocation7 + $0x280] sm:$0xff] }
  0x64   :  { %944 = vmatpush1.msra.mxu0 %v3831_v26  ;;  %877 = vmatpush1.msra.mxu1 %v3836_v27  ;;  %v1264_v26 = vld [vmem:[#allocation7 + $0x2d8] sm:$0xff]  ;;  %v1246_v27 = vld [vmem:[#allocation7 + $0x248] sm:$0xff] }
  0x65   :  { %945 = vmatprep.subr.mxu0 %v3843_v28  ;;  %878 = vmatprep.subr.mxu1 %v3848_v29  ;;  %v1263_v28 = vld [vmem:[#allocation7 + $0x2d0] sm:$0xff]  ;;  %v1245_v29 = vld [vmem:[#allocation7 + $0x240] sm:$0xff] }
  0x66   :  { %946 = vmatpush1.msra.mxu0 %v3855_v30  ;;  %879 = vmatpush1.msra.mxu1 %v3860_v31  ;;  %v1256_v30 = vld [vmem:[#allocation7 + $0x298] sm:$0xff]  ;;  %v4250_v31 = vld [vmem:[#allocation7 + $0x208] sm:$0xff] }
  0x67   :  { %947 = vmatprep.subr.mxu0 %v3867_v32  ;;  %912 = vmatprep.mubr.f32.mxu1 %v6135_v60  ;;  %v1255_v32 = vld [vmem:[#allocation7 + $0x290] sm:$0xff] }
  0x68   :  { %948 = vmatpush1.msra.mxu0 %v3879_v34  ;;  %1006 = vmatprep.subr.mxu1 %v3872_v33  ;;  %v4252_v33 = vld [vmem:[#allocation7 + $0x200] sm:$0xff]  ;;  %v1248_v34 = vld [vmem:[#allocation7 + $0x258] sm:$0xff] }
  0x69   :  { %2983 = vmatmul.mubr.msk.f32.vlgmr.msra.gmra.mxu1 %vm249_vm2, %v2982_v2  ;;  %949 = vmatprep.subr.mxu0 %v3891_v36  ;;  %v4254_v36 = vld [vmem:[#allocation7 + $0x1c8] sm:$0xff] }
  0x6a   :  { %1007 = vmatpush1.msra.mxu1 %v3896_v37  ;;  %950 = vmatpush1.msra.mxu0 %v3903_v38  ;;  %v1247_v37 = vld [vmem:[#allocation7 + $0x250] sm:$0xff]  ;;  %v4257_v38 = vld [vmem:[#allocation7 + $0x1c0] sm:$0xff] }
  0x6b   :  { %983 = vmatprep.mubr.f32.mxu0 %v6135_v60  ;;  %1008 = vmatprep.subr.mxu1 %v3911_v39  ;;  %v1240_v39 = vld [vmem:[#allocation7 + $0x218] sm:$0xff] }
  0x6c   :  { %2984 = vmatmul.mubr.msk.f32.vlgmr.msra.gmra.mxu0 %vm249_vm2, %v2982_v2  ;;  %1009 = vmatpush1.msra.mxu1 %v3918_v40  ;;  %v4260_v40 = vld [vmem:[#allocation7 + $0x188] sm:$0xff] }
  0x6d   :  { %1077 = vmatprep.subr.mxu0 %v3923_v41  ;;  %1010 = vmatprep.subr.mxu1 %v3930_v42  ;;  %v1239_v41 = vld [vmem:[#allocation7 + $0x210] sm:$0xff]  ;;  %v4263_v42 = vld [vmem:[#allocation7 + $0x180] sm:$0xff] }
  0x6e   :  { %1078 = vmatpush1.msra.mxu0 %v3935_v43  ;;  %1011 = vmatpush1.msra.mxu1 %v3943_v44  ;;  %v1232_v43 = vld [vmem:[#allocation7 + $0x1d8] sm:$0xff]  ;;  %v4266_v44 = vld [vmem:[#allocation7 + $0x148] sm:$0xff] }
  0x6f   :  { %1079 = vmatprep.subr.mxu0 %v3948_v45  ;;  %1012 = vmatprep.subr.mxu1 %v3955_v46  ;;  %v1231_v45 = vld [vmem:[#allocation7 + $0x1d0] sm:$0xff]  ;;  %v4269_v46 = vld [vmem:[#allocation7 + $0x140] sm:$0xff] }
  0x70   :  { %1080 = vmatpush1.msra.mxu0 %v3960_v47  ;;  %1013 = vmatpush1.msra.mxu1 %v3967_v48  ;;  %v1224_v47 = vld [vmem:[#allocation7 + $0x198] sm:$0xff]  ;;  %v4272_v48 = vld [vmem:[#allocation7 + $0x108] sm:$0xff] }
  0x71   :  { %1081 = vmatprep.subr.mxu0 %v6138_v3  ;;  %1014 = vmatprep.subr.mxu1 %v6139_v5  ;;  %v4302_v3 = vld [vmem:[#allocation7 + $0x7c8] sm:$0xff]  ;;  %v1183_v5 = vld [vmem:[#allocation7 + $0x50] sm:$0xff] }
  0x72   :  { %1082 = vmatpush1.msra.mxu0 %v3984_v51  ;;  %1015 = vmatpush1.msra.mxu1 %v3991_v52  ;;  %v1216_v51 = vld [vmem:[#allocation7 + $0x158] sm:$0xff]  ;;  %v4278_v52 = vld [vmem:[#allocation7 + $0xc8] sm:$0xff] }
  0x73   :  { %1083 = vmatprep.subr.mxu0 %v3996_v53  ;;  %1016 = vmatprep.subr.mxu1 %v4003_v54  ;;  %v1215_v53 = vld [vmem:[#allocation7 + $0x150] sm:$0xff]  ;;  %v4281_v54 = vld [vmem:[#allocation7 + $0xc0] sm:$0xff] }
  0x74   :  { %1084 = vmatpush1.msra.mxu0 %v4008_v55  ;;  %1017 = vmatpush1.msra.mxu1 %v4015_v56  ;;  %v1208_v55 = vld [vmem:[#allocation7 + $0x118] sm:$0xff]  ;;  %v4284_v56 = vld [vmem:[#allocation7 + $0x88] sm:$0xff] }
  0x75   :  { %1085 = vmatprep.subr.mxu0 %v4020_v57  ;;  %1018 = vmatprep.subr.mxu1 %v4027_v58  ;;  %v1207_v57 = vld [vmem:[#allocation7 + $0x110] sm:$0xff]  ;;  %v4287_v58 = vld [vmem:[#allocation7 + $0x80] sm:$0xff] }
  0x76   :  { %1086 = vmatpush1.msra.mxu0 %v4032_v59  ;;  %1019 = vmatpush1.msra.mxu1 %v6136_v49  ;;  %v1223_v49 = vld [vmem:[#allocation7 + $0x190] sm:$0xff]  ;;  %v1200_v59 = vld [vmem:[#allocation7 + $0xd8] sm:$0xff] }
  0x77   :  { %1087 = vmatprep.subr.mxu0 %v6137_v50  ;;  %1020 = vmatprep.subr.mxu1 %v4051_v62  ;;  %v4275_v50 = vld [vmem:[#allocation7 + $0x100] sm:$0xff]  ;;  %v1199_v62 = vld [vmem:[#allocation7 + $0xd0] sm:$0xff] }
  0x78   :  { %1088 = vmatpush1.msra.mxu0 %v4056_v63  ;;  %1021 = vmatpush1.msra.mxu1 %v4063_v1  ;;  %v4293_v63 = vld [vmem:[#allocation7 + $0x40] sm:$0xff]  ;;  %v1192_v1 = vld [vmem:[#allocation7 + $0x98] sm:$0xff] }
  0x79   :  { %1089 = vmatprep.subr.mxu0 %v4068_v4  ;;  %1054 = vmatprep.mubr.f32.mxu1 %v6135_v60  ;;  %v4296_v4 = vld [vmem:[#allocation7 + $0x8] sm:$0xff] }
  0x7a   :  { %1090 = vmatpush1.msra.mxu0 %v4075_v6  ;;  %1474 = vmatprep.subr.mxu1 %v1294_v7  ;;  %v1191_v6 = vld [vmem:[#allocation7 + $0x90] sm:$0xff]  ;;  %v4305_v7 = vld [vmem:[#allocation7 + $0x7c0] sm:$0xff] }
  0x7b   :  { %2985 = vmatmul.mubr.msk.f32.vlgmr.msra.gmra.mxu1 %vm249_vm2, %v2982_v2  ;;  %1091 = vmatprep.subr.mxu0 %v4084_v0  ;;  %v1269_v0 = vld [vmem:[#allocation7 + $0x300] sm:$0xff] }
  0x7c   :  { %1475 = vmatpush1.msra.mxu1 %v1293_v8  ;;  %1092 = vmatpush1.msra.mxu0 %v4091_v61  ;;  %v4290_v61 = vld [vmem:[#allocation7 + $0x48] sm:$0xff]  ;;  %v1176_v8 = vld [vmem:[#allocation7 + $0x18] sm:$0xff] }
  0x7d   :  { %1125 = vmatprep.mubr.f32.mxu0 %v6135_v60  ;;  %1476 = vmatprep.subr.mxu1 %v1286_v9  ;;  %v4308_v9 = vld [vmem:[#allocation7 + $0x788] sm:$0xff] }
  0x7e   :  { %2986 = vmatmul.mubr.msk.f32.vlgmr.msra.gmra.mxu0 %vm249_vm2, %v2982_v2  ;;  %1477 = vmatpush1.msra.mxu1 %v1285_v10  ;;  %v1184_v2 = vld [vmem:[#allocation7 + $0x58] sm:$0xff]  ;;  %v1175_v10 = vld [vmem:[#allocation7 + $0x10] sm:$0xff] }
  0x7f   :  { %1545 = vmatprep.subr.mxu0 %v1296_v11  ;;  %1478 = vmatprep.subr.mxu1 %v1278_v12  ;;  %v4311_v11 = vld [vmem:[#allocation7 + $0x780] sm:$0xff]  ;;  %v1424_v12 = vld [vmem:[#allocation7 + $0x7d8] sm:$0xff] }
  0x80   :  { %1546 = vmatpush1.msra.mxu0 %v1295_v13  ;;  %1479 = vmatpush1.msra.mxu1 %v1277_v14  ;;  %v4314_v13 = vld [vmem:[#allocation7 + $0x748] sm:$0xff]  ;;  %v1423_v14 = vld [vmem:[#allocation7 + $0x7d0] sm:$0xff] }
  0x81   :  { %1547 = vmatprep.subr.mxu0 %v1288_v15  ;;  %1480 = vmatprep.subr.mxu1 %v1270_v16  ;;  %v4317_v15 = vld [vmem:[#allocation7 + $0x740] sm:$0xff]  ;;  %v1416_v16 = vld [vmem:[#allocation7 + $0x798] sm:$0xff] }
  0x82   :  { %1548 = vmatpush1.msra.mxu0 %v1287_v17  ;;  %1481 = vmatpush1.msra.mxu1 %v1269_v0  ;;  %v4320_v17 = vld [vmem:[#allocation7 + $0x708] sm:$0xff]  ;;  %v1415_v0 = vld [vmem:[#allocation7 + $0x790] sm:$0xff] }
  0x83   :  { %1549 = vmatprep.subr.mxu0 %v1280_v18  ;;  %1482 = vmatprep.subr.mxu1 %v1262_v19  ;;  %v4323_v18 = vld [vmem:[#allocation7 + $0x700] sm:$0xff]  ;;  %v1408_v19 = vld [vmem:[#allocation7 + $0x758] sm:$0xff] }
  0x84   :  { %1550 = vmatpush1.msra.mxu0 %v1279_v20  ;;  %1483 = vmatpush1.msra.mxu1 %v1261_v21  ;;  %v4326_v20 = vld [vmem:[#allocation7 + $0x6c8] sm:$0xff]  ;;  %v1407_v21 = vld [vmem:[#allocation7 + $0x750] sm:$0xff] }
  0x85   :  { %1551 = vmatprep.subr.mxu0 %v1272_v22  ;;  %1484 = vmatprep.subr.mxu1 %v1254_v23  ;;  %v4329_v22 = vld [vmem:[#allocation7 + $0x6c0] sm:$0xff]  ;;  %v1400_v23 = vld [vmem:[#allocation7 + $0x718] sm:$0xff] }
  0x86   :  { %1552 = vmatpush1.msra.mxu0 %v1271_v24  ;;  %1485 = vmatpush1.msra.mxu1 %v1253_v25  ;;  %v4332_v24 = vld [vmem:[#allocation7 + $0x688] sm:$0xff]  ;;  %v1399_v25 = vld [vmem:[#allocation7 + $0x710] sm:$0xff] }
  0x87   :  { %1553 = vmatprep.subr.mxu0 %v1264_v26  ;;  %1486 = vmatprep.subr.mxu1 %v1246_v27  ;;  %v4335_v26 = vld [vmem:[#allocation7 + $0x680] sm:$0xff]  ;;  %v1392_v27 = vld [vmem:[#allocation7 + $0x6d8] sm:$0xff] }
  0x88   :  { %1554 = vmatpush1.msra.mxu0 %v1263_v28  ;;  %1487 = vmatpush1.msra.mxu1 %v1245_v29  ;;  %v4338_v28 = vld [vmem:[#allocation7 + $0x648] sm:$0xff]  ;;  %v1391_v29 = vld [vmem:[#allocation7 + $0x6d0] sm:$0xff] }
  0x89   :  { %1555 = vmatprep.subr.mxu0 %v1256_v30  ;;  %1488 = vmatprep.subr.mxu1 %v4250_v31  ;;  %v4341_v30 = vld [vmem:[#allocation7 + $0x640] sm:$0xff] }
  0x8a   :  { %1556 = vmatpush1.msra.mxu0 %v1255_v32  ;;  %1489 = vmatpush1.msra.mxu1 %v4252_v33  ;;  %v1384_v32 = vld [vmem:[#allocation7 + $0x698] sm:$0xff] }
  0x8b   :  { %1557 = vmatprep.subr.mxu0 %v1248_v34  ;;  %1490 = vmatprep.subr.mxu1 %v4254_v36  ;;  %v4344_v34 = vld [vmem:[#allocation7 + $0x608] sm:$0xff] }
  0x8c   :  { %1558 = vmatpush1.msra.mxu0 %v1247_v37  ;;  %1491 = vmatpush1.msra.mxu1 %v4257_v38  ;;  %v1383_v37 = vld [vmem:[#allocation7 + $0x690] sm:$0xff] }
  0x8d   :  { %1559 = vmatprep.subr.mxu0 %v1240_v39  ;;  %1492 = vmatprep.subr.mxu1 %v4260_v40  ;;  %v4347_v39 = vld [vmem:[#allocation7 + $0x600] sm:$0xff] }
  0x8e   :  { %1560 = vmatpush1.msra.mxu0 %v1239_v41  ;;  %1493 = vmatpush1.msra.mxu1 %v4263_v42  ;;  %v1376_v41 = vld [vmem:[#allocation7 + $0x658] sm:$0xff] }
  0x8f   :  { %1561 = vmatprep.subr.mxu0 %v1232_v43  ;;  %1494 = vmatprep.subr.mxu1 %v4266_v44  ;;  %v4350_v43 = vld [vmem:[#allocation7 + $0x5c8] sm:$0xff] }
  0x90   :  { %1562 = vmatpush1.msra.mxu0 %v1231_v45  ;;  %1495 = vmatpush1.msra.mxu1 %v4269_v46  ;;  %v1375_v45 = vld [vmem:[#allocation7 + $0x650] sm:$0xff] }
  0x91   :  { %1563 = vmatprep.subr.mxu0 %v1224_v47  ;;  %1496 = vmatprep.subr.mxu1 %v4272_v48  ;;  %v4353_v47 = vld [vmem:[#allocation7 + $0x5c0] sm:$0xff] }
  0x92   :  { %1564 = vmatpush1.msra.mxu0 %v1223_v49  ;;  %1497 = vmatpush1.msra.mxu1 %v4275_v50  ;;  %v1368_v49 = vld [vmem:[#allocation7 + $0x618] sm:$0xff] }
  0x93   :  { %1565 = vmatprep.subr.mxu0 %v1216_v51  ;;  %1498 = vmatprep.subr.mxu1 %v4278_v52  ;;  %v4356_v51 = vld [vmem:[#allocation7 + $0x588] sm:$0xff] }
  0x94   :  { %1566 = vmatpush1.msra.mxu0 %v1215_v53  ;;  %1499 = vmatpush1.msra.mxu1 %v4281_v54  ;;  %v1367_v53 = vld [vmem:[#allocation7 + $0x610] sm:$0xff] }
  0x95   :  { %1567 = vmatprep.subr.mxu0 %v1208_v55  ;;  %1500 = vmatprep.subr.mxu1 %v4284_v56  ;;  %v209_v55 = vlaneseq }
  0x96   :  { %1568 = vmatpush1.msra.mxu0 %v1207_v57  ;;  %1501 = vmatpush1.msra.mxu1 %v4287_v58  ;;  %v4359_v57 = vld [vmem:[#allocation7 + $0x580] sm:$0xff] }
  0x97   :  { %1569 = vmatprep.subr.mxu0 %v1200_v59  ;;  %1502 = vmatprep.subr.mxu1 %v4290_v61  ;;  %v1360_v59 = vld [vmem:[#allocation7 + $0x5d8] sm:$0xff] }
  0x98   :  { %1570 = vmatpush1.msra.mxu0 %v1199_v62  ;;  %1503 = vmatpush1.msra.mxu1 %v4293_v63  ;;  %v4362_v62 = vld [vmem:[#allocation7 + $0x548] sm:$0xff] }
  0x99   :  { %1571 = vmatprep.subr.mxu0 %v1192_v1  ;;  %1504 = vmatprep.subr.mxu1 %v4296_v4  ;;  %v1359_v1 = vld [vmem:[#allocation7 + $0x5d0] sm:$0xff] }
  0x9a   :  { %1572 = vmatpush1.msra.mxu0 %v1191_v6  ;;  %1505 = vmatpush1.msra.mxu1 %v4299_v35  ;;  %v4365_v6 = vld [vmem:[#allocation7 + $0x540] sm:$0xff] }
  0x9b   :  { %1573 = vmatprep.subr.mxu0 %v1184_v2  ;;  %1506 = vmatprep.subr.mxu1 %v4302_v3  ;;  %v1352_v2 = vld [vmem:[#allocation7 + $0x598] sm:$0xff] }
  0x9c   :  { %1574 = vmatpush1.msra.mxu0 %v1183_v5  ;;  %1507 = vmatpush2.msra.mxu1 %v4305_v7  ;;  %v4368_v5 = vld [vmem:[#allocation7 + $0x508] sm:$0xff] }
  0x9d   :  { %1575 = vmatprep.subr.mxu0 %v1176_v8  ;;  %1508 = vmatprep.subr.mxu1 %v4308_v9  ;;  %v1351_v8 = vld [vmem:[#allocation7 + $0x590] sm:$0xff] }
  0x9e   :  { %1576 = vmatpush1.msra.mxu0 %v1175_v10  ;;  %1509 = vmatpush2.msra.mxu1 %v4311_v11  ;;  %v4370_v10 = vshrl.u32 %v209_v55, 7  ;;  %v1320_v55 = vld [vmem:[#allocation7 + $0x498] sm:$0xff] }
  0x9f   :  { %1577 = vmatprep.subr.mxu0 %v1424_v12  ;;  %1510 = vmatprep.subr.mxu1 %v4314_v13  ;;  %v4373_v12 = vld [vmem:[#allocation7 + $0x500] sm:$0xff] }
  0xa0   :  { %1578 = vmatpush2.msra.mxu0 %v1423_v14  ;;  %1511 = vmatpush2.msra.mxu1 %v4317_v15  ;;  %6140 = vst [vmem:[#allocation12_spill] sm:$0xff] %v4370_v10  ;;  %v1344_v14 = vld [vmem:[#allocation7 + $0x558] sm:$0xff] }
  0xa1   :  { %1579 = vmatprep.subr.mxu0 %v1416_v16  ;;  %1512 = vmatprep.subr.mxu1 %v4320_v17  ;;  %v4376_v16 = vld [vmem:[#allocation7 + $0x4c8] sm:$0xff] }
  0xa2   :  { %1580 = vmatpush2.msra.mxu0 %v1415_v0  ;;  %1513 = vmatpush2.msra.mxu1 %v4323_v18  ;;  %v1343_v0 = vld [vmem:[#allocation7 + $0x550] sm:$0xff] }
  0xa3   :  { %1581 = vmatprep.subr.mxu0 %v1408_v19  ;;  %1514 = vmatprep.subr.mxu1 %v4326_v20  ;;  %v4379_v19 = vld [vmem:[#allocation7 + $0x4c0] sm:$0xff] }
  0xa4   :  { %1582 = vmatpush2.msra.mxu0 %v1407_v21  ;;  %1515 = vmatpush2.msra.mxu1 %v4329_v22  ;;  %v1336_v21 = vld [vmem:[#allocation7 + $0x518] sm:$0xff] }
  0xa5   :  { %1583 = vmatprep.subr.mxu0 %v1400_v23  ;;  %1516 = vmatprep.subr.mxu1 %v4332_v24  ;;  %v4382_v23 = vld [vmem:[#allocation7 + $0x488] sm:$0xff] }
  0xa6   :  { %1584 = vmatpush2.msra.mxu0 %v1399_v25  ;;  %1517 = vmatpush2.msra.mxu1 %v4335_v26  ;;  %v1335_v25 = vld [vmem:[#allocation7 + $0x510] sm:$0xff] }
  0xa7   :  { %1585 = vmatprep.subr.mxu0 %v1392_v27  ;;  %1518 = vmatprep.subr.mxu1 %v4338_v28  ;;  %v4385_v27 = vsub.s32 1, %v4370_v10 }
  0xa8   :  { %1586 = vmatpush2.msra.mxu0 %v1391_v29  ;;  %1519 = vmatpush2.msra.mxu1 %v4341_v30  ;;  %v4388_v29 = vld [vmem:[#allocation7 + $0x480] sm:$0xff] }
  0xa9   :  { %1587 = vmatprep.subr.mxu0 %v1384_v32  ;;  %1520 = vmatprep.subr.mxu1 %v4344_v34  ;;  %6141 = vst [vmem:[#allocation13_spill] sm:$0xff] %v4385_v27  ;;  %6142 = vst [vmem:[#allocation10_spill] sm:$0xff] %v4388_v29  ;;  %v1328_v32 = vld [vmem:[#allocation7 + $0x4d8] sm:$0xff] }
  0xaa   :  { %1588 = vmatpush2.msra.mxu0 %v1383_v37  ;;  %1521 = vmatpush2.msra.mxu1 %v4347_v39  ;;  %v1141_v37 = vld [vmem:[%s5924_s7] sm:$0x3] }
  0xab   :  { %1589 = vmatprep.subr.mxu0 %v1376_v41  ;;  %1522 = vmatprep.subr.mxu1 %v4350_v43  ;;  %v4394_v41 = vsub.s32 0, %v4370_v10  ;;  %v1299_v10 = vld [vmem:[#allocation7 + $0x3f0] sm:$0xff] }
  0xac   :  { %1590 = vmatpush2.msra.mxu0 %v1375_v45  ;;  %1523 = vmatpush2.msra.mxu1 %v4353_v47  ;;  %v4397_v45 = vld [vmem:[#allocation7 + $0x448] sm:$0xff] }
  0xad   :  { %1591 = vmatprep.subr.mxu0 %v1368_v49  ;;  %1524 = vmatprep.subr.mxu1 %v4356_v51  ;;  %6143 = vst [vmem:[#allocation11_spill] sm:$0xff] %v4394_v41  ;;  %6144 = vst [vmem:[#allocation14_spill] sm:$0xff] %v4397_v45  ;;  %v1327_v49 = vld [vmem:[#allocation7 + $0x4d0] sm:$0xff] }
  0xae   :  { %1592 = vmatpush2.msra.mxu0 %v1367_v53  ;;  %1525 = vmatpush2.msra.mxu1 %v4359_v57  ;;  %v4400_v53 = vld [vmem:[#allocation7 + $0x440] sm:$0xff] }
  0xaf   :  { %1593 = vmatprep.subr.mxu0 %v1360_v59  ;;  %1526 = vmatprep.subr.mxu1 %v4362_v62  ;;  %6145 = vst [vmem:[#allocation15_spill] sm:$0xff] %v4400_v53  ;;  %v4403_v59 = vld [vmem:[#allocation7 + $0x408] sm:$0xff] }
  0xb0   :  { %1594 = vmatpush2.msra.mxu0 %v1359_v1  ;;  %1527 = vmatpush2.msra.mxu1 %v4365_v6  ;;  %6146 = vst [vmem:[#allocation16_spill] sm:$0xff] %v4403_v59  ;;  %v1319_v1 = vld [vmem:[#allocation7 + $0x490] sm:$0xff] }
  0xb1   :  { %1595 = vmatprep.subr.mxu0 %v1352_v2  ;;  %1528 = vmatprep.subr.mxu1 %v4368_v5  ;;  %v4406_v2 = vrot.slane %v1141_v37, %v4385_v27  ;;  %v1300_v27 = vld [vmem:[#allocation7 + $0x3f8] sm:$0xff] }
  0xb2   :  { %1596 = vmatpush2.msra.mxu0 %v1351_v8  ;;  %1529 = vmatpush2.msra.mxu1 %v4373_v12  ;;  %v4409_v8 = vld [vmem:[#allocation7 + $0x400] sm:$0xff] }
  0xb3   :  { %1597 = vmatprep.subr.mxu0 %v1344_v14  ;;  %1530 = vmatprep.subr.mxu1 %v4376_v16  ;;  %6147 = vst [vmem:[#allocation17_spill] sm:$0xff] %v4409_v8  ;;  %v4412_v14 = vrot.slane %v1141_v37, %v4394_v41  ;;  %v1303_v37 = vld [vmem:[#allocation7 + $0x410] sm:$0xff]  ;;  %v1282_v41 = vld [vmem:[#allocation7 + $0x368] sm:$0xff] }
  0xb4   :  { %1598 = vmatpush2.msra.mxu0 %v1343_v0  ;;  %1531 = vmatpush2.msra.mxu1 %v4379_v19  ;;  %v1312_v0 = vld [vmem:[#allocation7 + $0x458] sm:$0xff] }
  0xb5   :  { %1599 = vmatprep.subr.mxu0 %v1336_v21  ;;  %1532 = vmatprep.subr.mxu1 %v4382_v23  ;;  %v1311_v21 = vld [vmem:[#allocation7 + $0x450] sm:$0xff] }
  0xb6   :  { %1600 = vmatpush2.msra.mxu0 %v1335_v25  ;;  %1533 = vmatpush2.msra.mxu1 %v4388_v29  ;;  %v4416_v25 = vld [vmem:[#allocation7 + $0x3e8] sm:$0xff]  ;;  %v1275_v29 = vld [vmem:[#allocation7 + $0x330] sm:$0xff] }
  0xb7   :  { %1601 = vmatprep.subr.mxu0 %v1328_v32  ;;  %1534 = vmatprep.subr.mxu1 %v4397_v45  ;;  %6148 = vst [vmem:[#allocation18_spill] sm:$0xff] %v4416_v25  ;;  %v1304_v32 = vld [vmem:[#allocation7 + $0x418] sm:$0xff]  ;;  %v1258_v45 = vld [vmem:[#allocation7 + $0x2a8] sm:$0xff] }
  0xb8   :  { %1602 = vmatpush2.msra.mxu0 %v1327_v49  ;;  %1535 = vmatpush2.msra.mxu1 %v4400_v53  ;;  %v1297_v49 = vld [vmem:[#allocation7 + $0x3e0] sm:$0xff] }
  0xb9   :  { %1603 = vmatprep.subr.mxu0 %v1320_v55  ;;  %1536 = vmatprep.subr.mxu1 %v4403_v59  ;;  %v1290_v55 = vld [vmem:[#allocation7 + $0x3a8] sm:$0xff]  ;;  %v1291_v59 = vld [vmem:[#allocation7 + $0x3b0] sm:$0xff]  ;;  %v1265_v53 = vld [vmem:[#allocation7 + $0x2e0] sm:$0xff] }
  0xba   :  { %1604 = vmatpush2.msra.mxu0 %v1319_v1  ;;  %1537 = vmatpush2.msra.mxu1 %v4409_v8  ;;  %v1289_v1 = vld [vmem:[#allocation7 + $0x3a0] sm:$0xff]  ;;  %v1292_v8 = vld [vmem:[#allocation7 + $0x3b8] sm:$0xff] }
  0xbb   :  { %1538 = vmatprep.mubr.f32.mxu1 %v4406_v2  ;;  %1605 = vmatprep.subr.mxu0 %v1312_v0  ;;  %v1281_v0 = vld [vmem:[#allocation7 + $0x360] sm:$0xff] }
  0xbc   :  { %1539 = vmatmul.mubr.f32.vlgmr.msra.gmra.mxu1 %v4412_v14  ;;  %1606 = vmatpush2.msra.mxu0 %v1311_v21  ;;  %v1274_v21 = vld [vmem:[#allocation7 + $0x328] sm:$0xff] }
  0xbd   :  { %1616 = vmatprep.subr.mxu1 %v4416_v25  ;;  %1607 = vmatprep.subr.mxu0 %v1304_v32  ;;  %v1273_v32 = vld [vmem:[#allocation7 + $0x320] sm:$0xff]  ;;  %v1283_v25 = vld [vmem:[#allocation7 + $0x370] sm:$0xff] }
  0xbe   :  { %1617 = vmatpush1.msra.mxu1 %v1297_v49  ;;  %1608 = vmatpush2.msra.mxu0 %v1303_v37  ;;  %v1284_v49 = vld [vmem:[#allocation7 + $0x378] sm:$0xff]  ;;  %v1266_v37 = vld [vmem:[#allocation7 + $0x2e8] sm:$0xff] }
  0xbf   :  { %1609 = vmatprep.mubr.f32.mxu0 %v4406_v2  ;;  %1618 = vmatprep.subr.mxu1 %v1290_v55  ;;  %v1276_v55 = vld [vmem:[#allocation7 + $0x338] sm:$0xff] }
  0xc0   :  { %1610 = vmatmul.mubr.f32.vlgmr.msra.gmra.mxu0 %v4412_v14  ;;  %1619 = vmatpush1.msra.mxu1 %v1289_v1  ;;  %v1268_v1 = vld [vmem:[#allocation7 + $0x2f8] sm:$0xff] }
  0xc1   :  { %1687 = vmatprep.subr.mxu0 %v1300_v27  ;;  %1620 = vmatprep.subr.mxu1 %v1282_v41  ;;  %v1257_v27 = vld [vmem:[#allocation7 + $0x2a0] sm:$0xff]  ;;  %v1267_v41 = vld [vmem:[#allocation7 + $0x2f0] sm:$0xff] }
  0xc2   :  { %1688 = vmatpush1.msra.mxu0 %v1299_v10  ;;  %1621 = vmatpush1.msra.mxu1 %v1281_v0  ;;  %v1250_v10 = vld [vmem:[#allocation7 + $0x268] sm:$0xff]  ;;  %v1260_v0 = vld [vmem:[#allocation7 + $0x2b8] sm:$0xff] }
  0xc3   :  { %1689 = vmatprep.subr.mxu0 %v1292_v8  ;;  %1622 = vmatprep.subr.mxu1 %v1274_v21  ;;  %v1249_v8 = vld [vmem:[#allocation7 + $0x260] sm:$0xff]  ;;  %v1259_v21 = vld [vmem:[#allocation7 + $0x2b0] sm:$0xff] }
  0xc4   :  { %1690 = vmatpush1.msra.mxu0 %v1291_v59  ;;  %1623 = vmatpush1.msra.mxu1 %v1273_v32  ;;  %v4424_v59 = vld [vmem:[#allocation7 + $0x228] sm:$0xff]  ;;  %v4426_v32 = vld [vmem:[#allocation7 + $0x220] sm:$0xff] }
  0xc5   :  { %1691 = vmatprep.subr.mxu0 %v1284_v49  ;;  %1624 = vmatprep.subr.mxu1 %v1266_v37  ;;  %6149 = vst [vmem:[#allocation19_spill] sm:$0xff] %v4426_v32  ;;  %v1251_v49 = vld [vmem:[#allocation7 + $0x270] sm:$0xff]  ;;  %v4434_v37 = vld [vmem:[#allocation7 + $0x1a8] sm:$0xff] }
  0xc6   :  { %1692 = vmatpush1.msra.mxu0 %v1283_v25  ;;  %1625 = vmatpush1.msra.mxu1 %v1265_v53  ;;  %v1252_v25 = vld [vmem:[#allocation7 + $0x278] sm:$0xff]  ;;  %v4428_v53 = vld [vmem:[#allocation7 + $0x1e8] sm:$0xff]  ;;  %6152 = vst [vmem:[#allocation22_spill] sm:$0xff] %v4434_v37 }
  0xc7   :  { %1693 = vmatprep.subr.mxu0 %v1276_v55  ;;  %1626 = vmatprep.subr.mxu1 %v1258_v45  ;;  %6150 = vst [vmem:[#allocation20_spill] sm:$0xff] %v4428_v53  ;;  %v1244_v45 = vld [vmem:[#allocation7 + $0x238] sm:$0xff]  ;;  %v1243_v55 = vld [vmem:[#allocation7 + $0x230] sm:$0xff] }
  0xc8   :  { %1694 = vmatpush1.msra.mxu0 %v1275_v29  ;;  %1627 = vmatpush1.msra.mxu1 %v1257_v27  ;;  %v4431_v29 = vld [vmem:[#allocation7 + $0x1e0] sm:$0xff] }
  0xc9   :  { %1695 = vmatprep.subr.mxu0 %v1268_v1  ;;  %1628 = vmatprep.subr.mxu1 %v1250_v10  ;;  %6151 = vst [vmem:[#allocation21_spill] sm:$0xff] %v4431_v29  ;;  %v4437_v27 = vld [vmem:[#allocation7 + $0x1a0] sm:$0xff]  ;;  %v1236_v1 = vld [vmem:[#allocation7 + $0x1f8] sm:$0xff]  ;;  %v4440_v10 = vld [vmem:[#allocation7 + $0x168] sm:$0xff] }
  0xca   :  { %1696 = vmatpush1.msra.mxu0 %v1267_v41  ;;  %1629 = vmatpush1.msra.mxu1 %v1249_v8  ;;  %6153 = vst [vmem:[#allocation23_spill] sm:$0xff] %v4437_v27  ;;  %6154 = vst [vmem:[#allocation24_spill] sm:$0xff] %v4440_v10  ;;  %v1235_v41 = vld [vmem:[#allocation7 + $0x1f0] sm:$0xff]  ;;  %v4443_v8 = vld [vmem:[#allocation7 + $0x160] sm:$0xff] }
  0xcb   :  { %1697 = vmatprep.subr.mxu0 %v1260_v0  ;;  %1630 = vmatprep.subr.mxu1 %v4424_v59  ;;  %6155 = vst [vmem:[#allocation25_spill] sm:$0xff] %v4443_v8  ;;  %v1228_v0 = vld [vmem:[#allocation7 + $0x1b8] sm:$0xff] }
  0xcc   :  { %1698 = vmatpush1.msra.mxu0 %v1259_v21  ;;  %1631 = vmatpush1.msra.mxu1 %v4426_v32  ;;  %v4446_v21 = vld [vmem:[#allocation7 + $0x128] sm:$0xff]  ;;  %v1412_v32 = vld [vmem:[#allocation7 + $0x778] sm:$0xff] }
  0xcd   :  { %1699 = vmatprep.subr.mxu0 %v1252_v25  ;;  %1632 = vmatprep.subr.mxu1 %v4428_v53  ;;  %6156 = vst [vmem:[#allocation26_spill] sm:$0xff] %v4446_v21  ;;  %v1227_v25 = vld [vmem:[#allocation7 + $0x1b0] sm:$0xff] }
  0xce   :  { %1700 = vmatpush1.msra.mxu0 %v1251_v49  ;;  %1633 = vmatpush1.msra.mxu1 %v4431_v29  ;;  %v4449_v49 = vld [vmem:[#allocation7 + $0x120] sm:$0xff] }
  0xcf   :  { %1701 = vmatprep.subr.mxu0 %v1244_v45  ;;  %1634 = vmatprep.subr.mxu1 %v4434_v37  ;;  %6157 = vst [vmem:[#allocation27_spill] sm:$0xff] %v4449_v49  ;;  %v1220_v45 = vld [vmem:[#allocation7 + $0x178] sm:$0xff]  ;;  %v4452_v37 = vld [vmem:[#allocation7 + $0xe8] sm:$0xff] }
  0xd0   :  { %1702 = vmatpush1.msra.mxu0 %v1243_v55  ;;  %1635 = vmatpush1.msra.mxu1 %v4437_v27  ;;  %6158 = vst [vmem:[#allocation28_spill] sm:$0xff] %v4452_v37  ;;  %v1219_v55 = vld [vmem:[#allocation7 + $0x170] sm:$0xff]  ;;  %v1212_v27 = vld [vmem:[#allocation7 + $0x138] sm:$0xff] }
  0xd1   :  { %1703 = vmatprep.subr.mxu0 %v1236_v1  ;;  %1636 = vmatprep.subr.mxu1 %v4440_v10  ;;  %v4455_v1 = vld [vmem:[#allocation7 + $0xe0] sm:$0xff]  ;;  %v1211_v10 = vld [vmem:[#allocation7 + $0x130] sm:$0xff] }
  0xd2   :  { %1704 = vmatpush1.msra.mxu0 %v1235_v41  ;;  %1637 = vmatpush1.msra.mxu1 %v4443_v8  ;;  %v138_v29 = vpop.f32.mrf.mxu0  ;;  %6159 = vst [vmem:[#allocation29_spill] sm:$0xff] %v4455_v1  ;;  %v4458_v41 = vld [vmem:[#allocation7 + $0xa8] sm:$0xff]  ;;  %v1204_v8 = vld [vmem:[#allocation7 + $0xf8] sm:$0xff] }
  0xd3   :  { %1705 = vmatprep.subr.mxu0 %v1228_v0  ;;  %1638 = vmatprep.subr.mxu1 %v4446_v21  ;;  %6160 = vst [vmem:[#allocation30_spill] sm:$0xff] %v4458_v41  ;;  %v4461_v0 = vld [vmem:[#allocation7 + $0xa0] sm:$0xff]  ;;  %v1203_v21 = vld [vmem:[#allocation7 + $0xf0] sm:$0xff] }
  0xd4   :  { %1706 = vmatpush1.msra.mxu0 %v1227_v25  ;;  %1639 = vmatpush1.msra.mxu1 %v4449_v49  ;;  %v3163_v53 = vpop.f32.mrf.mxu0  ;;  %6161 = vst [vmem:[#allocation31_spill] sm:$0xff] %v4461_v0  ;;  %v4464_v25 = vld [vmem:[#allocation7 + $0x68] sm:$0xff]  ;;  %v1196_v49 = vld [vmem:[#allocation7 + $0xb8] sm:$0xff] }
  0xd5   :  { %1707 = vmatprep.subr.mxu0 %v1220_v45  ;;  %1640 = vmatprep.subr.mxu1 %v4452_v37  ;;  %6162 = vst [vmem:[#allocation32_spill] sm:$0xff] %v4464_v25  ;;  %v4467_v45 = vld [vmem:[#allocation7 + $0x60] sm:$0xff]  ;;  %v4470_v53 = vld [vmem:[#allocation7 + $0x28] sm:$0xff] }
  0xd6   :  { %1708 = vmatpush1.msra.mxu0 %v1219_v55  ;;  %1641 = vmatpush1.msra.mxu1 %v4455_v1  ;;  %6163 = vst [vmem:[#allocation33_spill] sm:$0xff] %v4467_v45  ;;  %6164 = vst [vmem:[#allocation34_spill] sm:$0xff] %v4470_v53  ;;  %v1195_v55 = vld [vmem:[#allocation7 + $0xb0] sm:$0xff]  ;;  %v4473_v1 = vld [vmem:[#allocation7 + $0x20] sm:$0xff] }
  0xd7   :  { %1709 = vmatprep.subr.mxu0 %v1212_v27  ;;  %1642 = vmatprep.subr.mxu1 %v4458_v41  ;;  %6165 = vst [vmem:[#allocation35_spill] sm:$0xff] %v4473_v1  ;;  %v1188_v27 = vld [vmem:[#allocation7 + $0x78] sm:$0xff]  ;;  %v4476_v41 = vld [vmem:[#allocation7 + $0x7e8] sm:$0xff]  ;;  %v4502_v37 = vld [vmem:[#allocation7 + $0x720] sm:$0xff] }
  0xd8   :  { %1710 = vmatpush1.msra.mxu0 %v1211_v10  ;;  %1643 = vmatpush1.msra.mxu1 %v4461_v0  ;;  %6166 = vst [vmem:[#allocation36_spill] sm:$0xff] %v4476_v41  ;;  %v1187_v10 = vld [vmem:[#allocation7 + $0x70] sm:$0xff]  ;;  %v4479_v0 = vld [vmem:[#allocation7 + $0x7e0] sm:$0xff]  ;;  %6172 = vst [vmem:[#allocation42_spill] sm:$0xff] %v4502_v37 }
  0xd9   :  { %1711 = vmatprep.subr.mxu0 %v1204_v8  ;;  %1644 = vmatprep.subr.mxu1 %v4464_v25  ;;  %6167 = vst [vmem:[#allocation37_spill] sm:$0xff] %v4479_v0  ;;  %v1180_v8 = vld [vmem:[#allocation7 + $0x38] sm:$0xff]  ;;  %v4482_v25 = vld [vmem:[#allocation7 + $0x7a8] sm:$0xff] }
  0xda   :  { %1712 = vmatpush1.msra.mxu0 %v1203_v21  ;;  %1645 = vmatpush1.msra.mxu1 %v4467_v45  ;;  %v1179_v21 = vld [vmem:[#allocation7 + $0x30] sm:$0xff]  ;;  %v4485_v45 = vld [vmem:[#allocation7 + $0x7a0] sm:$0xff] }
  0xdb   :  { %1713 = vmatprep.subr.mxu0 %v1196_v49  ;;  %1646 = vmatprep.subr.mxu1 %v4470_v53  ;;  %6168 = vst [vmem:[#allocation38_spill] sm:$0xff] %v4485_v45  ;;  %v1428_v49 = vld [vmem:[#allocation7 + $0x7f8] sm:$0xff]  ;;  %v4491_v53 = vld [vmem:[#allocation7 + $0x768] sm:$0xff] }
  0xdc   :  { %1714 = vmatpush1.msra.mxu0 %v1195_v55  ;;  %1647 = vmatpush1.msra.mxu1 %v4473_v1  ;;  %v2971_v55 = vld [vmem:[%s5919_s2] ss:$0 sm:$0xff]  ;;  %v1427_v1 = vld [vmem:[#allocation7 + $0x7f0] sm:$0xff]  ;;  %s3610_s2 = smov 96  }
  0xdd   :  { %1715 = vmatprep.subr.mxu0 %v1188_v27  ;;  %1648 = vmatprep.subr.mxu1 %v4476_v41  ;;  %v4494_v27 = vld [vmem:[#allocation7 + $0x760] sm:$0xff]  ;;  %v1420_v41 = vld [vmem:[#allocation7 + $0x7b8] sm:$0xff] }
  0xde   :  { %1716 = vmatpush1.msra.mxu0 %v1187_v10  ;;  %1649 = vmatpush2.msra.mxu1 %v4479_v0  ;;  %6169 = vst [vmem:[#allocation39_spill] sm:$0xff] %v4494_v27  ;;  %v4497_v10 = vld [vmem:[#allocation7 + $0x728] sm:$0xff]  ;;  %v1419_v0 = vld [vmem:[#allocation7 + $0x7b0] sm:$0xff] }
  0xdf   :  { %1717 = vmatprep.subr.mxu0 %v1180_v8  ;;  %1650 = vmatprep.subr.mxu1 %v4482_v25  ;;  %6170 = vst [vmem:[#allocation40_spill] sm:$0xff] %v4497_v10  ;;  %v4499_v8 = vadd.f32 %v2971_v55, %v138_v29  ;;  %v1404_v29 = vld [vmem:[#allocation7 + $0x738] sm:$0xff]  ;;  %v4511_v55 = vld [vmem:[#allocation7 + $0x6a8] sm:$0xff] }
  0xe0   :  { %1718 = vmatpush1.msra.mxu0 %v1179_v21  ;;  %1651 = vmatpush2.msra.mxu1 %v4485_v45  ;;  %v4505_v21 = vld [vmem:[#allocation7 + $0x6e8] sm:$0xff]  ;;  %v4508_v45 = vld [vmem:[#allocation7 + $0x6e0] sm:$0xff]  ;;  %6175 = vst [vmem:[#allocation45_spill] sm:$0xff] %v4511_v55 }
  0xe1   :  { %1719 = vmatprep.subr.mxu0 %v1428_v49  ;;  %6171 = vst [vmem:[#allocation41_spill] sm:$0xff] %v4499_v8  ;;  %1652 = vmatprep.subr.mxu1 %v4491_v53  ;;  %6173 = vst [vmem:[#allocation43_spill] sm:$0xff] %v4505_v21  ;;  %v1411_v49 = vld [vmem:[#allocation7 + $0x770] sm:$0xff] }
  0xe2   :  { %1720 = vmatpush2.msra.mxu0 %v1427_v1  ;;  %1653 = vmatpush2.msra.mxu1 %v4494_v27  ;;  %6174 = vst [vmem:[#allocation44_spill] sm:$0xff] %v4508_v45  ;;  %v1403_v1 = vld [vmem:[#allocation7 + $0x730] sm:$0xff]  ;;  %v4575_v27 = vld [vmem:[#allocation7 + $0x460] sm:$0xff] }
  0xe3   :  { %1721 = vmatprep.subr.mxu0 %v1420_v41  ;;  %1654 = vmatprep.subr.mxu1 %v4497_v10  ;;  %v4516_v41 = vld [vmem:[#allocation7 + $0x6a0] sm:$0xff]  ;;  %v4519_v10 = vld [vmem:[#allocation7 + $0x668] sm:$0xff]  ;;  %6193 = vst [vmem:[#allocation63_spill] sm:$0xff] %v4575_v27 }
  0xe4   :  { %1722 = vmatpush2.msra.mxu0 %v1419_v0  ;;  %1655 = vmatpush2.msra.mxu1 %v4502_v37  ;;  %6176 = vst [vmem:[#allocation46_spill] sm:$0xff] %v4516_v41  ;;  %v1396_v0 = vld [vmem:[#allocation7 + $0x6f8] sm:$0xff]  ;;  %6177 = vst [vmem:[#allocation47_spill] sm:$0xff] %v4519_v10  ;;  %v4522_v37 = vld [vmem:[#allocation7 + $0x660] sm:$0xff] }
  0xe5   :  { %1723 = vmatprep.subr.mxu0 %v1412_v32  ;;  %2932 = vrot.lane.b32.xlu1 %v4499_v8, %s3610_s2  ;;  %v1395_v32 = vld [vmem:[#allocation7 + $0x6f0] sm:$0xff]  ;;  %6178 = vst [vmem:[#allocation48_spill] sm:$0xff] %v4522_v37  ;;  %v1388_v8 = vld [vmem:[#allocation7 + $0x6b8] sm:$0xff] }
  0xe6   :  { %1656 = vmatprep.subr.mxu1 %v4505_v21  ;;  %1724 = vmatpush2.msra.mxu0 %v1411_v49  ;;  %v4525_v21 = vld [vmem:[#allocation7 + $0x628] sm:$0xff]  ;;  %v1387_v49 = vld [vmem:[#allocation7 + $0x6b0] sm:$0xff] }
  0xe7   :  { %1657 = vmatpush2.msra.mxu1 %v4508_v45  ;;  %1725 = vmatprep.subr.mxu0 %v1404_v29  ;;  %6179 = vst [vmem:[#allocation49_spill] sm:$0xff] %v4525_v21  ;;  %v4528_v45 = vld [vmem:[#allocation7 + $0x620] sm:$0xff]  ;;  %v1380_v29 = vld [vmem:[#allocation7 + $0x678] sm:$0xff] }
  0xe8   :  { %1658 = vmatprep.subr.mxu1 %v4511_v55  ;;  %1726 = vmatpush2.msra.mxu0 %v1403_v1  ;;  %6180 = vst [vmem:[#allocation50_spill] sm:$0xff] %v4528_v45  ;;  %v4531_v55 = vld [vmem:[#allocation7 + $0x5e8] sm:$0xff]  ;;  %v1379_v1 = vld [vmem:[#allocation7 + $0x670] sm:$0xff] }
  0xe9   :  { %1659 = vmatpush2.msra.mxu1 %v4516_v41  ;;  %1727 = vmatprep.subr.mxu0 %v1396_v0  ;;  %6181 = vst [vmem:[#allocation51_spill] sm:$0xff] %v4531_v55  ;;  %v4534_v41 = vld [vmem:[#allocation7 + $0x5e0] sm:$0xff]  ;;  %v1372_v0 = vld [vmem:[#allocation7 + $0x638] sm:$0xff] }
  0xea   :  { %1660 = vmatprep.subr.mxu1 %v4519_v10  ;;  %1728 = vmatpush2.msra.mxu0 %v1395_v32  ;;  %6182 = vst [vmem:[#allocation52_spill] sm:$0xff] %v4534_v41  ;;  %v4537_v10 = vld [vmem:[#allocation7 + $0x5a8] sm:$0xff]  ;;  %v1371_v32 = vld [vmem:[#allocation7 + $0x630] sm:$0xff] }
  0xeb   :  { %1661 = vmatpush2.msra.mxu1 %v4522_v37  ;;  %1729 = vmatprep.subr.mxu0 %v1388_v8  ;;  %6183 = vst [vmem:[#allocation53_spill] sm:$0xff] %v4537_v10  ;;  %v4540_v37 = vld [vmem:[#allocation7 + $0x5a0] sm:$0xff]  ;;  %v1364_v8 = vld [vmem:[#allocation7 + $0x5f8] sm:$0xff] }
  0xec   :  { %1662 = vmatprep.subr.mxu1 %v4525_v21  ;;  %1730 = vmatpush2.msra.mxu0 %v1387_v49  ;;  %6184 = vst [vmem:[#allocation54_spill] sm:$0xff] %v4540_v37  ;;  %v4543_v21 = vld [vmem:[#allocation7 + $0x568] sm:$0xff]  ;;  %v1363_v49 = vld [vmem:[#allocation7 + $0x5f0] sm:$0xff] }
  0xed   :  { %1663 = vmatpush2.msra.mxu1 %v4528_v45  ;;  %1731 = vmatprep.subr.mxu0 %v1380_v29  ;;  %6185 = vst [vmem:[#allocation55_spill] sm:$0xff] %v4543_v21  ;;  %v4546_v45 = vld [vmem:[#allocation7 + $0x560] sm:$0xff]  ;;  %v1356_v29 = vld [vmem:[#allocation7 + $0x5b8] sm:$0xff] }
  0xee   :  { %1664 = vmatprep.subr.mxu1 %v4531_v55  ;;  %1732 = vmatpush2.msra.mxu0 %v1379_v1  ;;  %6186 = vst [vmem:[#allocation56_spill] sm:$0xff] %v4546_v45  ;;  %v4549_v55 = vld [vmem:[#allocation7 + $0x528] sm:$0xff]  ;;  %v1355_v1 = vld [vmem:[#allocation7 + $0x5b0] sm:$0xff] }
  0xef   :  { %1665 = vmatpush2.msra.mxu1 %v4534_v41  ;;  %1733 = vmatprep.subr.mxu0 %v1372_v0  ;;  %6187 = vst [vmem:[#allocation57_spill] sm:$0xff] %v4549_v55  ;;  %v4552_v41 = vld [vmem:[#allocation7 + $0x520] sm:$0xff]  ;;  %v1348_v0 = vld [vmem:[#allocation7 + $0x578] sm:$0xff] }
  0xf0   :  { %1666 = vmatprep.subr.mxu1 %v4537_v10  ;;  %1734 = vmatpush2.msra.mxu0 %v1371_v32  ;;  %6188 = vst [vmem:[#allocation58_spill] sm:$0xff] %v4552_v41  ;;  %v4555_v10 = vld [vmem:[#allocation7 + $0x4e8] sm:$0xff]  ;;  %v1347_v32 = vld [vmem:[#allocation7 + $0x570] sm:$0xff] }
  0xf1   :  { %1667 = vmatpush2.msra.mxu1 %v4540_v37  ;;  %1735 = vmatprep.subr.mxu0 %v1364_v8  ;;  %v4558_v37 = vld [vmem:[#allocation7 + $0x4e0] sm:$0xff]  ;;  %v1340_v8 = vld [vmem:[#allocation7 + $0x538] sm:$0xff] }
  0xf2   :  { %1668 = vmatprep.subr.mxu1 %v4543_v21  ;;  %1736 = vmatpush2.msra.mxu0 %v1363_v49  ;;  %6189 = vst [vmem:[#allocation59_spill] sm:$0xff] %v4558_v37  ;;  %v4561_v21 = vld [vmem:[#allocation7 + $0x4a8] sm:$0xff]  ;;  %v1461_v49 = vld [vmem:[%s5929_s12] sm:$0xff] }
  0xf3   :  { %1669 = vmatpush2.msra.mxu1 %v4546_v45  ;;  %1737 = vmatprep.subr.mxu0 %v1356_v29  ;;  %6190 = vst [vmem:[#allocation60_spill] sm:$0xff] %v4561_v21  ;;  %v1339_v45 = vld [vmem:[#allocation7 + $0x530] sm:$0xff]  ;;  %v4567_v29 = vld [vmem:[#allocation7 + $0x4a0] sm:$0xff]  ;;  %vm1900_vm3 = vcmp.eq.s32.totalorder %v1461_v49, 0  ;;  %vm2355_vm4 = vcmp.eq.s32.totalorder %v1461_v49, 1 }
  0xf4   :  { %1670 = vmatprep.subr.mxu1 %v4549_v55  ;;  %1738 = vmatpush2.msra.mxu0 %v1355_v1  ;;  %v1332_v55 = vld [vmem:[#allocation7 + $0x4f8] sm:$0xff]  ;;  %v4570_v1 = vld [vmem:[#allocation7 + $0x468] sm:$0xff]  ;;  %v3003_v49 = vsel %vm2355_vm4, 1.0, %v6135_v60 }
  0xf5   :  { %1671 = vmatpush2.msra.mxu1 %v4552_v41  ;;  %1739 = vmatprep.subr.mxu0 %v1348_v0  ;;  %6191 = vst [vmem:[#allocation61_spill] sm:$0xff] %v4570_v1  ;;  %v4573_v41 = vld [vmem:[#allocation7 + $0x4f0] sm:$0xff]  ;;  %v4578_v0 = vld [vmem:[#allocation7 + $0x4b8] sm:$0xff] }
  0xf6   :  { %1672 = vmatprep.subr.mxu1 %v4555_v10  ;;  %1740 = vmatpush2.msra.mxu0 %v1347_v32  ;;  %6192 = vst [vmem:[#allocation62_spill] sm:$0xff] %v4573_v41  ;;  %6194 = vst [vmem:[#allocation64_spill] sm:$0xff] %v4578_v0  ;;  %v4580_v32 = vld [vmem:[#allocation7 + $0x428] sm:$0xff] }
  0xf7   :  { %1673 = vmatpush2.msra.mxu1 %v4558_v37  ;;  %1741 = vmatprep.subr.mxu0 %v1340_v8  ;;  %v4583_v37 = vld [vmem:[#allocation7 + $0x4b0] sm:$0xff]  ;;  %v4585_v8 = vld [vmem:[#allocation7 + $0x420] sm:$0xff] }
  0xf8   :  { %1674 = vmatprep.subr.mxu1 %v4561_v21  ;;  %1742 = vmatpush2.msra.mxu0 %v1339_v45  ;;  %6195 = vst [vmem:[#allocation65_spill] sm:$0xff] %v4583_v37  ;;  %v4589_v21 = vld [vmem:[#allocation7 + $0x478] sm:$0xff]  ;;  %v2994_v45 = vsel %vm1900_vm3, 1.0, %v6135_v60  ;;  %v5378_v60 = vld [vmem:[#allocation7 + $0xf0] sm:$0xff] }
  0xf9   :  { %1675 = vmatpush2.msra.mxu1 %v4567_v29  ;;  %1743 = vmatprep.subr.mxu0 %v1332_v55  ;;  %6196 = vst [vmem:[#allocation66_spill] sm:$0xff] %v4589_v21  ;;  %v4595_v55 = vld [vmem:[#allocation7 + $0x470] sm:$0xff] }
  0xfa   :  { %1676 = vmatprep.subr.mxu1 %v4570_v1  ;;  %1744 = vmatpush2.msra.mxu0 %v4573_v41  ;;  %6197 = vst [vmem:[#allocation67_spill] sm:$0xff] %v4595_v55  ;;  %v4599_v1 = vld [vmem:[#allocation7 + $0x438] sm:$0xff]  ;;  %v4603_v41 = vld [vmem:[#allocation7 + $0x430] sm:$0xff] }
  0xfb   :  { %1677 = vmatpush2.msra.mxu1 %v4575_v27  ;;  %1745 = vmatprep.subr.mxu0 %v4578_v0  ;;  %6198 = vst [vmem:[#allocation68_spill] sm:$0xff] %v4599_v1  ;;  %6199 = vst [vmem:[#allocation69_spill] sm:$0xff] %v4603_v41  ;;  %v3173_v27 = vpack.i.bf16 %v3003_v49, %v2994_v45  ;;  %v4611_v0 = vld [vmem:[#allocation7 + $0x3c8] sm:$0xff]  ;;  %v4614_v45 = vld [vmem:[#allocation7 + $0x3c0] sm:$0xff] }
  0xfc   :  { %1678 = vmatprep.subr.mxu1 %v4580_v32  ;;  %1746 = vmatpush2.msra.mxu0 %v4583_v37  ;;  %v3611_v37 = vmov 0   ;;  %6200 = vst [vmem:[#allocation70_spill] sm:$0xff] %v4611_v0  ;;  %6201 = vst [vmem:[#allocation71_spill] sm:$0xff] %v4614_v45  ;;  %v4617_v49 = vld [vmem:[#allocation7 + $0x388] sm:$0xff] }
  0xfd   :  { %1679 = vmatpush2.msra.mxu1 %v4585_v8  ;;  %1680 = vmatprep.mubr.f32.mxu1 %v4406_v2  ;;  %6202 = vst [vmem:[#allocation72_spill] sm:$0xff] %v4617_v49 }
  0xfe   :  { %1747 = vmatprep.subr.mxu0 %v4589_v21  ;;  %1681 = vmatmul.mubr.f32.vlgmr.msra.gmra.mxu1 %v4412_v14 }
  0xff   :  { %1748 = vmatpush2.msra.mxu0 %v4595_v55  ;;  %1751 = vmatprep.mubr.f32.mxu0 %v4406_v2  ;;  %v4620_v2 = vld [vmem:[#allocation7 + $0x380] sm:$0xff] }
 0x100   :  { %1749 = vmatprep.subr.mxu0 %v4599_v1  ;;  %3172 = vset.pattern.permute.xlu0 %v3611_v37  ;;  %6203 = vst [vmem:[#allocation73_spill] sm:$0xff] %v4620_v2  ;;  %v4623_v37 = vld [vmem:[#allocation7 + $0x348] sm:$0xff] }
 0x101   :  { %1750 = vmatpush2.msra.mxu0 %v4603_v41  ;;  %3174 = vperm.xlu0 %3172, %v3173_v27   ;;  %6204 = vst [vmem:[#allocation74_spill] sm:$0xff] %v4623_v37  ;;  %v4629_v27 = vld [vmem:[#allocation7 + $0x308] sm:$0xff]  ;;  %v6249_v41 = vld [vmem:[#allocation13_spill] sm:$0xff] }
 0x102   :  { %1752 = vmatmul.mubr.f32.vlgmr.msra.gmra.mxu0 %v4412_v14  ;;  %1928 = vmatprep.subr.mxu0 %v4611_v0  ;;  %v4626_v14 = vld [vmem:[#allocation7 + $0x340] sm:$0xff]  ;;  %6206 = vst [vmem:[#allocation76_spill] sm:$0xff] %v4629_v27 }
 0x103   :  { %1929 = vmatpush1.msra.mxu0 %v4614_v45  ;;  %6205 = vst [vmem:[#allocation75_spill] sm:$0xff] %v4626_v14  ;;  %v4632_v45 = vld [vmem:[#allocation7 + $0x300] sm:$0xff] }
 0x104   :  { %1930 = vmatprep.subr.mxu0 %v4617_v49  ;;  %6207 = vst [vmem:[#allocation77_spill] sm:$0xff] %v4632_v45  ;;  %v4635_v49 = vld [vmem:[#allocation7 + $0x2c8] sm:$0xff] }
 0x105   :  { %1931 = vmatpush1.msra.mxu0 %v4620_v2  ;;  %6208 = vst [vmem:[#allocation78_spill] sm:$0xff] %v4635_v49  ;;  %v4638_v2 = vld [vmem:[#allocation7 + $0x2c0] sm:$0xff] }
 0x106   :  { %1932 = vmatprep.subr.mxu0 %v4623_v37  ;;  %6209 = vst [vmem:[#allocation79_spill] sm:$0xff] %v4638_v2  ;;  %v4641_v37 = vld [vmem:[#allocation7 + $0x288] sm:$0xff] }
 0x107   :  { %1933 = vmatpush1.msra.mxu0 %v4626_v14  ;;  %6210 = vst [vmem:[#allocation80_spill] sm:$0xff] %v4641_v37  ;;  %v4644_v14 = vld [vmem:[#allocation7 + $0x280] sm:$0xff] }
 0x108   :  { %1934 = vmatprep.subr.mxu0 %v4629_v27  ;;  %6211 = vst [vmem:[#allocation81_spill] sm:$0xff] %v4644_v14  ;;  %v4647_v27 = vld [vmem:[#allocation7 + $0x248] sm:$0xff] }
 0x109   :  { %1935 = vmatpush1.msra.mxu0 %v4632_v45  ;;  %6212 = vst [vmem:[#allocation82_spill] sm:$0xff] %v4647_v27  ;;  %v4650_v45 = vld [vmem:[#allocation7 + $0x240] sm:$0xff] }
 0x10a   :  { %1936 = vmatprep.subr.mxu0 %v4635_v49  ;;  %6213 = vst [vmem:[#allocation83_spill] sm:$0xff] %v4650_v45 }
 0x10b   :  { %1937 = vmatpush1.msra.mxu0 %v4638_v2 }
 0x10c   :  { %1938 = vmatprep.subr.mxu0 %v4641_v37 }
 0x10d   :  { %1939 = vmatpush1.msra.mxu0 %v4644_v14 }
 0x10e   :  { %1940 = vmatprep.subr.mxu0 %v4647_v27 }
 0x10f   :  { %1941 = vmatpush1.msra.mxu0 %v4650_v45 }
 0x110   :  { %1942 = vmatprep.subr.mxu0 %v4250_v31  ;;  %v6214_v31 = vld [vmem:[#allocation10_spill] sm:$0xff] }
 0x111   :  { %1943 = vmatpush1.msra.mxu0 %v4252_v33  ;;  %v6215_v33 = vld [vmem:[#allocation14_spill] sm:$0xff] }
 0x112   :  { %1944 = vmatprep.subr.mxu0 %v4254_v36  ;;  %v6216_v36 = vld [vmem:[#allocation15_spill] sm:$0xff] }
 0x113   :  { %1945 = vmatpush1.msra.mxu0 %v4257_v38  ;;  %v6217_v38 = vld [vmem:[#allocation16_spill] sm:$0xff] }
 0x114   :  { %1946 = vmatprep.subr.mxu0 %v4260_v40  ;;  %v6218_v40 = vld [vmem:[#allocation17_spill] sm:$0xff] }
 0x115   :  { %1947 = vmatpush1.msra.mxu0 %v4263_v42  ;;  %v6219_v42 = vld [vmem:[#allocation18_spill] sm:$0xff] }
 0x116   :  { %1948 = vmatprep.subr.mxu0 %v4266_v44  ;;  %v4707_v44 = vld [vmem:[%s5926_s9 + $0xf8] sm:$0xff] }
 0x117   :  { %1949 = vmatpush1.msra.mxu0 %v4269_v46  ;;  %3017 = vmatprep.subr.mxu1 %v4707_v44  ;;  %v4713_v46 = vld [vmem:[%s5926_s9 + $0x78] sm:$0xff] }
 0x118   :  { %1950 = vmatprep.subr.mxu0 %v4272_v48  ;;  %3018 = vmatpush3.msra.mxu1 %v4713_v46  ;;  %v4719_v48 = vld [vmem:[%s5926_s9 + $0xf0] sm:$0xff] }
 0x119   :  { %1951 = vmatpush1.msra.mxu0 %v4275_v50  ;;  %3019 = vmatprep.subr.mxu1 %v4719_v48  ;;  %v4725_v50 = vld [vmem:[%s5926_s9 + $0x70] sm:$0xff] }
 0x11a   :  { %1952 = vmatprep.subr.mxu0 %v4278_v52  ;;  %3020 = vmatpush3.msra.mxu1 %v4725_v50  ;;  %v4731_v52 = vld [vmem:[%s5926_s9 + $0xe8] sm:$0xff] }
 0x11b   :  { %1953 = vmatpush1.msra.mxu0 %v4281_v54  ;;  %3021 = vmatprep.subr.mxu1 %v4731_v52  ;;  %v4737_v54 = vld [vmem:[%s5926_s9 + $0x68] sm:$0xff] }
 0x11c   :  { %1954 = vmatprep.subr.mxu0 %v4284_v56  ;;  %3022 = vmatpush3.msra.mxu1 %v4737_v54  ;;  %v4743_v56 = vld [vmem:[%s5926_s9 + $0xe0] sm:$0xff] }
 0x11d   :  { %1955 = vmatpush1.msra.mxu0 %v4287_v58  ;;  %3023 = vmatprep.subr.mxu1 %v4743_v56  ;;  %v4749_v58 = vld [vmem:[%s5926_s9 + $0x60] sm:$0xff] }
 0x11e   :  { %1956 = vmatprep.subr.mxu0 %v4290_v61  ;;  %3024 = vmatpush3.msra.mxu1 %v4749_v58  ;;  %v4755_v61 = vld [vmem:[%s5926_s9 + $0xd8] sm:$0xff] }
 0x11f   :  { %1957 = vmatpush1.msra.mxu0 %v4293_v63  ;;  %3025 = vmatprep.subr.mxu1 %v4755_v61  ;;  %v4761_v63 = vld [vmem:[%s5926_s9 + $0x58] sm:$0xff] }
 0x120   :  { %1958 = vmatprep.subr.mxu0 %v4296_v4  ;;  %3026 = vmatpush3.msra.mxu1 %v4761_v63  ;;  %v4767_v4 = vld [vmem:[%s5926_s9 + $0xd0] sm:$0xff] }
 0x121   :  { %1959 = vmatpush1.msra.mxu0 %v4299_v35  ;;  %3027 = vmatprep.subr.mxu1 %v4767_v4  ;;  %v4773_v35 = vld [vmem:[%s5926_s9 + $0x50] sm:$0xff] }
 0x122   :  { %1960 = vmatprep.subr.mxu0 %v4302_v3  ;;  %3028 = vmatpush3.msra.mxu1 %v4773_v35  ;;  %v4779_v3 = vld [vmem:[%s5926_s9 + $0xc8] sm:$0xff] }
 0x123   :  { %1961 = vmatpush2.msra.mxu0 %v4305_v7  ;;  %3029 = vmatprep.subr.mxu1 %v4779_v3  ;;  %v4785_v7 = vld [vmem:[%s5926_s9 + $0x48] sm:$0xff] }
 0x124   :  { %1962 = vmatprep.subr.mxu0 %v4308_v9  ;;  %3030 = vmatpush3.msra.mxu1 %v4785_v7  ;;  %v4791_v9 = vld [vmem:[%s5926_s9 + $0xc0] sm:$0xff] }
 0x125   :  { %1963 = vmatpush2.msra.mxu0 %v4311_v11  ;;  %3031 = vmatprep.subr.mxu1 %v4791_v9  ;;  %v4797_v11 = vld [vmem:[%s5926_s9 + $0x40] sm:$0xff] }
 0x126   :  { %1964 = vmatprep.subr.mxu0 %v4314_v13  ;;  %3032 = vmatpush3.msra.mxu1 %v4797_v11  ;;  %v4803_v13 = vld [vmem:[%s5926_s9 + $0xb8] sm:$0xff] }
 0x127   :  { %1965 = vmatpush2.msra.mxu0 %v4317_v15  ;;  %3033 = vmatprep.subr.mxu1 %v4803_v13  ;;  %v4809_v15 = vld [vmem:[%s5926_s9 + $0x38] sm:$0xff] }
 0x128   :  { %1966 = vmatprep.subr.mxu0 %v4320_v17  ;;  %3034 = vmatpush3.msra.mxu1 %v4809_v15  ;;  %v4815_v17 = vld [vmem:[%s5926_s9 + $0xb0] sm:$0xff] }
 0x129   :  { %1967 = vmatpush2.msra.mxu0 %v4323_v18  ;;  %3035 = vmatprep.subr.mxu1 %v4815_v17  ;;  %v4821_v18 = vld [vmem:[%s5926_s9 + $0x30] sm:$0xff] }
 0x12a   :  { %1968 = vmatprep.subr.mxu0 %v4326_v20  ;;  %3036 = vmatpush3.msra.mxu1 %v4821_v18  ;;  %v4827_v20 = vld [vmem:[%s5926_s9 + $0xa8] sm:$0xff] }
 0x12b   :  { %1969 = vmatpush2.msra.mxu0 %v4329_v22  ;;  %3037 = vmatprep.subr.mxu1 %v4827_v20  ;;  %v4833_v22 = vld [vmem:[%s5926_s9 + $0x28] sm:$0xff] }
 0x12c   :  { %1970 = vmatprep.subr.mxu0 %v4332_v24  ;;  %3038 = vmatpush3.msra.mxu1 %v4833_v22  ;;  %v4839_v24 = vld [vmem:[%s5926_s9 + $0xa0] sm:$0xff] }
 0x12d   :  { %1971 = vmatpush2.msra.mxu0 %v4335_v26  ;;  %3039 = vmatprep.subr.mxu1 %v4839_v24  ;;  %v4845_v26 = vld [vmem:[%s5926_s9 + $0x20] sm:$0xff] }
 0x12e   :  { %1972 = vmatprep.subr.mxu0 %v4338_v28  ;;  %6220 = vst [vmem:[#allocation10_spill] sm:$0xff] %v4845_v26  ;;  %3040 = vmatpush3.msra.mxu1 %v4845_v26  ;;  %v4851_v28 = vld [vmem:[%s5926_s9 + $0x98] sm:$0xff] }
 0x12f   :  { %1973 = vmatpush2.msra.mxu0 %v4341_v30  ;;  %6221 = vst [vmem:[#allocation14_spill] sm:$0xff] %v4851_v28  ;;  %3041 = vmatprep.subr.mxu1 %v4851_v28  ;;  %v4857_v30 = vld [vmem:[%s5926_s9 + $0x18] sm:$0xff] }
 0x130   :  { %1974 = vmatprep.subr.mxu0 %v4344_v34  ;;  %6222 = vst [vmem:[#allocation15_spill] sm:$0xff] %v4857_v30  ;;  %3042 = vmatpush3.msra.mxu1 %v4857_v30  ;;  %v4863_v34 = vld [vmem:[%s5926_s9 + $0x90] sm:$0xff] }
 0x131   :  { %1975 = vmatpush2.msra.mxu0 %v4347_v39  ;;  %6223 = vst [vmem:[#allocation16_spill] sm:$0xff] %v4863_v34  ;;  %3043 = vmatprep.subr.mxu1 %v4863_v34  ;;  %v4869_v39 = vld [vmem:[%s5926_s9 + $0x10] sm:$0xff] }
 0x132   :  { %1976 = vmatprep.subr.mxu0 %v4350_v43  ;;  %6224 = vst [vmem:[#allocation17_spill] sm:$0xff] %v4869_v39  ;;  %3044 = vmatpush3.msra.mxu1 %v4869_v39  ;;  %v4875_v43 = vld [vmem:[%s5926_s9 + $0x88] sm:$0xff] }
 0x133   :  { %1977 = vmatpush2.msra.mxu0 %v4353_v47  ;;  %6225 = vst [vmem:[#allocation18_spill] sm:$0xff] %v4875_v43  ;;  %3045 = vmatprep.subr.mxu1 %v4875_v43  ;;  %v4881_v47 = vld [vmem:[%s5926_s9 + $0x8] sm:$0xff] }
 0x134   :  { %1978 = vmatprep.subr.mxu0 %v4356_v51  ;;  %6226 = vst [vmem:[#allocation84_spill] sm:$0xff] %v4881_v47  ;;  %3046 = vmatpush3.msra.mxu1 %v4881_v47  ;;  %v4887_v51 = vld [vmem:[%s5926_s9 + $0x80] sm:$0xff] }
 0x135   :  { %1979 = vmatpush2.msra.mxu0 %v4359_v57  ;;  %6227 = vst [vmem:[#allocation85_spill] sm:$0xff] %v4887_v51  ;;  %3047 = vmatprep.subr.mxu1 %v4887_v51  ;;  %v4893_v57 = vld [vmem:[%s5926_s9] sm:$0xff] }
 0x136   :  { %1980 = vmatprep.subr.mxu0 %v4362_v62  ;;  %6228 = vst [vmem:[#allocation86_spill] sm:$0xff] %v4893_v57  ;;  %3048 = vmatpush3.msra.mxu1 %v4893_v57  ;;  %v4896_v62 = vld [vmem:[#allocation7 + $0x3d8] sm:$0xff] }
 0x137   :  { %1981 = vmatpush2.msra.mxu0 %v4365_v6  ;;  %6229 = vst [vmem:[#allocation87_spill] sm:$0xff] %v4896_v62  ;;  %1999 = vmatprep.subr.mxu1 %v4896_v62  ;;  %v319_v6 = vpop.f32.mrf.mxu1 }
 0x138   :  { %1982 = vmatprep.subr.mxu0 %v4368_v5  ;;  %v390_v5 = vpop.f32.mrf.mxu0 }
 0x139   :  { %1983 = vmatpush2.msra.mxu0 %v4373_v12  ;;  %v321_v12 = vpop.f32.mrf.mxu1 }
 0x13a   :  { %1984 = vmatprep.subr.mxu0 %v4376_v16  ;;  %v392_v16 = vpop.f32.mrf.mxu0 }
 0x13b   :  { %1985 = vmatpush2.msra.mxu0 %v4379_v19  ;;  %v461_v19 = vpop.f32.mrf.mxu1 }
 0x13c   :  { %1986 = vmatprep.subr.mxu0 %v4382_v23  ;;  %v4899_v23 = vpop.f32.mrf.mxu0 }
 0x13d   :  { %1987 = vmatpush2.msra.mxu0 %v6214_v31  ;;  %v4901_v31 = vpop.f32.mrf.mxu1 }
 0x13e   :  { %1988 = vmatprep.subr.mxu0 %v6215_v33  ;;  %v4903_v33 = vpop.f32.mrf.mxu0 }
 0x13f   :  { %1989 = vmatpush2.msra.mxu0 %v6216_v36  ;;  %v4905_v36 = vpop.f32.mrf.mxu1 }
 0x140   :  { %1990 = vmatprep.subr.mxu0 %v6217_v38  ;;  %6230 = vst [vmem:[#allocation88_spill] sm:$0xff] %v4905_v36  ;;  %v4907_v38 = vpop.f32.mrf.mxu0 }
 0x141   :  { %1991 = vmatpush2.msra.mxu0 %v6218_v40  ;;  %6231 = vst [vmem:[#allocation89_spill] sm:$0xff] %v4907_v38  ;;  %v4909_v40 = vpop.f32.mrf.mxu1 }
 0x142   :  { %2070 = vmatprep.subr.mxu0 %v6219_v42  ;;  %6232 = vst [vmem:[#allocation90_spill] sm:$0xff] %v4909_v40  ;;  %v4911_v42 = vpop.f32.mrf.mxu0 }
 0x143   :  { %6233 = vst [vmem:[#allocation91_spill] sm:$0xff] %v4911_v42  ;;  %v4913_v45 = vpop.f32.mrf.mxu1  ;;  %v6244_v42 = vld [vmem:[#allocation12_spill] sm:$0xff] }
 0x144   :  { %6234 = vst [vmem:[#allocation92_spill] sm:$0xff] %v4913_v45  ;;  %v4915_v27 = vpop.f32.mrf.mxu0 }
 0x145   :  { %6235 = vst [vmem:[#allocation93_spill] sm:$0xff] %v4915_v27  ;;  %v4917_v14 = vpop.f32.mrf.mxu1  ;;  %v206_v27 = vld [vmem:[%s5922_s5] sm:$0xff] }
 0x146   :  { %6236 = vst [vmem:[#allocation94_spill] sm:$0xff] %v4917_v14  ;;  %v4919_v37 = vpop.f32.mrf.mxu0  ;;  %v223_v14 = vsub.s32 3, %v6244_v42 }
 0x147   :  { %6237 = vst [vmem:[#allocation95_spill] sm:$0xff] %v4919_v37  ;;  %v4921_v2 = vpop.f32.mrf.mxu1 }
 0x148   :  { %6238 = vst [vmem:[#allocation96_spill] sm:$0xff] %v4921_v2  ;;  %v4923_v49 = vpop.f32.mrf.mxu0  ;;  %v6247_v2 = vld [vmem:[#allocation11_spill] sm:$0xff]  ;;  %v4948_v1 = vrot.slane %v206_v27, %v223_v14 }
 0x149   :  { %6239 = vst [vmem:[#allocation97_spill] sm:$0xff] %v4923_v49  ;;  %v4925_v0 = vpop.f32.mrf.mxu1  ;;  %v4942_v49 = vrot.slane %v206_v27, %v6247_v2 }
 0x14a   :  { %6240 = vst [vmem:[#allocation98_spill] sm:$0xff] %v4925_v0  ;;  %v4927_v36 = vpop.f32.mrf.mxu0  ;;  %v219_v0 = vsub.s32 2, %v6244_v42  ;;  %6250 = vst [vmem:[#allocation13_spill] sm:$0xff] %v4948_v1  ;;  %v393_v57 = vadd.f32 %v392_v16, %v4948_v1 }
 0x14b   :  { %6241 = vst [vmem:[#allocation99_spill] sm:$0xff] %v4927_v36  ;;  %v4929_v38 = vpop.f32.mrf.mxu1  ;;  %6248 = vst [vmem:[#allocation11_spill] sm:$0xff] %v4942_v49  ;;  %v320_v55 = vadd.f32 %v319_v6, %v4942_v49 }
 0x14c   :  { %6242 = vst [vmem:[#allocation100_spill] sm:$0xff] %v4929_v38  ;;  %v4931_v40 = vpop.f32.mrf.mxu0  ;;  %v4946_v38 = vrot.slane %v206_v27, %v6249_v41  ;;  %v4951_v21 = vrot.slane %v206_v27, %v219_v0  ;;  %v227_v0 = vsub.s32 4, %v6244_v42 }
 0x14d   :  { %6243 = vst [vmem:[#allocation101_spill] sm:$0xff] %v4931_v40  ;;  %v4937_v45 = vpop.f32.mrf.mxu1 }
 0x14e   :  { %6245 = vst [vmem:[#allocation12_spill] sm:$0xff] %v4937_v45  ;;  %v4939_v37 = vpop.f32.mrf.mxu0  ;;  %v322_v45 = vadd.f32 %v321_v12, %v4946_v38  ;;  %v391_v43 = vadd.f32 %v390_v5, %v4951_v21  ;;  %v231_v12 = vsub.s32 5, %v6244_v42 }
 0x14f   :  { %6246 = vst [vmem:[#allocation102_spill] sm:$0xff] %v4939_v37 }
 0x17c   :  { %v1540_v36 = vpop.f32.mrf.mxu1 }
 0x17d   :  { %v1758_v51 = vadd.f32 %v1540_v36, %v320_v55  ;;  %v235_v55 = vsub.s32 6, %v6244_v42 }
 0x17e   :  { %v1542_v62 = vpop.f32.mrf.mxu1 }
 0x17f   :  { %v1759_v47 = vadd.f32 %v1542_v62, %v322_v45  ;;  %v2987_v34 = vmul.f32 -1.442695, %v1758_v51  ;;  %v4959_v62 = vrot.slane %v206_v27, %v227_v0 }
 0x180   :  { %v1611_v40 = vpop.f32.mrf.mxu0 }
 0x181   :  { %v1760_v30 = vadd.f32 %v1611_v40, %v391_v43  ;;  %v2988_v28 = vmul.f32 -1.442695, %v1759_v47  ;;  %3178 = vpow2.f32 %v2987_v34  ;;  %v4962_v34 = vrot.slane %v206_v27, %v231_v12 }
 0x182   :  { %v1613_v37 = vpop.f32.mrf.mxu0  ;;  %v462_v47 = vadd.f32 %v461_v19, %v4959_v62 }
 0x183   :  { %v1761_v39 = vadd.f32 %v1613_v37, %v393_v57  ;;  %v2989_v26 = vmul.f32 -1.442695, %v1760_v30  ;;  %3180 = vpow2.f32 %v2988_v28  ;;  %v239_v37 = vsub.s32 7, %v6244_v42 }
 0x184   :  { %v4964_v30 = vrot.slane %v206_v27, %v235_v55  ;;  %v464_v36 = vadd.f32 %v4901_v31, %v4962_v34 }
 0x185   :  { %v2990_v14 = vmul.f32 -1.442695, %v1761_v39  ;;  %v4967_v51 = vrot.slane %v206_v27, %v239_v37 }
 0x186   :  { %v533_v42 = vadd.f32 %v4899_v23, %v4964_v30  ;;  %v1155_v23 = vld [vmem:[%s5925_s8] sm:$0x3] }
 0x187   :  { %3182 = vpow2.f32 %v2990_v14  ;;  %v535_v27 = vadd.f32 %v4903_v33, %v4967_v51 }
 0x188   :  { %3184 = vpow2.f32 %v2989_v26 }
 0x18e   :  { %v3179_v6 = vpop.eup %3178 }
 0x18f   :  { %v1772_v43 = vadd.f32 1.0, %v3179_v6 }
 0x190   :  { %v3181_v16 = vpop.eup %3180 }
 0x191   :  { %v1773_v28 = vadd.f32 1.0, %v3181_v16  ;;  %3186 = vrcp.f32 %v1772_v43 }
 0x193   :  { %3188 = vrcp.f32 %v1773_v28 }
 0x194   :  { %v3183_v45 = vpop.eup %3182 }
 0x195   :  { %v3185_v39 = vpop.eup %3184  ;;  %v1785_v26 = vadd.f32 1.0, %v3183_v45 }
 0x196   :  { %v1784_v57 = vadd.f32 1.0, %v3185_v39  ;;  %v1164_v39 = vrot.slane %v1155_v23, %v6249_v41 }
 0x197   :  { %3190 = vrcp.f32 %v1785_v26  ;;  %v1160_v26 = vrot.slane %v1155_v23, %v6247_v2  ;;  %v5000_v23 = vld [vmem:[#allocation7 + $0x398] sm:$0xff] }
 0x19e   :  { %v3187_v45 = vpop.eup %3186 }
 0x1a0   :  { %v3189_v37 = vpop.eup %3188 }
 0x1a4   :  { %v3191_v43 = vpop.eup %3190 }
 0x1be   :  { %v1682_v5 = vpop.f32.mrf.mxu1 }
 0x1bf   :  { %v1762_v40 = vadd.f32 %v1682_v5, %v462_v47  ;;  %v1805_v5 = vmul.f32 %v3191_v43, %v1164_v39  ;;  %v5004_v43 = vld [vmem:[#allocation7 + $0x3a8] sm:$0xff]  ;;  %v5008_v39 = vld [vmem:[#allocation7 + $0x390] sm:$0xff] }
 0x1c0   :  { %v1684_v14 = vpop.f32.mrf.mxu1 }
 0x1c1   :  { %3192 = vtanh.f32 %v1762_v40  ;;  %v1763_v0 = vadd.f32 %v1684_v14, %v464_v36 }
 0x1c2   :  { %v1753_v6 = vpop.f32.mrf.mxu0  ;;  %3194 = vrcp.f32 %v1784_v57 }
 0x1c3   :  { %v1764_v19 = vadd.f32 %v1753_v6, %v533_v42  ;;  %3196 = vtanh.f32 %v1763_v0 }
 0x1c4   :  { %v1755_v12 = vpop.f32.mrf.mxu0 }
 0x1c5   :  { %v2991_v16 = vmul.f32 -1.442695, %v1764_v19  ;;  %v1765_v55 = vadd.f32 %v1755_v12, %v535_v27 }
 0x1c7   :  { %3198 = vpow2.f32 %v2991_v16  ;;  %v2992_v31 = vmul.f32 -1.442695, %v1765_v55 }
 0x1c9   :  { %3200 = vpow2.f32 %v2992_v31 }
 0x1ce   :  { %v3193_v28 = vpop.eup %3192 }
 0x1cf   :  { %v3195_v33 = vpop.eup %3194  ;;  %v1806_v57 = vmul.f32 %v3193_v28, %v3187_v45  ;;  %v4994_v45 = vld [vmem:[#allocation7 + $0x3d0] sm:$0xff]  ;;  %v5011_v28 = vld [vmem:[#allocation7 + $0x3a0] sm:$0xff] }
 0x1d0   :  { %v3197_v47 = vpop.eup %3196  ;;  %v1804_v42 = vmul.f32 %v3195_v33, %v1160_v26  ;;  %v5014_v33 = vld [vmem:[#allocation7 + $0x358] sm:$0xff]  ;;  %v5017_v26 = vld [vmem:[#allocation7 + $0x368] sm:$0xff] }
 0x1d1   :  { %v1807_v36 = vmul.f32 %v3197_v47, %v3189_v37  ;;  %v4997_v37 = vld [vmem:[#allocation7 + $0x3e0] sm:$0xff]  ;;  %v5020_v47 = vld [vmem:[#allocation7 + $0x350] sm:$0xff] }
 0x1d2   :  { %v4982_v27 = vadd.f32 %v1806_v57, %v1804_v42  ;;  %v5023_v57 = vld [vmem:[#allocation7 + $0x360] sm:$0xff] }
 0x1d3   :  { %v4980_v14 = vadd.f32 %v1807_v36, %v1805_v5  ;;  %v5026_v5 = vld [vmem:[#allocation7 + $0x318] sm:$0xff]  ;;  %v5029_v36 = vld [vmem:[#allocation7 + $0x328] sm:$0xff]  ;;  %v5035_v42 = vld [vmem:[#allocation7 + $0x320] sm:$0xff] }
 0x1d4   :  { %v3199_v40 = vpop.eup %3198 }
 0x1d5   :  { %v1798_v0 = vadd.f32 1.0, %v3199_v40  ;;  %3202 = vtanh.f32 %v4980_v14  ;;  %v5032_v40 = vld [vmem:[#allocation7 + $0x310] sm:$0xff] }
 0x1d6   :  { %v3201_v6 = vpop.eup %3200 }
 0x1d7   :  { %v1799_v19 = vadd.f32 1.0, %v3201_v6  ;;  %3204 = vrcp.f32 %v1798_v0  ;;  %v5038_v0 = vld [vmem:[#allocation7 + $0x2d8] sm:$0xff]  ;;  %v5041_v6 = vld [vmem:[#allocation7 + $0x2e8] sm:$0xff] }
 0x1d8   :  { %6253 = vst [vmem:[#allocation105_spill] sm:$0xff] %v5038_v0  ;;  %6254 = vst [vmem:[#allocation106_spill] sm:$0xff] %v5041_v6 }
 0x1d9   :  { %3206 = vrcp.f32 %v1799_v19  ;;  %v5044_v19 = vld [vmem:[#allocation7 + $0x2d0] sm:$0xff] }
 0x1da   :  { %3208 = vtanh.f32 %v4982_v27  ;;  %6255 = vst [vmem:[#allocation107_spill] sm:$0xff] %v5044_v19 }
 0x1e2   :  { %v3203_v41 = vpop.eup %3202 }
 0x1e4   :  { %v3205_v2 = vpop.eup %3204 }
 0x1e6   :  { %v3207_v12 = vpop.eup %3206 }
 0x1e7   :  { %v3209_v16 = vpop.eup %3208  ;;  %v4986_v55 = vmul.f32 %v3207_v12, %v3203_v41  ;;  %v5047_v41 = vld [vmem:[#allocation7 + $0x2e0] sm:$0xff]  ;;  %v5053_v12 = vld [vmem:[#allocation7 + $0x2a8] sm:$0xff] }
 0x1e8   :  { %v4988_v31 = vmul.f32 %v3209_v16, %v3205_v2  ;;  %6256 = vst [vmem:[#allocation108_spill] sm:$0xff] %v5047_v41  ;;  %v5050_v2 = vld [vmem:[#allocation7 + $0x298] sm:$0xff]  ;;  %6258 = vst [vmem:[#allocation110_spill] sm:$0xff] %v5053_v12  ;;  %v5056_v16 = vld [vmem:[#allocation7 + $0x290] sm:$0xff] }
 0x1e9   :  { %6251 = vst [vmem:[#allocation103_spill] sm:$0xff] %v4986_v55  ;;  %1882 = vmatprep.mubr.f32.mxu1 %v4986_v55  ;;  %1992 = vmatprep.mubr.f32.mxu0 %v4986_v55  ;;  %6257 = vst [vmem:[#allocation109_spill] sm:$0xff] %v5050_v2 }
 0x1ea   :  { %6252 = vst [vmem:[#allocation104_spill] sm:$0xff] %v4988_v31  ;;  %1883 = vmatmul.mubr.f32.vlgmr.msra.gmra.mxu1 %v4988_v31  ;;  %1993 = vmatmul.mubr.f32.vlgmr.msra.gmra.mxu0 %v4988_v31  ;;  %6259 = vst [vmem:[#allocation111_spill] sm:$0xff] %v5056_v16 }
 0x1eb   :  { %2000 = vmatpush1.msra.mxu1 %v4994_v45  ;;  %2071 = vmatpush1.msra.mxu0 %v4997_v37 }
 0x1ec   :  { %2001 = vmatprep.subr.mxu1 %v5000_v23  ;;  %2063 = vmatprep.mubr.f32.mxu1 %v4986_v55 }
 0x1ed   :  { %2072 = vmatprep.subr.mxu0 %v5004_v43  ;;  %2134 = vmatprep.mubr.f32.mxu0 %v4986_v55 }
 0x1ee   :  { %2002 = vmatpush1.msra.mxu1 %v5008_v39  ;;  %2073 = vmatpush1.msra.mxu0 %v5011_v28 }
 0x1ef   :  { %2003 = vmatprep.subr.mxu1 %v5014_v33  ;;  %2074 = vmatprep.subr.mxu0 %v5017_v26 }
 0x1f0   :  { %2004 = vmatpush1.msra.mxu1 %v5020_v47  ;;  %2075 = vmatpush1.msra.mxu0 %v5023_v57 }
 0x1f1   :  { %2005 = vmatprep.subr.mxu1 %v5026_v5  ;;  %2076 = vmatprep.subr.mxu0 %v5029_v36 }
 0x1f2   :  { %2006 = vmatpush1.msra.mxu1 %v5032_v40  ;;  %2077 = vmatpush1.msra.mxu0 %v5035_v42 }
 0x1f3   :  { %2007 = vmatprep.subr.mxu1 %v5038_v0  ;;  %2078 = vmatprep.subr.mxu0 %v5041_v6  ;;  %v5059_v6 = vld [vmem:[#allocation7 + $0x2a0] sm:$0xff]  ;;  %v5086_v0 = vld [vmem:[#allocation7 + $0x1d0] sm:$0xff] }
 0x1f4   :  { %2008 = vmatpush1.msra.mxu1 %v5044_v19  ;;  %2079 = vmatpush1.msra.mxu0 %v5047_v41  ;;  %6260 = vst [vmem:[#allocation112_spill] sm:$0xff] %v5059_v6  ;;  %v5062_v19 = vld [vmem:[#allocation7 + $0x258] sm:$0xff]  ;;  %v5065_v41 = vld [vmem:[#allocation7 + $0x268] sm:$0xff] }
 0x1f5   :  { %2009 = vmatprep.subr.mxu1 %v5050_v2  ;;  %2080 = vmatprep.subr.mxu0 %v5053_v12  ;;  %6261 = vst [vmem:[#allocation113_spill] sm:$0xff] %v5062_v19  ;;  %6262 = vst [vmem:[#allocation114_spill] sm:$0xff] %v5065_v41  ;;  %v5068_v2 = vld [vmem:[#allocation7 + $0x250] sm:$0xff]  ;;  %v5071_v12 = vld [vmem:[#allocation7 + $0x260] sm:$0xff] }
 0x1f6   :  { %2010 = vmatpush1.msra.mxu1 %v5056_v16  ;;  %2081 = vmatpush1.msra.mxu0 %v5059_v6  ;;  %6263 = vst [vmem:[#allocation115_spill] sm:$0xff] %v5068_v2  ;;  %6264 = vst [vmem:[#allocation116_spill] sm:$0xff] %v5071_v12  ;;  %v5074_v16 = vld [vmem:[#allocation7 + $0x218] sm:$0xff]  ;;  %v5078_v6 = vld [vmem:[#allocation7 + $0x210] sm:$0xff] }
 0x1f7   :  { %2011 = vmatprep.subr.mxu1 %v5062_v19  ;;  %2082 = vmatprep.subr.mxu0 %v5065_v41  ;;  %6265 = vst [vmem:[#allocation117_spill] sm:$0xff] %v5074_v16  ;;  %6266 = vst [vmem:[#allocation118_spill] sm:$0xff] %v5078_v6  ;;  %v6267_v19 = vld [vmem:[#allocation19_spill] sm:$0xff]  ;;  %v5082_v41 = vld [vmem:[#allocation7 + $0x1d8] sm:$0xff] }
 0x1f8   :  { %2012 = vmatpush1.msra.mxu1 %v5068_v2  ;;  %2083 = vmatpush1.msra.mxu0 %v5071_v12  ;;  %6268 = vst [vmem:[#allocation19_spill] sm:$0xff] %v5082_v41  ;;  %v6269_v2 = vld [vmem:[#allocation20_spill] sm:$0xff]  ;;  %v6271_v12 = vld [vmem:[#allocation21_spill] sm:$0xff] }
 0x1f9   :  { %2013 = vmatprep.subr.mxu1 %v5074_v16  ;;  %2084 = vmatprep.subr.mxu0 %v4424_v59  ;;  %6270 = vst [vmem:[#allocation20_spill] sm:$0xff] %v5086_v0  ;;  %v5090_v16 = vld [vmem:[#allocation7 + $0x198] sm:$0xff]  ;;  %v6273_v59 = vld [vmem:[#allocation22_spill] sm:$0xff] }
 0x1fa   :  { %2014 = vmatpush1.msra.mxu1 %v5078_v6  ;;  %2085 = vmatpush1.msra.mxu0 %v6267_v19  ;;  %6272 = vst [vmem:[#allocation21_spill] sm:$0xff] %v5090_v16  ;;  %v5094_v6 = vld [vmem:[#allocation7 + $0x190] sm:$0xff]  ;;  %v6275_v19 = vld [vmem:[#allocation23_spill] sm:$0xff] }
 0x1fb   :  { %2015 = vmatprep.subr.mxu1 %v5082_v41  ;;  %2086 = vmatprep.subr.mxu0 %v6269_v2  ;;  %6274 = vst [vmem:[#allocation22_spill] sm:$0xff] %v5094_v6  ;;  %v5098_v41 = vld [vmem:[#allocation7 + $0x158] sm:$0xff]  ;;  %v6277_v2 = vld [vmem:[#allocation24_spill] sm:$0xff] }
 0x1fc   :  { %2016 = vmatpush1.msra.mxu1 %v5086_v0  ;;  %2087 = vmatpush1.msra.mxu0 %v6271_v12  ;;  %6276 = vst [vmem:[#allocation23_spill] sm:$0xff] %v5098_v41  ;;  %v5102_v0 = vld [vmem:[#allocation7 + $0x150] sm:$0xff]  ;;  %v6279_v12 = vld [vmem:[#allocation25_spill] sm:$0xff] }
 0x1fd   :  { %2017 = vmatprep.subr.mxu1 %v5090_v16  ;;  %2088 = vmatprep.subr.mxu0 %v6273_v59  ;;  %6278 = vst [vmem:[#allocation24_spill] sm:$0xff] %v5102_v0  ;;  %v5106_v16 = vld [vmem:[#allocation7 + $0x118] sm:$0xff]  ;;  %v6281_v59 = vld [vmem:[#allocation26_spill] sm:$0xff] }
 0x1fe   :  { %2018 = vmatpush1.msra.mxu1 %v5094_v6  ;;  %2089 = vmatpush1.msra.mxu0 %v6275_v19  ;;  %6280 = vst [vmem:[#allocation25_spill] sm:$0xff] %v5106_v16  ;;  %v5110_v6 = vld [vmem:[#allocation7 + $0x110] sm:$0xff]  ;;  %v6283_v19 = vld [vmem:[#allocation27_spill] sm:$0xff] }
 0x1ff   :  { %2019 = vmatprep.subr.mxu1 %v5098_v41  ;;  %2090 = vmatprep.subr.mxu0 %v6277_v2  ;;  %6282 = vst [vmem:[#allocation26_spill] sm:$0xff] %v5110_v6  ;;  %v5114_v41 = vld [vmem:[#allocation7 + $0xd8] sm:$0xff]  ;;  %v6285_v2 = vld [vmem:[#allocation28_spill] sm:$0xff] }
 0x200   :  { %2020 = vmatpush1.msra.mxu1 %v5102_v0  ;;  %2091 = vmatpush1.msra.mxu0 %v6279_v12  ;;  %6284 = vst [vmem:[#allocation27_spill] sm:$0xff] %v5114_v41  ;;  %v5118_v0 = vld [vmem:[#allocation7 + $0xd0] sm:$0xff]  ;;  %v6287_v12 = vld [vmem:[#allocation29_spill] sm:$0xff] }
 0x201   :  { %2021 = vmatprep.subr.mxu1 %v5106_v16  ;;  %2092 = vmatprep.subr.mxu0 %v6281_v59  ;;  %6286 = vst [vmem:[#allocation28_spill] sm:$0xff] %v5118_v0  ;;  %v5122_v16 = vld [vmem:[#allocation7 + $0x98] sm:$0xff]  ;;  %v6289_v59 = vld [vmem:[#allocation30_spill] sm:$0xff] }
 0x202   :  { %2022 = vmatpush1.msra.mxu1 %v5110_v6  ;;  %2093 = vmatpush1.msra.mxu0 %v6283_v19  ;;  %6288 = vst [vmem:[#allocation29_spill] sm:$0xff] %v5122_v16  ;;  %v5126_v6 = vld [vmem:[#allocation7 + $0x90] sm:$0xff]  ;;  %v6291_v19 = vld [vmem:[#allocation31_spill] sm:$0xff] }
 0x203   :  { %2023 = vmatprep.subr.mxu1 %v5114_v41  ;;  %2094 = vmatprep.subr.mxu0 %v6285_v2  ;;  %6290 = vst [vmem:[#allocation30_spill] sm:$0xff] %v5126_v6  ;;  %v5130_v41 = vld [vmem:[#allocation7 + $0x58] sm:$0xff]  ;;  %v6293_v2 = vld [vmem:[#allocation32_spill] sm:$0xff] }
 0x204   :  { %2024 = vmatpush1.msra.mxu1 %v5118_v0  ;;  %2095 = vmatpush1.msra.mxu0 %v6287_v12  ;;  %6292 = vst [vmem:[#allocation31_spill] sm:$0xff] %v5130_v41  ;;  %v5134_v0 = vld [vmem:[#allocation7 + $0x50] sm:$0xff]  ;;  %v6295_v12 = vld [vmem:[#allocation33_spill] sm:$0xff] }
 0x205   :  { %2025 = vmatprep.subr.mxu1 %v5122_v16  ;;  %2096 = vmatprep.subr.mxu0 %v6289_v59  ;;  %6294 = vst [vmem:[#allocation32_spill] sm:$0xff] %v5134_v0  ;;  %v5138_v16 = vld [vmem:[#allocation7 + $0x18] sm:$0xff]  ;;  %v6297_v59 = vld [vmem:[#allocation34_spill] sm:$0xff] }
 0x206   :  { %2026 = vmatpush1.msra.mxu1 %v5126_v6  ;;  %2097 = vmatpush1.msra.mxu0 %v6291_v19  ;;  %6296 = vst [vmem:[#allocation33_spill] sm:$0xff] %v5138_v16  ;;  %v5142_v6 = vld [vmem:[#allocation7 + $0x10] sm:$0xff]  ;;  %v6298_v19 = vld [vmem:[#allocation35_spill] sm:$0xff] }
 0x207   :  { %2027 = vmatprep.subr.mxu1 %v5130_v41  ;;  %2098 = vmatprep.subr.mxu0 %v6293_v2  ;;  %v5146_v41 = vld [vmem:[#allocation7 + $0x7d8] sm:$0xff]  ;;  %v6300_v2 = vld [vmem:[#allocation36_spill] sm:$0xff] }
 0x208   :  { %2028 = vmatpush1.msra.mxu1 %v5134_v0  ;;  %2099 = vmatpush1.msra.mxu0 %v6295_v12  ;;  %6299 = vst [vmem:[#allocation34_spill] sm:$0xff] %v5146_v41  ;;  %v5150_v0 = vld [vmem:[#allocation7 + $0x7d0] sm:$0xff]  ;;  %v6301_v12 = vld [vmem:[#allocation37_spill] sm:$0xff] }
 0x209   :  { %2029 = vmatprep.subr.mxu1 %v5138_v16  ;;  %2100 = vmatprep.subr.mxu0 %v6297_v59  ;;  %v5154_v16 = vld [vmem:[#allocation7 + $0x798] sm:$0xff]  ;;  %v5158_v59 = vld [vmem:[#allocation7 + $0x790] sm:$0xff] }
 0x20a   :  { %2030 = vmatpush1.msra.mxu1 %v5142_v6  ;;  %2101 = vmatpush1.msra.mxu0 %v6298_v19  ;;  %6302 = vst [vmem:[#allocation35_spill] sm:$0xff] %v5154_v16  ;;  %6303 = vst [vmem:[#allocation36_spill] sm:$0xff] %v5158_v59  ;;  %v6304_v19 = vld [vmem:[#allocation38_spill] sm:$0xff] }
 0x20b   :  { %2031 = vmatprep.subr.mxu1 %v5146_v41  ;;  %2102 = vmatprep.subr.mxu0 %v6300_v2  ;;  %v5162_v41 = vld [vmem:[#allocation7 + $0x758] sm:$0xff]  ;;  %v5166_v2 = vld [vmem:[#allocation7 + $0x750] sm:$0xff] }
 0x20c   :  { %2032 = vmatpush2.msra.mxu1 %v5150_v0  ;;  %2103 = vmatpush2.msra.mxu0 %v6301_v12  ;;  %6305 = vst [vmem:[#allocation37_spill] sm:$0xff] %v5162_v41  ;;  %6306 = vst [vmem:[#allocation38_spill] sm:$0xff] %v5166_v2  ;;  %v6307_v12 = vld [vmem:[#allocation39_spill] sm:$0xff] }
 0x20d   :  { %2033 = vmatprep.subr.mxu1 %v5154_v16  ;;  %2104 = vmatprep.subr.mxu0 %v4482_v25  ;;  %v5170_v16 = vld [vmem:[#allocation7 + $0x718] sm:$0xff]  ;;  %v6309_v25 = vld [vmem:[#allocation40_spill] sm:$0xff] }
 0x20e   :  { %2034 = vmatpush2.msra.mxu1 %v5158_v59  ;;  %2105 = vmatpush2.msra.mxu0 %v6304_v19  ;;  %6308 = vst [vmem:[#allocation39_spill] sm:$0xff] %v5170_v16  ;;  %v5174_v59 = vld [vmem:[#allocation7 + $0x710] sm:$0xff]  ;;  %v6311_v19 = vld [vmem:[#allocation42_spill] sm:$0xff] }
 0x20f   :  { %2035 = vmatprep.subr.mxu1 %v5162_v41  ;;  %2106 = vmatprep.subr.mxu0 %v4491_v53  ;;  %6310 = vst [vmem:[#allocation40_spill] sm:$0xff] %v5174_v59  ;;  %v5178_v41 = vld [vmem:[#allocation7 + $0x6d8] sm:$0xff]  ;;  %v6313_v53 = vld [vmem:[#allocation43_spill] sm:$0xff] }
 0x210   :  { %2036 = vmatpush2.msra.mxu1 %v5166_v2  ;;  %2107 = vmatpush2.msra.mxu0 %v6307_v12  ;;  %6312 = vst [vmem:[#allocation42_spill] sm:$0xff] %v5178_v41  ;;  %v5182_v2 = vld [vmem:[#allocation7 + $0x6d0] sm:$0xff] }
 0x211   :  { %2037 = vmatprep.subr.mxu1 %v5170_v16  ;;  %2108 = vmatprep.subr.mxu0 %v6309_v25  ;;  %6314 = vst [vmem:[#allocation43_spill] sm:$0xff] %v5182_v2  ;;  %v6315_v12 = vld [vmem:[#allocation44_spill] sm:$0xff]  ;;  %v5186_v16 = vld [vmem:[#allocation7 + $0x698] sm:$0xff] }
 0x212   :  { %2038 = vmatpush2.msra.mxu1 %v5174_v59  ;;  %2109 = vmatpush2.msra.mxu0 %v6311_v19  ;;  %6316 = vst [vmem:[#allocation44_spill] sm:$0xff] %v5186_v16  ;;  %v6317_v25 = vld [vmem:[#allocation45_spill] sm:$0xff]  ;;  %v5190_v59 = vld [vmem:[#allocation7 + $0x690] sm:$0xff]  ;;  %v6319_v19 = vld [vmem:[#allocation46_spill] sm:$0xff] }
 0x213   :  { %2039 = vmatprep.subr.mxu1 %v5178_v41  ;;  %2110 = vmatprep.subr.mxu0 %v6313_v53  ;;  %6318 = vst [vmem:[#allocation45_spill] sm:$0xff] %v5190_v59  ;;  %v5194_v41 = vld [vmem:[#allocation7 + $0x658] sm:$0xff]  ;;  %v6321_v53 = vld [vmem:[#allocation47_spill] sm:$0xff] }
 0x214   :  { %2040 = vmatpush2.msra.mxu1 %v5182_v2  ;;  %2111 = vmatpush2.msra.mxu0 %v6315_v12  ;;  %6320 = vst [vmem:[#allocation46_spill] sm:$0xff] %v5194_v41  ;;  %v5198_v2 = vld [vmem:[#allocation7 + $0x650] sm:$0xff] }
 0x215   :  { %2041 = vmatprep.subr.mxu1 %v5186_v16  ;;  %2112 = vmatprep.subr.mxu0 %v6317_v25  ;;  %6322 = vst [vmem:[#allocation47_spill] sm:$0xff] %v5198_v2  ;;  %v6323_v12 = vld [vmem:[#allocation48_spill] sm:$0xff]  ;;  %v5202_v16 = vld [vmem:[#allocation7 + $0x618] sm:$0xff] }
 0x216   :  { %2042 = vmatpush2.msra.mxu1 %v5190_v59  ;;  %2113 = vmatpush2.msra.mxu0 %v6319_v19  ;;  %6324 = vst [vmem:[#allocation48_spill] sm:$0xff] %v5202_v16  ;;  %v6325_v25 = vld [vmem:[#allocation49_spill] sm:$0xff]  ;;  %v5206_v59 = vld [vmem:[#allocation7 + $0x610] sm:$0xff]  ;;  %v6327_v19 = vld [vmem:[#allocation50_spill] sm:$0xff] }
 0x217   :  { %2043 = vmatprep.subr.mxu1 %v5194_v41  ;;  %2114 = vmatprep.subr.mxu0 %v6321_v53  ;;  %6326 = vst [vmem:[#allocation49_spill] sm:$0xff] %v5206_v59  ;;  %v5210_v41 = vld [vmem:[#allocation7 + $0x5d8] sm:$0xff]  ;;  %v6329_v53 = vld [vmem:[#allocation51_spill] sm:$0xff] }
 0x218   :  { %2044 = vmatpush2.msra.mxu1 %v5198_v2  ;;  %2115 = vmatpush2.msra.mxu0 %v6323_v12  ;;  %6328 = vst [vmem:[#allocation50_spill] sm:$0xff] %v5210_v41  ;;  %v5214_v2 = vld [vmem:[#allocation7 + $0x5d0] sm:$0xff] }
 0x219   :  { %2045 = vmatprep.subr.mxu1 %v5202_v16  ;;  %2116 = vmatprep.subr.mxu0 %v6325_v25  ;;  %6330 = vst [vmem:[#allocation51_spill] sm:$0xff] %v5214_v2  ;;  %v6331_v12 = vld [vmem:[#allocation52_spill] sm:$0xff]  ;;  %v5218_v16 = vld [vmem:[#allocation7 + $0x598] sm:$0xff] }
 0x21a   :  { %2046 = vmatpush2.msra.mxu1 %v5206_v59  ;;  %2117 = vmatpush2.msra.mxu0 %v6327_v19  ;;  %6332 = vst [vmem:[#allocation52_spill] sm:$0xff] %v5218_v16  ;;  %v6333_v25 = vld [vmem:[#allocation53_spill] sm:$0xff]  ;;  %v5222_v59 = vld [vmem:[#allocation7 + $0x590] sm:$0xff]  ;;  %v6335_v19 = vld [vmem:[#allocation54_spill] sm:$0xff] }
 0x21b   :  { %2047 = vmatprep.subr.mxu1 %v5210_v41  ;;  %2118 = vmatprep.subr.mxu0 %v6329_v53  ;;  %6334 = vst [vmem:[#allocation53_spill] sm:$0xff] %v5222_v59  ;;  %v5226_v41 = vld [vmem:[#allocation7 + $0x558] sm:$0xff]  ;;  %v6337_v53 = vld [vmem:[#allocation55_spill] sm:$0xff] }
 0x21c   :  { %2048 = vmatpush2.msra.mxu1 %v5214_v2  ;;  %2119 = vmatpush2.msra.mxu0 %v6331_v12  ;;  %6336 = vst [vmem:[#allocation54_spill] sm:$0xff] %v5226_v41  ;;  %v5230_v2 = vld [vmem:[#allocation7 + $0x550] sm:$0xff] }
 0x21d   :  { %2049 = vmatprep.subr.mxu1 %v5218_v16  ;;  %2120 = vmatprep.subr.mxu0 %v6333_v25  ;;  %v6338_v12 = vld [vmem:[#allocation56_spill] sm:$0xff]  ;;  %v5234_v16 = vld [vmem:[#allocation7 + $0x518] sm:$0xff] }
 0x21e   :  { %2050 = vmatpush2.msra.mxu1 %v5222_v59  ;;  %2121 = vmatpush2.msra.mxu0 %v6335_v19  ;;  %6339 = vst [vmem:[#allocation55_spill] sm:$0xff] %v5234_v16  ;;  %v6340_v25 = vld [vmem:[#allocation57_spill] sm:$0xff]  ;;  %v5238_v59 = vld [vmem:[#allocation7 + $0x510] sm:$0xff]  ;;  %v6342_v19 = vld [vmem:[#allocation58_spill] sm:$0xff] }
 0x21f   :  { %2051 = vmatprep.subr.mxu1 %v5226_v41  ;;  %2122 = vmatprep.subr.mxu0 %v6337_v53  ;;  %6341 = vst [vmem:[#allocation56_spill] sm:$0xff] %v5238_v59  ;;  %v5242_v41 = vld [vmem:[#allocation7 + $0x4d8] sm:$0xff]  ;;  %v5246_v53 = vld [vmem:[#allocation7 + $0x4d0] sm:$0xff] }
 0x220   :  { %2052 = vmatpush2.msra.mxu1 %v5230_v2  ;;  %2123 = vmatpush2.msra.mxu0 %v6338_v12  ;;  %6343 = vst [vmem:[#allocation57_spill] sm:$0xff] %v5246_v53  ;;  %v6344_v12 = vld [vmem:[#allocation59_spill] sm:$0xff] }
 0x221   :  { %2053 = vmatprep.subr.mxu1 %v5234_v16  ;;  %2124 = vmatprep.subr.mxu0 %v6340_v25  ;;  %v5250_v16 = vld [vmem:[#allocation7 + $0x498] sm:$0xff]  ;;  %v6346_v25 = vld [vmem:[#allocation60_spill] sm:$0xff] }
 0x222   :  { %2054 = vmatpush2.msra.mxu1 %v5238_v59  ;;  %2125 = vmatpush2.msra.mxu0 %v6342_v19  ;;  %6345 = vst [vmem:[#allocation58_spill] sm:$0xff] %v5250_v16  ;;  %v5254_v59 = vld [vmem:[#allocation7 + $0x490] sm:$0xff]  ;;  %v5258_v19 = vld [vmem:[#allocation7 + $0x458] sm:$0xff] }
 0x223   :  { %2055 = vmatprep.subr.mxu1 %v5242_v41  ;;  %2126 = vmatprep.subr.mxu0 %v4555_v10  ;;  %v6347_v10 = vld [vmem:[#allocation61_spill] sm:$0xff] }
 0x224   :  { %2056 = vmatpush2.msra.mxu1 %v5246_v53  ;;  %2127 = vmatpush2.msra.mxu0 %v6344_v12  ;;  %v5262_v53 = vld [vmem:[#allocation7 + $0x450] sm:$0xff]  ;;  %v6348_v12 = vld [vmem:[#allocation63_spill] sm:$0xff] }
 0x225   :  { %2057 = vmatprep.subr.mxu1 %v5250_v16  ;;  %2128 = vmatprep.subr.mxu0 %v6346_v25  ;;  %v5266_v16 = vld [vmem:[#allocation7 + $0x418] sm:$0xff]  ;;  %v5270_v25 = vld [vmem:[#allocation7 + $0x410] sm:$0xff] }
 0x226   :  { %2058 = vmatpush2.msra.mxu1 %v5254_v59  ;;  %2129 = vmatpush2.msra.mxu0 %v4567_v29  ;;  %v5276_v29 = vld [vmem:[#allocation7 + $0x3f8] sm:$0xff] }
 0x227   :  { %2059 = vmatprep.subr.mxu1 %v5258_v19  ;;  %2130 = vmatprep.subr.mxu0 %v6347_v10  ;;  %v5280_v10 = vld [vmem:[#allocation7 + $0x3f0] sm:$0xff] }
 0x228   :  { %2060 = vmatpush2.msra.mxu1 %v5262_v53  ;;  %2131 = vmatpush2.msra.mxu0 %v6348_v12  ;;  %v5292_v12 = vld [vmem:[#allocation7 + $0x378] sm:$0xff] }
 0x229   :  { %2061 = vmatprep.subr.mxu1 %v5266_v16  ;;  %2132 = vmatprep.subr.mxu0 %v4580_v32  ;;  %v5284_v32 = vld [vmem:[#allocation7 + $0x3b8] sm:$0xff] }
 0x22a   :  { %2062 = vmatpush2.msra.mxu1 %v5270_v25  ;;  %2133 = vmatpush2.msra.mxu0 %v4585_v8  ;;  %v5288_v8 = vld [vmem:[#allocation7 + $0x3b0] sm:$0xff] }
 0x22b   :  { %2064 = vmatmul.mubr.f32.vlgmr.msra.gmra.mxu1 %v4988_v31  ;;  %2135 = vmatmul.mubr.f32.vlgmr.msra.gmra.mxu0 %v4988_v31 }
 0x22c   :  { %2141 = vmatprep.subr.mxu1 %v5276_v29  ;;  %2205 = vmatprep.mubr.f32.mxu1 %v4986_v55  ;;  %v5296_v55 = vld [vmem:[#allocation7 + $0x370] sm:$0xff] }
 0x22d   :  { %2142 = vmatpush1.msra.mxu1 %v5280_v10  ;;  %3052 = vmatprep.subr.mxu0 %v4707_v44  ;;  %v5300_v44 = vld [vmem:[#allocation7 + $0x338] sm:$0xff] }
 0x22e   :  { %2143 = vmatprep.subr.mxu1 %v5284_v32  ;;  %3053 = vmatpush3.msra.mxu0 %v4713_v46  ;;  %v5304_v46 = vld [vmem:[#allocation7 + $0x330] sm:$0xff] }
 0x22f   :  { %2144 = vmatpush1.msra.mxu1 %v5288_v8  ;;  %3054 = vmatprep.subr.mxu0 %v4719_v48  ;;  %v5308_v48 = vld [vmem:[#allocation7 + $0x2f8] sm:$0xff] }
 0x230   :  { %2145 = vmatprep.subr.mxu1 %v5292_v12  ;;  %3055 = vmatpush3.msra.mxu0 %v4725_v50  ;;  %v5312_v50 = vld [vmem:[#allocation7 + $0x2f0] sm:$0xff] }
 0x231   :  { %2146 = vmatpush1.msra.mxu1 %v5296_v55  ;;  %3056 = vmatprep.subr.mxu0 %v4731_v52  ;;  %v5316_v52 = vld [vmem:[#allocation7 + $0x2b8] sm:$0xff] }
 0x232   :  { %2147 = vmatprep.subr.mxu1 %v5300_v44  ;;  %3057 = vmatpush3.msra.mxu0 %v4737_v54  ;;  %v5320_v54 = vld [vmem:[#allocation7 + $0x2b0] sm:$0xff] }
 0x233   :  { %2148 = vmatpush1.msra.mxu1 %v5304_v46  ;;  %3058 = vmatprep.subr.mxu0 %v4743_v56  ;;  %6349 = vst [vmem:[#allocation59_spill] sm:$0xff] %v5320_v54  ;;  %v5324_v56 = vld [vmem:[#allocation7 + $0x278] sm:$0xff] }
 0x234   :  { %2149 = vmatprep.subr.mxu1 %v5308_v48  ;;  %3059 = vmatpush3.msra.mxu0 %v4749_v58  ;;  %6350 = vst [vmem:[#allocation60_spill] sm:$0xff] %v5324_v56  ;;  %v5328_v58 = vld [vmem:[#allocation7 + $0x270] sm:$0xff] }
 0x235   :  { %2150 = vmatpush1.msra.mxu1 %v5312_v50  ;;  %3060 = vmatprep.subr.mxu0 %v4755_v61  ;;  %6351 = vst [vmem:[#allocation61_spill] sm:$0xff] %v5328_v58  ;;  %v5332_v61 = vld [vmem:[#allocation7 + $0x238] sm:$0xff] }
 0x236   :  { %2151 = vmatprep.subr.mxu1 %v5316_v52  ;;  %3061 = vmatpush3.msra.mxu0 %v4761_v63  ;;  %6352 = vst [vmem:[#allocation63_spill] sm:$0xff] %v5332_v61  ;;  %v5336_v63 = vld [vmem:[#allocation7 + $0x230] sm:$0xff] }
 0x237   :  { %2152 = vmatpush1.msra.mxu1 %v5320_v54  ;;  %3062 = vmatprep.subr.mxu0 %v4767_v4  ;;  %6353 = vst [vmem:[#allocation119_spill] sm:$0xff] %v5336_v63  ;;  %v5340_v4 = vld [vmem:[#allocation7 + $0x1f8] sm:$0xff] }
 0x238   :  { %2153 = vmatprep.subr.mxu1 %v5324_v56  ;;  %3063 = vmatpush3.msra.mxu0 %v4773_v35  ;;  %6354 = vst [vmem:[#allocation120_spill] sm:$0xff] %v5340_v4  ;;  %v5344_v35 = vld [vmem:[#allocation7 + $0x1f0] sm:$0xff] }
 0x239   :  { %2154 = vmatpush1.msra.mxu1 %v5328_v58  ;;  %3064 = vmatprep.subr.mxu0 %v4779_v3  ;;  %6355 = vst [vmem:[#allocation121_spill] sm:$0xff] %v5344_v35  ;;  %v5348_v3 = vld [vmem:[#allocation7 + $0x1b8] sm:$0xff]  ;;  %v6430_v56 = vld [vmem:[#allocation92_spill] sm:$0xff] }
 0x23a   :  { %2155 = vmatprep.subr.mxu1 %v5332_v61  ;;  %3065 = vmatpush3.msra.mxu0 %v4785_v7  ;;  %6356 = vst [vmem:[#allocation122_spill] sm:$0xff] %v5348_v3  ;;  %v5352_v7 = vld [vmem:[#allocation7 + $0x1b0] sm:$0xff]  ;;  %v759_v54 = vadd.f32 %v6430_v56, %v4959_v62 }
 0x23b   :  { %2156 = vmatpush1.msra.mxu1 %v5336_v63  ;;  %3066 = vmatprep.subr.mxu0 %v4791_v9  ;;  %6357 = vst [vmem:[#allocation123_spill] sm:$0xff] %v5352_v7  ;;  %v5356_v9 = vld [vmem:[#allocation7 + $0x178] sm:$0xff] }
 0x23c   :  { %2157 = vmatprep.subr.mxu1 %v5340_v4  ;;  %3067 = vmatpush3.msra.mxu0 %v4797_v11  ;;  %6358 = vst [vmem:[#allocation124_spill] sm:$0xff] %v5356_v9  ;;  %v5362_v11 = vld [vmem:[#allocation7 + $0x170] sm:$0xff]  ;;  %v1888_v4 = vld [vmem:[#allocation5] sm:$0xff] }
 0x23d   :  { %2158 = vmatpush1.msra.mxu1 %v5344_v35  ;;  %3068 = vmatprep.subr.mxu0 %v4803_v13  ;;  %6359 = vst [vmem:[#allocation125_spill] sm:$0xff] %v5362_v11  ;;  %v5366_v13 = vld [vmem:[#allocation7 + $0x138] sm:$0xff] }
 0x23e   :  { %2159 = vmatprep.subr.mxu1 %v5348_v3  ;;  %3069 = vmatpush3.msra.mxu0 %v4809_v15  ;;  %6360 = vst [vmem:[#allocation126_spill] sm:$0xff] %v5366_v13  ;;  %v5370_v15 = vld [vmem:[#allocation7 + $0x130] sm:$0xff] }
 0x23f   :  { %2160 = vmatpush1.msra.mxu1 %v5352_v7  ;;  %3070 = vmatprep.subr.mxu0 %v4815_v17  ;;  %6361 = vst [vmem:[#allocation127_spill] sm:$0xff] %v5370_v15  ;;  %v5374_v17 = vld [vmem:[#allocation7 + $0xf8] sm:$0xff]  ;;  %v3492_v7 = vld [vmem:[#allocation7 + $0x3e8] sm:$0xff] }
 0x240   :  { %2161 = vmatprep.subr.mxu1 %v5356_v9  ;;  %3071 = vmatpush3.msra.mxu0 %v4821_v18  ;;  %6362 = vst [vmem:[#allocation128_spill] sm:$0xff] %v5374_v17  ;;  %v6363_v18 = vld [vmem:[#allocation10_spill] sm:$0xff]  ;;  %v6413_v9 = vld [vmem:[#allocation71_spill] sm:$0xff] }
 0x241   :  { %2162 = vmatpush1.msra.mxu1 %v5362_v11  ;;  %3072 = vmatprep.subr.mxu0 %v4827_v20  ;;  %6364 = vst [vmem:[#allocation10_spill] sm:$0xff] %v5378_v60  ;;  %v6365_v20 = vld [vmem:[#allocation14_spill] sm:$0xff]  ;;  %v6410_v11 = vld [vmem:[#allocation68_spill] sm:$0xff] }
 0x242   :  { %2163 = vmatprep.subr.mxu1 %v5366_v13  ;;  %3073 = vmatpush3.msra.mxu0 %v4833_v22  ;;  %v5382_v13 = vld [vmem:[#allocation7 + $0xb8] sm:$0xff]  ;;  %v6367_v22 = vld [vmem:[#allocation15_spill] sm:$0xff] }
 0x243   :  { %2164 = vmatpush1.msra.mxu1 %v5370_v15  ;;  %3074 = vmatprep.subr.mxu0 %v4839_v24  ;;  %6366 = vst [vmem:[#allocation14_spill] sm:$0xff] %v5382_v13  ;;  %v5386_v15 = vld [vmem:[#allocation7 + $0xb0] sm:$0xff] }
 0x244   :  { %2165 = vmatprep.subr.mxu1 %v5374_v17  ;;  %3075 = vmatpush3.msra.mxu0 %v6363_v18  ;;  %6368 = vst [vmem:[#allocation15_spill] sm:$0xff] %v5386_v15  ;;  %v6369_v24 = vld [vmem:[#allocation16_spill] sm:$0xff]  ;;  %v5390_v17 = vld [vmem:[#allocation7 + $0x78] sm:$0xff] }
 0x245   :  { %2166 = vmatpush1.msra.mxu1 %v5378_v60  ;;  %3076 = vmatprep.subr.mxu0 %v6365_v20  ;;  %6370 = vst [vmem:[#allocation16_spill] sm:$0xff] %v5390_v17  ;;  %v6371_v18 = vld [vmem:[#allocation17_spill] sm:$0xff]  ;;  %v5394_v60 = vld [vmem:[#allocation7 + $0x70] sm:$0xff]  ;;  %v6373_v20 = vld [vmem:[#allocation18_spill] sm:$0xff] }
 0x246   :  { %2167 = vmatprep.subr.mxu1 %v5382_v13  ;;  %3077 = vmatpush3.msra.mxu0 %v6367_v22  ;;  %6372 = vst [vmem:[#allocation17_spill] sm:$0xff] %v5394_v60  ;;  %v5398_v13 = vld [vmem:[#allocation7 + $0x38] sm:$0xff]  ;;  %v6375_v22 = vld [vmem:[#allocation84_spill] sm:$0xff] }
 0x247   :  { %2168 = vmatpush1.msra.mxu1 %v5386_v15  ;;  %3078 = vmatprep.subr.mxu0 %v6369_v24  ;;  %6374 = vst [vmem:[#allocation18_spill] sm:$0xff] %v5398_v13  ;;  %v5402_v15 = vld [vmem:[#allocation7 + $0x30] sm:$0xff]  ;;  %v6377_v24 = vld [vmem:[#allocation85_spill] sm:$0xff] }
 0x248   :  { %2169 = vmatprep.subr.mxu1 %v5390_v17  ;;  %3079 = vmatpush3.msra.mxu0 %v6371_v18  ;;  %6376 = vst [vmem:[#allocation84_spill] sm:$0xff] %v5402_v15  ;;  %v5406_v17 = vld [vmem:[#allocation7 + $0x7f8] sm:$0xff]  ;;  %v6379_v18 = vld [vmem:[#allocation86_spill] sm:$0xff] }
 0x249   :  { %2170 = vmatpush1.msra.mxu1 %v5394_v60  ;;  %3080 = vmatprep.subr.mxu0 %v6373_v20  ;;  %6378 = vst [vmem:[#allocation85_spill] sm:$0xff] %v5406_v17  ;;  %v5410_v60 = vld [vmem:[#allocation7 + $0x7f0] sm:$0xff]  ;;  %v6381_v20 = vld [vmem:[#allocation87_spill] sm:$0xff] }
 0x24a   :  { %2171 = vmatprep.subr.mxu1 %v5398_v13  ;;  %3081 = vmatpush3.msra.mxu0 %v6375_v22  ;;  %6380 = vst [vmem:[#allocation86_spill] sm:$0xff] %v5410_v60  ;;  %v5414_v13 = vld [vmem:[#allocation7 + $0x7b8] sm:$0xff]  ;;  %v5417_v22 = vld [vmem:[#allocation7 + $0x7b0] sm:$0xff] }
 0x24b   :  { %2172 = vmatpush1.msra.mxu1 %v5402_v15  ;;  %3082 = vmatprep.subr.mxu0 %v6377_v24  ;;  %6382 = vst [vmem:[#allocation87_spill] sm:$0xff] %v5414_v13  ;;  %6383 = vst [vmem:[#allocation129_spill] sm:$0xff] %v5417_v22  ;;  %v5420_v24 = vld [vmem:[#allocation7 + $0x778] sm:$0xff]  ;;  %v6408_v15 = vld [vmem:[#allocation66_spill] sm:$0xff] }
 0x24c   :  { %2173 = vmatprep.subr.mxu1 %v5406_v17  ;;  %3083 = vmatpush3.msra.mxu0 %v6379_v18  ;;  %6384 = vst [vmem:[#allocation130_spill] sm:$0xff] %v5420_v24  ;;  %v5423_v17 = vld [vmem:[#allocation7 + $0x770] sm:$0xff]  ;;  %v5426_v18 = vld [vmem:[#allocation7 + $0x738] sm:$0xff] }
 0x24d   :  { %2174 = vmatpush2.msra.mxu1 %v5410_v60  ;;  %2454 = vmatprep.subr.mxu0 %v6381_v20  ;;  %6385 = vst [vmem:[#allocation131_spill] sm:$0xff] %v5423_v17  ;;  %6386 = vst [vmem:[#allocation132_spill] sm:$0xff] %v5426_v18  ;;  %v5429_v20 = vld [vmem:[#allocation7 + $0x730] sm:$0xff] }
 0x24e   :  { %2175 = vmatprep.subr.mxu1 %v5414_v13  ;;  %6387 = vst [vmem:[#allocation133_spill] sm:$0xff] %v5429_v20  ;;  %v5432_v13 = vld [vmem:[#allocation7 + $0x6f8] sm:$0xff]  ;;  %v6406_v60 = vld [vmem:[#allocation64_spill] sm:$0xff] }
 0x24f   :  { %2176 = vmatpush2.msra.mxu1 %v5417_v22  ;;  %6388 = vst [vmem:[#allocation134_spill] sm:$0xff] %v5432_v13  ;;  %v5435_v22 = vld [vmem:[#allocation7 + $0x6f0] sm:$0xff] }
 0x250   :  { %2177 = vmatprep.subr.mxu1 %v5420_v24  ;;  %6389 = vst [vmem:[#allocation135_spill] sm:$0xff] %v5435_v22  ;;  %v5438_v24 = vld [vmem:[#allocation7 + $0x6b8] sm:$0xff] }
 0x251   :  { %2178 = vmatpush2.msra.mxu1 %v5423_v17  ;;  %6390 = vst [vmem:[#allocation136_spill] sm:$0xff] %v5438_v24  ;;  %v5441_v17 = vld [vmem:[#allocation7 + $0x6b0] sm:$0xff] }
 0x252   :  { %2179 = vmatprep.subr.mxu1 %v5426_v18  ;;  %6391 = vst [vmem:[#allocation137_spill] sm:$0xff] %v5441_v17  ;;  %v5444_v18 = vld [vmem:[#allocation7 + $0x678] sm:$0xff] }
 0x253   :  { %2180 = vmatpush2.msra.mxu1 %v5429_v20  ;;  %6392 = vst [vmem:[#allocation138_spill] sm:$0xff] %v5444_v18  ;;  %v5447_v20 = vld [vmem:[#allocation7 + $0x670] sm:$0xff] }
 0x254   :  { %2181 = vmatprep.subr.mxu1 %v5432_v13  ;;  %6393 = vst [vmem:[#allocation139_spill] sm:$0xff] %v5447_v20  ;;  %v5450_v13 = vld [vmem:[#allocation7 + $0x638] sm:$0xff] }
 0x255   :  { %2182 = vmatpush2.msra.mxu1 %v5435_v22  ;;  %6394 = vst [vmem:[#allocation140_spill] sm:$0xff] %v5450_v13  ;;  %v5453_v22 = vld [vmem:[#allocation7 + $0x630] sm:$0xff] }
 0x256   :  { %2183 = vmatprep.subr.mxu1 %v5438_v24  ;;  %6395 = vst [vmem:[#allocation141_spill] sm:$0xff] %v5453_v22  ;;  %v5456_v24 = vld [vmem:[#allocation7 + $0x5f8] sm:$0xff] }
 0x257   :  { %2184 = vmatpush2.msra.mxu1 %v5441_v17  ;;  %6396 = vst [vmem:[#allocation142_spill] sm:$0xff] %v5456_v24  ;;  %v5459_v17 = vld [vmem:[#allocation7 + $0x5f0] sm:$0xff] }
 0x258   :  { %2185 = vmatprep.subr.mxu1 %v5444_v18  ;;  %6397 = vst [vmem:[#allocation143_spill] sm:$0xff] %v5459_v17  ;;  %v5462_v18 = vld [vmem:[#allocation7 + $0x5b8] sm:$0xff] }
 0x259   :  { %2186 = vmatpush2.msra.mxu1 %v5447_v20  ;;  %6398 = vst [vmem:[#allocation144_spill] sm:$0xff] %v5462_v18  ;;  %v5465_v20 = vld [vmem:[#allocation7 + $0x5b0] sm:$0xff] }
 0x25a   :  { %2187 = vmatprep.subr.mxu1 %v5450_v13  ;;  %6399 = vst [vmem:[#allocation145_spill] sm:$0xff] %v5465_v20  ;;  %v5468_v13 = vld [vmem:[#allocation7 + $0x578] sm:$0xff] }
 0x25b   :  { %2188 = vmatpush2.msra.mxu1 %v5453_v22  ;;  %6400 = vst [vmem:[#allocation146_spill] sm:$0xff] %v5468_v13  ;;  %v5471_v22 = vld [vmem:[#allocation7 + $0x570] sm:$0xff] }
 0x25c   :  { %2189 = vmatprep.subr.mxu1 %v5456_v24  ;;  %6401 = vst [vmem:[#allocation147_spill] sm:$0xff] %v5471_v22  ;;  %v5474_v24 = vld [vmem:[#allocation7 + $0x538] sm:$0xff] }
 0x25d   :  { %2190 = vmatpush2.msra.mxu1 %v5459_v17  ;;  %6402 = vst [vmem:[#allocation148_spill] sm:$0xff] %v5474_v24  ;;  %v5477_v17 = vld [vmem:[#allocation7 + $0x530] sm:$0xff] }
 0x25e   :  { %2191 = vmatprep.subr.mxu1 %v5462_v18  ;;  %6403 = vst [vmem:[#allocation149_spill] sm:$0xff] %v5477_v17  ;;  %v5480_v18 = vld [vmem:[#allocation7 + $0x4f8] sm:$0xff] }
 0x25f   :  { %2192 = vmatpush2.msra.mxu1 %v5465_v20  ;;  %6404 = vst [vmem:[#allocation150_spill] sm:$0xff] %v5480_v18  ;;  %v6405_v20 = vld [vmem:[#allocation62_spill] sm:$0xff] }
 0x260   :  { %2193 = vmatprep.subr.mxu1 %v5468_v13  ;;  %v6407_v13 = vld [vmem:[#allocation65_spill] sm:$0xff] }
 0x261   :  { %2194 = vmatpush2.msra.mxu1 %v5471_v22  ;;  %v6409_v22 = vld [vmem:[#allocation67_spill] sm:$0xff] }
 0x262   :  { %2195 = vmatprep.subr.mxu1 %v5474_v24  ;;  %v6411_v24 = vld [vmem:[#allocation69_spill] sm:$0xff] }
 0x263   :  { %2196 = vmatpush2.msra.mxu1 %v5477_v17  ;;  %v6412_v17 = vld [vmem:[#allocation70_spill] sm:$0xff] }
 0x264   :  { %2197 = vmatprep.subr.mxu1 %v5480_v18  ;;  %v6414_v18 = vld [vmem:[#allocation72_spill] sm:$0xff] }
 0x265   :  { %2198 = vmatpush2.msra.mxu1 %v6405_v20  ;;  %v6415_v20 = vld [vmem:[#allocation73_spill] sm:$0xff] }
 0x266   :  { %2199 = vmatprep.subr.mxu1 %v6406_v60  ;;  %v6416_v60 = vld [vmem:[#allocation74_spill] sm:$0xff] }
 0x267   :  { %2200 = vmatpush2.msra.mxu1 %v6407_v13  ;;  %v6417_v13 = vld [vmem:[#allocation75_spill] sm:$0xff] }
 0x268   :  { %2201 = vmatprep.subr.mxu1 %v6408_v15  ;;  %v6418_v15 = vld [vmem:[#allocation76_spill] sm:$0xff] }
 0x269   :  { %2202 = vmatpush2.msra.mxu1 %v6409_v22  ;;  %v6419_v22 = vld [vmem:[#allocation77_spill] sm:$0xff] }
 0x26a   :  { %2203 = vmatprep.subr.mxu1 %v6410_v11  ;;  %v6420_v11 = vld [vmem:[#allocation78_spill] sm:$0xff] }
 0x26b   :  { %2204 = vmatpush2.msra.mxu1 %v6411_v24  ;;  %v6421_v24 = vld [vmem:[#allocation79_spill] sm:$0xff] }
 0x26c   :  { %2206 = vmatmul.mubr.f32.vlgmr.msra.gmra.mxu1 %v4988_v31  ;;  %2383 = vmatprep.subr.mxu1 %v6412_v17  ;;  %v6422_v31 = vld [vmem:[#allocation80_spill] sm:$0xff]  ;;  %v6423_v17 = vld [vmem:[#allocation81_spill] sm:$0xff] }
 0x26d   :  { %2384 = vmatpush1.msra.mxu1 %v6413_v9  ;;  %v6424_v9 = vld [vmem:[#allocation82_spill] sm:$0xff] }
 0x26e   :  { %2385 = vmatprep.subr.mxu1 %v6414_v18  ;;  %v6425_v18 = vld [vmem:[#allocation83_spill] sm:$0xff] }
 0x26f   :  { %2386 = vmatpush1.msra.mxu1 %v6415_v20  ;;  %v3442_v20 = vld [vmem:[#allocation7 + $0x208] sm:$0xff] }
 0x270   :  { %2387 = vmatprep.subr.mxu1 %v6416_v60  ;;  %v3443_v60 = vld [vmem:[#allocation7 + $0x200] sm:$0xff] }
 0x271   :  { %2388 = vmatpush1.msra.mxu1 %v6417_v13  ;;  %v3444_v13 = vld [vmem:[#allocation7 + $0x1c8] sm:$0xff] }
 0x272   :  { %2389 = vmatprep.subr.mxu1 %v6418_v15  ;;  %v3445_v15 = vld [vmem:[#allocation7 + $0x1c0] sm:$0xff] }
 0x273   :  { %2390 = vmatpush1.msra.mxu1 %v6419_v22  ;;  %v3446_v22 = vld [vmem:[#allocation7 + $0x188] sm:$0xff] }
 0x274   :  { %2391 = vmatprep.subr.mxu1 %v6420_v11  ;;  %v3447_v11 = vld [vmem:[#allocation7 + $0x180] sm:$0xff] }
 0x275   :  { %2392 = vmatpush1.msra.mxu1 %v6421_v24  ;;  %v3448_v24 = vld [vmem:[#allocation7 + $0x148] sm:$0xff] }
 0x276   :  { %2393 = vmatprep.subr.mxu1 %v6422_v31  ;;  %v3449_v31 = vld [vmem:[#allocation7 + $0x140] sm:$0xff] }
 0x277   :  { %2394 = vmatpush1.msra.mxu1 %v6423_v17  ;;  %v3450_v17 = vld [vmem:[#allocation7 + $0x108] sm:$0xff] }
 0x278   :  { %2395 = vmatprep.subr.mxu1 %v6424_v9  ;;  %v3451_v9 = vld [vmem:[#allocation7 + $0x100] sm:$0xff] }
 0x279   :  { %2396 = vmatpush1.msra.mxu1 %v6425_v18  ;;  %v3452_v18 = vld [vmem:[#allocation7 + $0xc8] sm:$0xff] }
 0x27a   :  { %2397 = vmatprep.subr.mxu1 %v3442_v20  ;;  %v3453_v20 = vld [vmem:[#allocation7 + $0xc0] sm:$0xff] }
 0x27b   :  { %2398 = vmatpush1.msra.mxu1 %v3443_v60  ;;  %v3454_v60 = vld [vmem:[#allocation7 + $0x88] sm:$0xff] }
 0x27c   :  { %2399 = vmatprep.subr.mxu1 %v3444_v13  ;;  %v3455_v13 = vld [vmem:[#allocation7 + $0x80] sm:$0xff] }
 0x27d   :  { %2400 = vmatpush1.msra.mxu1 %v3445_v15  ;;  %v3456_v15 = vld [vmem:[#allocation7 + $0x48] sm:$0xff] }
 0x27e   :  { %2401 = vmatprep.subr.mxu1 %v3446_v22  ;;  %v3457_v22 = vld [vmem:[#allocation7 + $0x40] sm:$0xff] }
 0x27f   :  { %2402 = vmatpush1.msra.mxu1 %v3447_v11  ;;  %v3458_v11 = vld [vmem:[#allocation7 + $0x8] sm:$0xff] }
 0x280   :  { %2403 = vmatprep.subr.mxu1 %v3448_v24  ;;  %v3459_v24 = vld [vmem:[#allocation7] sm:$0xff] }
 0x281   :  { %2404 = vmatpush1.msra.mxu1 %v3449_v31  ;;  %v3460_v31 = vld [vmem:[#allocation7 + $0x7c8] sm:$0xff] }
 0x282   :  { %2405 = vmatprep.subr.mxu1 %v3450_v17  ;;  %v3461_v17 = vld [vmem:[#allocation7 + $0x7c0] sm:$0xff] }
 0x283   :  { %2406 = vmatpush1.msra.mxu1 %v3451_v9  ;;  %v3462_v9 = vld [vmem:[#allocation7 + $0x788] sm:$0xff] }
 0x284   :  { %2407 = vmatprep.subr.mxu1 %v3452_v18  ;;  %v3463_v18 = vld [vmem:[#allocation7 + $0x780] sm:$0xff] }
 0x285   :  { %2408 = vmatpush1.msra.mxu1 %v3453_v20  ;;  %v3464_v20 = vld [vmem:[#allocation7 + $0x748] sm:$0xff] }
 0x286   :  { %2409 = vmatprep.subr.mxu1 %v3454_v60  ;;  %v3465_v60 = vld [vmem:[#allocation7 + $0x740] sm:$0xff] }
 0x287   :  { %2410 = vmatpush1.msra.mxu1 %v3455_v13  ;;  %v3466_v13 = vld [vmem:[#allocation7 + $0x708] sm:$0xff] }
 0x288   :  { %2411 = vmatprep.subr.mxu1 %v3456_v15  ;;  %v3467_v15 = vld [vmem:[#allocation7 + $0x700] sm:$0xff] }
 0x289   :  { %2412 = vmatpush1.msra.mxu1 %v3457_v22  ;;  %v3468_v22 = vld [vmem:[#allocation7 + $0x6c8] sm:$0xff] }
 0x28a   :  { %2413 = vmatprep.subr.mxu1 %v3458_v11  ;;  %v3469_v11 = vld [vmem:[#allocation7 + $0x6c0] sm:$0xff] }
 0x28b   :  { %2414 = vmatpush1.msra.mxu1 %v3459_v24  ;;  %v3470_v24 = vld [vmem:[#allocation7 + $0x688] sm:$0xff] }
 0x28c   :  { %2415 = vmatprep.subr.mxu1 %v3460_v31  ;;  %v3471_v31 = vld [vmem:[#allocation7 + $0x680] sm:$0xff] }
 0x28d   :  { %2416 = vmatpush2.msra.mxu1 %v3461_v17  ;;  %v3472_v17 = vld [vmem:[#allocation7 + $0x648] sm:$0xff] }
 0x28e   :  { %2417 = vmatprep.subr.mxu1 %v3462_v9  ;;  %v3473_v9 = vld [vmem:[#allocation7 + $0x640] sm:$0xff] }
 0x28f   :  { %2418 = vmatpush2.msra.mxu1 %v3463_v18  ;;  %v3474_v18 = vld [vmem:[#allocation7 + $0x608] sm:$0xff] }
 0x290   :  { %2419 = vmatprep.subr.mxu1 %v3464_v20  ;;  %v3475_v20 = vld [vmem:[#allocation7 + $0x600] sm:$0xff] }
 0x291   :  { %2420 = vmatpush2.msra.mxu1 %v3465_v60  ;;  %v3476_v60 = vld [vmem:[#allocation7 + $0x5c8] sm:$0xff] }
 0x292   :  { %2421 = vmatprep.subr.mxu1 %v3466_v13  ;;  %v3477_v13 = vld [vmem:[#allocation7 + $0x5c0] sm:$0xff] }
 0x293   :  { %2422 = vmatpush2.msra.mxu1 %v3467_v15  ;;  %v3478_v15 = vld [vmem:[#allocation7 + $0x588] sm:$0xff] }
 0x294   :  { %2423 = vmatprep.subr.mxu1 %v3468_v22  ;;  %v3479_v22 = vld [vmem:[#allocation7 + $0x580] sm:$0xff] }
 0x295   :  { %2424 = vmatpush2.msra.mxu1 %v3469_v11  ;;  %v3480_v11 = vld [vmem:[#allocation7 + $0x548] sm:$0xff] }
 0x296   :  { %2425 = vmatprep.subr.mxu1 %v3470_v24  ;;  %v3481_v24 = vld [vmem:[#allocation7 + $0x540] sm:$0xff] }
 0x297   :  { %2426 = vmatpush2.msra.mxu1 %v3471_v31  ;;  %v3482_v31 = vld [vmem:[#allocation7 + $0x508] sm:$0xff] }
 0x298   :  { %2427 = vmatprep.subr.mxu1 %v3472_v17  ;;  %v3483_v17 = vld [vmem:[#allocation7 + $0x500] sm:$0xff] }
 0x299   :  { %2428 = vmatpush2.msra.mxu1 %v3473_v9  ;;  %v3484_v9 = vld [vmem:[#allocation7 + $0x4c8] sm:$0xff] }
 0x29a   :  { %2429 = vmatprep.subr.mxu1 %v3474_v18  ;;  %v3485_v18 = vld [vmem:[#allocation7 + $0x4c0] sm:$0xff] }
 0x29b   :  { %2430 = vmatpush2.msra.mxu1 %v3475_v20  ;;  %v3486_v20 = vld [vmem:[#allocation7 + $0x488] sm:$0xff] }
 0x29c   :  { %2431 = vmatprep.subr.mxu1 %v3476_v60  ;;  %v3487_v60 = vld [vmem:[#allocation7 + $0x480] sm:$0xff] }
 0x29d   :  { %2432 = vmatpush2.msra.mxu1 %v3477_v13  ;;  %v3488_v13 = vld [vmem:[#allocation7 + $0x448] sm:$0xff] }
 0x29e   :  { %2433 = vmatprep.subr.mxu1 %v3478_v15  ;;  %v3489_v15 = vld [vmem:[#allocation7 + $0x440] sm:$0xff] }
 0x29f   :  { %2434 = vmatpush2.msra.mxu1 %v3479_v22 }
 0x2a0   :  { %2435 = vmatprep.subr.mxu1 %v3480_v11  ;;  %v3490_v11 = vld [vmem:[#allocation7 + $0x408] sm:$0xff] }
 0x2a1   :  { %2436 = vmatpush2.msra.mxu1 %v3481_v24  ;;  %v3491_v24 = vld [vmem:[#allocation7 + $0x400] sm:$0xff] }
 0x2a2   :  { %2437 = vmatprep.subr.mxu1 %v3482_v31 }
 0x2a3   :  { %2438 = vmatpush2.msra.mxu1 %v3483_v17 }
 0x2a4   :  { %2439 = vmatprep.subr.mxu1 %v3484_v9  ;;  %v6426_v9 = vld [vmem:[#allocation41_spill] sm:$0xff] }
 0x2a5   :  { %2440 = vmatpush2.msra.mxu1 %v3485_v18 }
 0x2a6   :  { %2441 = vmatprep.subr.mxu1 %v3486_v20 }
 0x2a7   :  { %2442 = vmatpush2.msra.mxu1 %v3487_v60 }
 0x2a8   :  { %2443 = vmatprep.subr.mxu1 %v3488_v13  ;;  %v1896_v13 = vld [vmem:[%s5928_s11] sm:$0xff] }
 0x2a9   :  { %2444 = vmatpush2.msra.mxu1 %v3489_v15  ;;  %v6427_v15 = vld [vmem:[#allocation88_spill] sm:$0xff] }
 0x2aa   :  { %v3049_v22 = vpop.f32.mrf.mxu1  ;;  %2445 = vmatprep.subr.mxu1 %v3490_v11  ;;  %v1994_v60 = vpop.f32.mrf.mxu0  ;;  %v617_v11 = vadd.f32 %v6427_v15, %v4942_v49  ;;  %v6429_v15 = vld [vmem:[#allocation89_spill] sm:$0xff] }
 0x2ab   :  { %2446 = vmatpush2.msra.mxu1 %v3491_v24  ;;  %v688_v49 = vadd.f32 %v6429_v15, %v4951_v21 }
 0x2ac   :  { %v3050_v31 = vpop.f32.mrf.mxu1  ;;  %2525 = vmatprep.subr.mxu1 %v3492_v7  ;;  %v1996_v63 = vpop.f32.mrf.mxu0  ;;  %v6428_v7 = vld [vmem:[#allocation90_spill] sm:$0xff] }
 0x2ad   :  { %v3051_v17 = vadd.f32 %v3050_v31, %v3049_v22  ;;  %v619_v22 = vadd.f32 %v6428_v7, %v4946_v38  ;;  %v2212_v31 = vadd.f32 %v1994_v60, %v617_v11  ;;  %v6432_v11 = vld [vmem:[#allocation94_spill] sm:$0xff] }
 0x2af   :  { %v1889_v3 = vadd.f32 %v3051_v17, %v6426_v9 }
 0x2b1   :  { %v2993_v18 = vmul.f32 -1.442695, %v1889_v3 }
 0x2b3   :  { %3210 = vpow2.f32 %v2993_v18  ;;  %v2213_v18 = vadd.f32 %v1996_v63, %v619_v22  ;;  %v6431_v63 = vld [vmem:[#allocation91_spill] sm:$0xff] }
 0x2c0   :  { %v3211_v20 = vpop.eup %3210 }
 0x2c1   :  { %v1893_v35 = vadd.f32 1.0, %v3211_v20  ;;  %v2995_v20 = vmul.f32 -1.442695, %v2212_v31 }
 0x2c3   :  { %3212 = vrcp.f32 %v1893_v35  ;;  %v2996_v35 = vmul.f32 -1.442695, %v2213_v18 }
 0x2c4   :  { %3214 = vpow2.f32 %v2995_v20 }
 0x2c5   :  { %3216 = vpow2.f32 %v2996_v35 }
 0x2d0   :  { %v3213_v24 = vpop.eup %3212 }
 0x2d1   :  { %v1897_v3 = vmul.f32 %v3213_v24, %v1896_v13  ;;  %v3215_v9 = vpop.eup %3214  ;;  %v761_v24 = vadd.f32 %v6432_v11, %v4962_v34 }
 0x2d2   :  { %v3217_v61 = vpop.eup %3216  ;;  %v2226_v58 = vadd.f32 1.0, %v3215_v9 }
 0x2d3   :  { %v1898_v17 = vadd.f32 %v1897_v3, %v1888_v4  ;;  %v2227_v7 = vadd.f32 1.0, %v3217_v61  ;;  %v690_v4 = vadd.f32 %v6431_v63, %v4948_v1 }
 0x2d4   :  { %3218 = vrcp.f32 %v2226_v58 }
 0x2d5   :  { %1899 = vst.msk [vmem:[#allocation5] sm:$0xff] %vm1169_vm5, %v1898_v17 }
 0x2e1   :  { %v3219_v61 = vpop.eup %3218 }
 0x2eb   :  { %v2065_v60 = vpop.f32.mrf.mxu1  ;;  %v2136_v13 = vpop.f32.mrf.mxu0 }
 0x2ec   :  { %v2214_v22 = vadd.f32 %v2065_v60, %v688_v49  ;;  %v2216_v31 = vadd.f32 %v2136_v13, %v759_v54 }
 0x2ed   :  { %v2067_v3 = vpop.f32.mrf.mxu1  ;;  %v2138_v9 = vpop.f32.mrf.mxu0 }
 0x2ee   :  { %v2997_v17 = vmul.f32 -1.442695, %v2214_v22  ;;  %3220 = vtanh.f32 %v2216_v31  ;;  %v2215_v18 = vadd.f32 %v2067_v3, %v690_v4  ;;  %v2217_v20 = vadd.f32 %v2138_v9, %v761_v24  ;;  %v6433_v3 = vld [vmem:[#allocation93_spill] sm:$0xff] }
 0x2ef   :  { %3222 = vrcp.f32 %v2227_v7  ;;  %v830_v9 = vadd.f32 %v6433_v3, %v4964_v30  ;;  %v6449_v3 = vld [vmem:[#allocation19_spill] sm:$0xff] }
 0x2f0   :  { %3224 = vpow2.f32 %v2997_v17  ;;  %v2998_v56 = vmul.f32 -1.442695, %v2215_v18 }
 0x2f1   :  { %3226 = vtanh.f32 %v2217_v20 }
 0x2f2   :  { %3228 = vpow2.f32 %v2998_v56 }
 0x2fb   :  { %v3221_v35 = vpop.eup %3220 }
 0x2fc   :  { %v3223_v15 = vpop.eup %3222  ;;  %v2260_v63 = vmul.f32 %v3221_v35, %v3219_v61 }
 0x2fd   :  { %v3225_v1 = vpop.eup %3224 }
 0x2fe   :  { %v3227_v11 = vpop.eup %3226  ;;  %v2238_v49 = vadd.f32 1.0, %v3225_v1  ;;  %v6434_v1 = vld [vmem:[#allocation95_spill] sm:$0xff] }
 0x2ff   :  { %v3229_v54 = vpop.eup %3228  ;;  %v2261_v58 = vmul.f32 %v3227_v11, %v3223_v15  ;;  %v832_v18 = vadd.f32 %v6434_v1, %v4967_v51  ;;  %v3496_v1 = vld [vmem:[#allocation7 + $0x1e0] sm:$0xff] }
 0x300   :  { %3230 = vrcp.f32 %v2238_v49  ;;  %v2239_v60 = vadd.f32 1.0, %v3229_v54 }
 0x302   :  { %3232 = vrcp.f32 %v2239_v60 }
 0x30d   :  { %v3231_v13 = vpop.eup %3230 }
 0x30e   :  { %v2258_v4 = vmul.f32 %v3231_v13, %v4982_v27 }
 0x30f   :  { %v3233_v7 = vpop.eup %3232 }
 0x310   :  { %v5523_v24 = vadd.f32 %v2260_v63, %v2258_v4  ;;  %v2259_v22 = vmul.f32 %v3233_v7, %v4980_v14  ;;  %v6448_v7 = vld [vmem:[#allocation118_spill] sm:$0xff] }
 0x312   :  { %v5526_v31 = vadd.f32 %v2261_v58, %v2259_v22  ;;  %v3494_v22 = vld [vmem:[#allocation7 + $0x220] sm:$0xff] }
 0x32c   :  { %v2207_v17 = vpop.f32.mrf.mxu1 }
 0x32d   :  { %v2218_v20 = vadd.f32 %v2207_v17, %v830_v9  ;;  %v3495_v9 = vld [vmem:[#allocation7 + $0x1e8] sm:$0xff]  ;;  %v6450_v17 = vld [vmem:[#allocation20_spill] sm:$0xff] }
 0x32e   :  { %v2209_v56 = vpop.f32.mrf.mxu1 }
 0x32f   :  { %v2999_v61 = vmul.f32 -1.442695, %v2218_v20  ;;  %v2219_v35 = vadd.f32 %v2209_v56, %v832_v18  ;;  %v6451_v18 = vld [vmem:[#allocation21_spill] sm:$0xff]  ;;  %v3497_v20 = vld [vmem:[#allocation7 + $0x1a8] sm:$0xff]  ;;  %v6452_v56 = vld [vmem:[#allocation22_spill] sm:$0xff] }
 0x331   :  { %3234 = vpow2.f32 %v2999_v61  ;;  %v3000_v27 = vmul.f32 -1.442695, %v2219_v35  ;;  %v3498_v61 = vld [vmem:[#allocation7 + $0x1a0] sm:$0xff]  ;;  %v6453_v35 = vld [vmem:[#allocation23_spill] sm:$0xff] }
 0x333   :  { %3236 = vpow2.f32 %v3000_v27  ;;  %v3499_v27 = vld [vmem:[#allocation7 + $0x168] sm:$0xff] }
 0x334   :  { %3238 = vtanh.f32 %v5526_v31 }
 0x33e   :  { %v3235_v15 = vpop.eup %3234 }
 0x33f   :  { %v2252_v63 = vadd.f32 1.0, %v3235_v15  ;;  %v6454_v15 = vld [vmem:[#allocation24_spill] sm:$0xff] }
 0x340   :  { %v3237_v11 = vpop.eup %3236 }
 0x341   :  { %v2253_v14 = vadd.f32 1.0, %v3237_v11  ;;  %3240 = vrcp.f32 %v2252_v63  ;;  %v3239_v49 = vpop.eup %3238  ;;  %v3500_v63 = vld [vmem:[#allocation7 + $0x160] sm:$0xff]  ;;  %v6455_v11 = vld [vmem:[#allocation25_spill] sm:$0xff] }
 0x343   :  { %3242 = vrcp.f32 %v2253_v14  ;;  %v3501_v14 = vld [vmem:[#allocation7 + $0x128] sm:$0xff] }
 0x344   :  { %3244 = vtanh.f32 %v5523_v24 }
 0x34e   :  { %v3241_v54 = vpop.eup %3240 }
 0x350   :  { %v3243_v58 = vpop.eup %3242 }
 0x351   :  { %v3245_v60 = vpop.eup %3244  ;;  %v5534_v13 = vmul.f32 %v3243_v58, %v3239_v49  ;;  %v6456_v49 = vld [vmem:[#allocation26_spill] sm:$0xff]  ;;  %v6457_v58 = vld [vmem:[#allocation27_spill] sm:$0xff] }
 0x352   :  { %v5536_v4 = vmul.f32 %v3245_v60, %v3241_v54  ;;  %v3502_v54 = vld [vmem:[#allocation7 + $0x120] sm:$0xff]  ;;  %v3503_v60 = vld [vmem:[#allocation7 + $0xe8] sm:$0xff] }
 0x353   :  { %2336 = vmatprep.mubr.f32.mxu0 %v5534_v13  ;;  %2447 = vmatprep.mubr.f32.mxu1 %v5534_v13 }
 0x354   :  { %2337 = vmatmul.mubr.f32.vlgmr.msra.gmra.mxu0 %v5536_v4  ;;  %2448 = vmatmul.mubr.f32.vlgmr.msra.gmra.mxu1 %v5536_v4 }
 0x355   :  { %2455 = vmatpush1.msra.mxu0 %v4994_v45  ;;  %2526 = vmatpush1.msra.mxu1 %v4997_v37  ;;  %v6435_v45 = vld [vmem:[#allocation105_spill] sm:$0xff]  ;;  %v6436_v37 = vld [vmem:[#allocation106_spill] sm:$0xff] }
 0x356   :  { %2456 = vmatprep.subr.mxu0 %v5000_v23  ;;  %2518 = vmatprep.mubr.f32.mxu0 %v5534_v13  ;;  %v6437_v23 = vld [vmem:[#allocation107_spill] sm:$0xff] }
 0x357   :  { %2527 = vmatprep.subr.mxu1 %v5004_v43  ;;  %2589 = vmatprep.mubr.f32.mxu1 %v5534_v13  ;;  %v6438_v43 = vld [vmem:[#allocation108_spill] sm:$0xff] }
 0x358   :  { %2457 = vmatpush1.msra.mxu0 %v5008_v39  ;;  %2528 = vmatpush1.msra.mxu1 %v5011_v28  ;;  %v6439_v39 = vld [vmem:[#allocation109_spill] sm:$0xff]  ;;  %v6440_v28 = vld [vmem:[#allocation110_spill] sm:$0xff] }
 0x359   :  { %2458 = vmatprep.subr.mxu0 %v5014_v33  ;;  %2529 = vmatprep.subr.mxu1 %v5017_v26  ;;  %v6441_v33 = vld [vmem:[#allocation111_spill] sm:$0xff]  ;;  %v6442_v26 = vld [vmem:[#allocation112_spill] sm:$0xff] }
 0x35a   :  { %2459 = vmatpush1.msra.mxu0 %v5020_v47  ;;  %2530 = vmatpush1.msra.mxu1 %v5023_v57  ;;  %v6443_v47 = vld [vmem:[#allocation113_spill] sm:$0xff]  ;;  %v6444_v57 = vld [vmem:[#allocation114_spill] sm:$0xff] }
 0x35b   :  { %2460 = vmatprep.subr.mxu0 %v5026_v5  ;;  %2531 = vmatprep.subr.mxu1 %v5029_v36  ;;  %v6445_v5 = vld [vmem:[#allocation115_spill] sm:$0xff]  ;;  %v6446_v36 = vld [vmem:[#allocation116_spill] sm:$0xff] }
 0x35c   :  { %2461 = vmatpush1.msra.mxu0 %v5032_v40  ;;  %2532 = vmatpush1.msra.mxu1 %v5035_v42  ;;  %v6447_v40 = vld [vmem:[#allocation117_spill] sm:$0xff]  ;;  %v3493_v42 = vld [vmem:[#allocation7 + $0x228] sm:$0xff] }
 0x35d   :  { %2462 = vmatprep.subr.mxu0 %v6435_v45  ;;  %2533 = vmatprep.subr.mxu1 %v6436_v37  ;;  %v6458_v45 = vld [vmem:[#allocation28_spill] sm:$0xff]  ;;  %v3504_v37 = vld [vmem:[#allocation7 + $0xe0] sm:$0xff] }
 0x35e   :  { %2463 = vmatpush1.msra.mxu0 %v6437_v23  ;;  %2534 = vmatpush1.msra.mxu1 %v6438_v43  ;;  %v6459_v23 = vld [vmem:[#allocation29_spill] sm:$0xff]  ;;  %v3505_v43 = vld [vmem:[#allocation7 + $0xa8] sm:$0xff] }
 0x35f   :  { %2464 = vmatprep.subr.mxu0 %v6439_v39  ;;  %2535 = vmatprep.subr.mxu1 %v6440_v28  ;;  %v6460_v39 = vld [vmem:[#allocation30_spill] sm:$0xff] }
 0x360   :  { %2465 = vmatpush1.msra.mxu0 %v6441_v33  ;;  %2536 = vmatpush1.msra.mxu1 %v6442_v26  ;;  %v3506_v28 = vld [vmem:[#allocation7 + $0xa0] sm:$0xff]  ;;  %v6461_v33 = vld [vmem:[#allocation31_spill] sm:$0xff] }
 0x361   :  { %2466 = vmatprep.subr.mxu0 %v6443_v47  ;;  %2537 = vmatprep.subr.mxu1 %v6444_v57  ;;  %v3507_v26 = vld [vmem:[#allocation7 + $0x68] sm:$0xff]  ;;  %v6462_v47 = vld [vmem:[#allocation32_spill] sm:$0xff]  ;;  %v3508_v57 = vld [vmem:[#allocation7 + $0x60] sm:$0xff] }
 0x362   :  { %2467 = vmatpush1.msra.mxu0 %v6445_v5  ;;  %2538 = vmatpush1.msra.mxu1 %v6446_v36  ;;  %v6463_v5 = vld [vmem:[#allocation33_spill] sm:$0xff]  ;;  %v3509_v36 = vld [vmem:[#allocation7 + $0x28] sm:$0xff] }
 0x363   :  { %2468 = vmatprep.subr.mxu0 %v6447_v40  ;;  %2539 = vmatprep.subr.mxu1 %v3493_v42  ;;  %v3510_v40 = vld [vmem:[#allocation7 + $0x20] sm:$0xff] }
 0x364   :  { %2469 = vmatpush1.msra.mxu0 %v6448_v7  ;;  %2540 = vmatpush1.msra.mxu1 %v3494_v22  ;;  %v6464_v42 = vld [vmem:[#allocation34_spill] sm:$0xff]  ;;  %v3511_v7 = vld [vmem:[#allocation7 + $0x7e8] sm:$0xff] }
 0x365   :  { %2470 = vmatprep.subr.mxu0 %v6449_v3  ;;  %2541 = vmatprep.subr.mxu1 %v3495_v9  ;;  %v3512_v22 = vld [vmem:[#allocation7 + $0x7e0] sm:$0xff]  ;;  %v6465_v3 = vld [vmem:[#allocation35_spill] sm:$0xff] }
 0x366   :  { %2471 = vmatpush1.msra.mxu0 %v6450_v17  ;;  %2542 = vmatpush1.msra.mxu1 %v3496_v1  ;;  %v3513_v9 = vld [vmem:[#allocation7 + $0x7a8] sm:$0xff]  ;;  %v6466_v17 = vld [vmem:[#allocation36_spill] sm:$0xff]  ;;  %v3514_v1 = vld [vmem:[#allocation7 + $0x7a0] sm:$0xff] }
 0x367   :  { %2472 = vmatprep.subr.mxu0 %v6451_v18  ;;  %2543 = vmatprep.subr.mxu1 %v3497_v20  ;;  %v6467_v18 = vld [vmem:[#allocation37_spill] sm:$0xff]  ;;  %v6468_v20 = vld [vmem:[#allocation38_spill] sm:$0xff] }
 0x368   :  { %2473 = vmatpush1.msra.mxu0 %v6452_v56  ;;  %2544 = vmatpush1.msra.mxu1 %v3498_v61  ;;  %v3516_v56 = vld [vmem:[#allocation7 + $0x760] sm:$0xff]  ;;  %v6469_v61 = vld [vmem:[#allocation39_spill] sm:$0xff] }
 0x369   :  { %2474 = vmatprep.subr.mxu0 %v6453_v35  ;;  %2545 = vmatprep.subr.mxu1 %v3499_v27  ;;  %v6470_v35 = vld [vmem:[#allocation40_spill] sm:$0xff]  ;;  %v3518_v27 = vld [vmem:[#allocation7 + $0x720] sm:$0xff] }
 0x36a   :  { %2475 = vmatpush1.msra.mxu0 %v6454_v15  ;;  %2546 = vmatpush1.msra.mxu1 %v3500_v63  ;;  %v6471_v15 = vld [vmem:[#allocation42_spill] sm:$0xff]  ;;  %v3519_v63 = vld [vmem:[#allocation7 + $0x6e8] sm:$0xff] }
 0x36b   :  { %2476 = vmatprep.subr.mxu0 %v6455_v11  ;;  %2547 = vmatprep.subr.mxu1 %v3501_v14  ;;  %v6472_v11 = vld [vmem:[#allocation43_spill] sm:$0xff]  ;;  %v3520_v14 = vld [vmem:[#allocation7 + $0x6e0] sm:$0xff] }
 0x36c   :  { %2477 = vmatpush1.msra.mxu0 %v6456_v49  ;;  %2548 = vmatpush1.msra.mxu1 %v3502_v54  ;;  %v6473_v49 = vld [vmem:[#allocation44_spill] sm:$0xff]  ;;  %v3521_v54 = vld [vmem:[#allocation7 + $0x6a8] sm:$0xff] }
 0x36d   :  { %2478 = vmatprep.subr.mxu0 %v6457_v58  ;;  %2549 = vmatprep.subr.mxu1 %v3503_v60  ;;  %v6474_v58 = vld [vmem:[#allocation45_spill] sm:$0xff]  ;;  %v3522_v60 = vld [vmem:[#allocation7 + $0x6a0] sm:$0xff] }
 0x36e   :  { %2479 = vmatpush1.msra.mxu0 %v6458_v45  ;;  %2550 = vmatpush1.msra.mxu1 %v3504_v37  ;;  %v6475_v45 = vld [vmem:[#allocation46_spill] sm:$0xff]  ;;  %v3523_v37 = vld [vmem:[#allocation7 + $0x668] sm:$0xff] }
 0x36f   :  { %2480 = vmatprep.subr.mxu0 %v6459_v23  ;;  %2551 = vmatprep.subr.mxu1 %v3505_v43  ;;  %v6476_v23 = vld [vmem:[#allocation47_spill] sm:$0xff]  ;;  %v3524_v43 = vld [vmem:[#allocation7 + $0x660] sm:$0xff] }
 0x370   :  { %2481 = vmatpush1.msra.mxu0 %v6460_v39  ;;  %2552 = vmatpush1.msra.mxu1 %v3506_v28  ;;  %v6477_v39 = vld [vmem:[#allocation48_spill] sm:$0xff]  ;;  %v3525_v28 = vld [vmem:[#allocation7 + $0x628] sm:$0xff] }
 0x371   :  { %2482 = vmatprep.subr.mxu0 %v6461_v33  ;;  %2553 = vmatprep.subr.mxu1 %v3507_v26  ;;  %v6478_v33 = vld [vmem:[#allocation49_spill] sm:$0xff]  ;;  %v3526_v26 = vld [vmem:[#allocation7 + $0x620] sm:$0xff] }
 0x372   :  { %2483 = vmatpush1.msra.mxu0 %v6462_v47  ;;  %2554 = vmatpush1.msra.mxu1 %v3508_v57  ;;  %v6479_v47 = vld [vmem:[#allocation50_spill] sm:$0xff]  ;;  %v3527_v57 = vld [vmem:[#allocation7 + $0x5e8] sm:$0xff] }
 0x373   :  { %2484 = vmatprep.subr.mxu0 %v6463_v5  ;;  %2555 = vmatprep.subr.mxu1 %v3509_v36  ;;  %v6480_v5 = vld [vmem:[#allocation51_spill] sm:$0xff]  ;;  %v3528_v36 = vld [vmem:[#allocation7 + $0x5e0] sm:$0xff] }
 0x374   :  { %2485 = vmatpush1.msra.mxu0 %v5142_v6  ;;  %2556 = vmatpush1.msra.mxu1 %v3510_v40  ;;  %v3515_v6 = vld [vmem:[#allocation7 + $0x768] sm:$0xff]  ;;  %v6481_v40 = vld [vmem:[#allocation52_spill] sm:$0xff] }
 0x375   :  { %2486 = vmatprep.subr.mxu0 %v6464_v42  ;;  %2557 = vmatprep.subr.mxu1 %v3511_v7  ;;  %v3529_v42 = vld [vmem:[#allocation7 + $0x5a8] sm:$0xff]  ;;  %v6482_v7 = vld [vmem:[#allocation53_spill] sm:$0xff] }
 0x376   :  { %2487 = vmatpush2.msra.mxu0 %v5150_v0  ;;  %2558 = vmatpush2.msra.mxu1 %v3512_v22  ;;  %v3517_v0 = vld [vmem:[#allocation7 + $0x728] sm:$0xff]  ;;  %v3530_v22 = vld [vmem:[#allocation7 + $0x5a0] sm:$0xff] }
 0x377   :  { %2488 = vmatprep.subr.mxu0 %v6465_v3  ;;  %2559 = vmatprep.subr.mxu1 %v3513_v9  ;;  %v6483_v3 = vld [vmem:[#allocation54_spill] sm:$0xff]  ;;  %v3531_v9 = vld [vmem:[#allocation7 + $0x568] sm:$0xff] }
 0x378   :  { %2489 = vmatpush2.msra.mxu0 %v6466_v17  ;;  %2560 = vmatpush2.msra.mxu1 %v3514_v1  ;;  %v3532_v17 = vld [vmem:[#allocation7 + $0x560] sm:$0xff]  ;;  %v6484_v1 = vld [vmem:[#allocation55_spill] sm:$0xff] }
 0x379   :  { %2490 = vmatprep.subr.mxu0 %v6467_v18  ;;  %2561 = vmatprep.subr.mxu1 %v3515_v6  ;;  %v3533_v18 = vld [vmem:[#allocation7 + $0x528] sm:$0xff]  ;;  %v6485_v6 = vld [vmem:[#allocation56_spill] sm:$0xff] }
 0x37a   :  { %2491 = vmatpush2.msra.mxu0 %v6468_v20  ;;  %2562 = vmatpush2.msra.mxu1 %v3516_v56  ;;  %v3534_v20 = vld [vmem:[#allocation7 + $0x520] sm:$0xff]  ;;  %v3535_v56 = vld [vmem:[#allocation7 + $0x4e8] sm:$0xff] }
 0x37b   :  { %2492 = vmatprep.subr.mxu0 %v6469_v61  ;;  %2563 = vmatprep.subr.mxu1 %v3517_v0  ;;  %v6486_v61 = vld [vmem:[#allocation57_spill] sm:$0xff]  ;;  %v3536_v0 = vld [vmem:[#allocation7 + $0x4e0] sm:$0xff] }
 0x37c   :  { %2493 = vmatpush2.msra.mxu0 %v6470_v35  ;;  %2564 = vmatpush2.msra.mxu1 %v3518_v27  ;;  %v6487_v35 = vld [vmem:[#allocation58_spill] sm:$0xff] }
 0x37d   :  { %2494 = vmatprep.subr.mxu0 %v6471_v15  ;;  %2565 = vmatprep.subr.mxu1 %v3519_v63  ;;  %v3538_v27 = vld [vmem:[#allocation7 + $0x4a0] sm:$0xff]  ;;  %v3539_v15 = vld [vmem:[#allocation7 + $0x468] sm:$0xff] }
 0x37e   :  { %2495 = vmatpush2.msra.mxu0 %v6472_v11  ;;  %2566 = vmatpush2.msra.mxu1 %v3520_v14  ;;  %v3541_v63 = vld [vmem:[#allocation7 + $0x428] sm:$0xff]  ;;  %v3542_v11 = vld [vmem:[#allocation7 + $0x420] sm:$0xff] }
 0x37f   :  { %2496 = vmatprep.subr.mxu0 %v6473_v49  ;;  %2567 = vmatprep.subr.mxu1 %v3521_v54  ;;  %v6491_v14 = vld [vmem:[#allocation63_spill] sm:$0xff]  ;;  %v3556_v49 = vld [vmem:[%s5926_s9 + $0x48] sm:$0xff] }
 0x380   :  { %2497 = vmatpush2.msra.mxu0 %v6474_v58  ;;  %2568 = vmatpush2.msra.mxu1 %v3522_v60  ;;  %v6492_v54 = vld [vmem:[#allocation119_spill] sm:$0xff]  ;;  %v3557_v58 = vld [vmem:[%s5926_s9 + $0xc0] sm:$0xff]  ;;  %v6493_v60 = vld [vmem:[#allocation120_spill] sm:$0xff] }
 0x381   :  { %2498 = vmatprep.subr.mxu0 %v6475_v45  ;;  %2569 = vmatprep.subr.mxu1 %v3523_v37  ;;  %v3558_v45 = vld [vmem:[%s5926_s9 + $0x40] sm:$0xff] }
 0x382   :  { %2499 = vmatpush2.msra.mxu0 %v6476_v23  ;;  %2570 = vmatpush2.msra.mxu1 %v3524_v43  ;;  %v6494_v37 = vld [vmem:[#allocation121_spill] sm:$0xff]  ;;  %v3559_v23 = vld [vmem:[%s5926_s9 + $0xb8] sm:$0xff]  ;;  %v6495_v43 = vld [vmem:[#allocation122_spill] sm:$0xff] }
 0x383   :  { %2500 = vmatprep.subr.mxu0 %v6477_v39  ;;  %2571 = vmatprep.subr.mxu1 %v3525_v28  ;;  %v3560_v39 = vld [vmem:[%s5926_s9 + $0x38] sm:$0xff]  ;;  %v6496_v28 = vld [vmem:[#allocation123_spill] sm:$0xff] }
 0x384   :  { %2501 = vmatpush2.msra.mxu0 %v6478_v33  ;;  %2572 = vmatpush2.msra.mxu1 %v3526_v26  ;;  %v3561_v33 = vld [vmem:[%s5926_s9 + $0xb0] sm:$0xff]  ;;  %v6497_v26 = vld [vmem:[#allocation124_spill] sm:$0xff] }
 0x385   :  { %2502 = vmatprep.subr.mxu0 %v6479_v47  ;;  %2573 = vmatprep.subr.mxu1 %v3527_v57  ;;  %v3562_v47 = vld [vmem:[%s5926_s9 + $0x30] sm:$0xff]  ;;  %v6498_v57 = vld [vmem:[#allocation125_spill] sm:$0xff] }
 0x386   :  { %2503 = vmatpush2.msra.mxu0 %v6480_v5  ;;  %2574 = vmatpush2.msra.mxu1 %v3528_v36  ;;  %v3563_v5 = vld [vmem:[%s5926_s9 + $0xa8] sm:$0xff] }
 0x387   :  { %2504 = vmatprep.subr.mxu0 %v6481_v40  ;;  %2575 = vmatprep.subr.mxu1 %v3529_v42  ;;  %v6499_v36 = vld [vmem:[#allocation126_spill] sm:$0xff]  ;;  %v6500_v42 = vld [vmem:[#allocation127_spill] sm:$0xff] }
 0x388   :  { %2505 = vmatpush2.msra.mxu0 %v6482_v7  ;;  %2576 = vmatpush2.msra.mxu1 %v3530_v22  ;;  %v3564_v40 = vld [vmem:[%s5926_s9 + $0x28] sm:$0xff]  ;;  %v3565_v7 = vld [vmem:[%s5926_s9 + $0xa0] sm:$0xff]  ;;  %v6501_v22 = vld [vmem:[#allocation128_spill] sm:$0xff] }
 0x389   :  { %2506 = vmatprep.subr.mxu0 %v6483_v3  ;;  %2577 = vmatprep.subr.mxu1 %v3531_v9  ;;  %v3566_v3 = vld [vmem:[%s5926_s9 + $0x20] sm:$0xff]  ;;  %v6502_v9 = vld [vmem:[#allocation10_spill] sm:$0xff] }
 0x38a   :  { %2507 = vmatpush2.msra.mxu0 %v5230_v2  ;;  %2578 = vmatpush2.msra.mxu1 %v3532_v17  ;;  %v3537_v2 = vld [vmem:[#allocation7 + $0x4a8] sm:$0xff]  ;;  %v3567_v17 = vld [vmem:[%s5926_s9 + $0x98] sm:$0xff] }
 0x38b   :  { %2508 = vmatprep.subr.mxu0 %v6484_v1  ;;  %2579 = vmatprep.subr.mxu1 %v3533_v18  ;;  %v6503_v1 = vld [vmem:[#allocation14_spill] sm:$0xff]  ;;  %v3568_v18 = vld [vmem:[%s5926_s9 + $0x18] sm:$0xff] }
 0x38c   :  { %2509 = vmatpush2.msra.mxu0 %v6485_v6  ;;  %2580 = vmatpush2.msra.mxu1 %v3534_v20  ;;  %v6504_v6 = vld [vmem:[#allocation15_spill] sm:$0xff] }
 0x38d   :  { %2510 = vmatprep.subr.mxu0 %v5242_v41  ;;  %2581 = vmatprep.subr.mxu1 %v3535_v56  ;;  %v3540_v41 = vld [vmem:[#allocation7 + $0x460] sm:$0xff]  ;;  %v3569_v20 = vld [vmem:[%s5926_s9 + $0x90] sm:$0xff]  ;;  %v6505_v56 = vld [vmem:[#allocation16_spill] sm:$0xff] }
 0x38e   :  { %2511 = vmatpush2.msra.mxu0 %v6486_v61  ;;  %2582 = vmatpush2.msra.mxu1 %v3536_v0  ;;  %v3570_v61 = vld [vmem:[%s5926_s9 + $0x10] sm:$0xff]  ;;  %v6506_v0 = vld [vmem:[#allocation17_spill] sm:$0xff] }
 0x38f   :  { %2512 = vmatprep.subr.mxu0 %v6487_v35  ;;  %2583 = vmatprep.subr.mxu1 %v3537_v2  ;;  %v3571_v35 = vld [vmem:[%s5926_s9 + $0x88] sm:$0xff] }
 0x390   :  { %2513 = vmatpush2.msra.mxu0 %v5254_v59  ;;  %2584 = vmatpush2.msra.mxu1 %v3538_v27  ;;  %v3544_v59 = vld [vmem:[%s5926_s9 + $0x78] sm:$0xff]  ;;  %v6507_v2 = vld [vmem:[#allocation18_spill] sm:$0xff] }
 0x391   :  { %2514 = vmatprep.subr.mxu0 %v5258_v19  ;;  %2585 = vmatprep.subr.mxu1 %v3539_v15  ;;  %v3546_v19 = vld [vmem:[%s5926_s9 + $0x70] sm:$0xff]  ;;  %v3572_v27 = vld [vmem:[%s5926_s9 + $0x8] sm:$0xff]  ;;  %v6508_v15 = vld [vmem:[#allocation84_spill] sm:$0xff] }
 0x392   :  { %2515 = vmatpush2.msra.mxu0 %v5262_v53  ;;  %2586 = vmatpush2.msra.mxu1 %v3540_v41  ;;  %v3545_v53 = vld [vmem:[%s5926_s9 + $0xf0] sm:$0xff]  ;;  %v3573_v41 = vld [vmem:[%s5926_s9 + $0x80] sm:$0xff] }
 0x393   :  { %2516 = vmatprep.subr.mxu0 %v5266_v16  ;;  %2587 = vmatprep.subr.mxu1 %v3541_v63  ;;  %v3543_v16 = vld [vmem:[%s5926_s9 + $0xf8] sm:$0xff]  ;;  %v6509_v63 = vld [vmem:[#allocation85_spill] sm:$0xff] }
 0x394   :  { %2517 = vmatpush2.msra.mxu0 %v5270_v25  ;;  %2588 = vmatpush2.msra.mxu1 %v3542_v11  ;;  %v3547_v25 = vld [vmem:[%s5926_s9 + $0xe8] sm:$0xff]  ;;  %v3574_v11 = vld [vmem:[%s5926_s9] sm:$0xff] }
 0x395   :  { %2519 = vmatmul.mubr.f32.vlgmr.msra.gmra.mxu0 %v5536_v4  ;;  %2590 = vmatmul.mubr.f32.vlgmr.msra.gmra.mxu1 %v5536_v4 }
 0x396   :  { %2596 = vmatprep.subr.mxu0 %v5276_v29  ;;  %2660 = vmatprep.mubr.f32.mxu0 %v5534_v13  ;;  %v3548_v29 = vld [vmem:[%s5926_s9 + $0x68] sm:$0xff] }
 0x397   :  { %2597 = vmatpush1.msra.mxu0 %v5280_v10  ;;  %3087 = vmatprep.subr.mxu1 %v3543_v16  ;;  %v3549_v10 = vld [vmem:[%s5926_s9 + $0xe0] sm:$0xff]  ;;  %v6510_v16 = vld [vmem:[#allocation86_spill] sm:$0xff] }
 0x398   :  { %2598 = vmatprep.subr.mxu0 %v5284_v32  ;;  %3088 = vmatpush3.msra.mxu1 %v3544_v59  ;;  %v3551_v32 = vld [vmem:[%s5926_s9 + $0xd8] sm:$0xff]  ;;  %v6511_v59 = vld [vmem:[#allocation87_spill] sm:$0xff] }
 0x399   :  { %2599 = vmatpush1.msra.mxu0 %v5288_v8  ;;  %3089 = vmatprep.subr.mxu1 %v3545_v53  ;;  %v3552_v8 = vld [vmem:[%s5926_s9 + $0x58] sm:$0xff]  ;;  %v6512_v53 = vld [vmem:[#allocation129_spill] sm:$0xff] }
 0x39a   :  { %2600 = vmatprep.subr.mxu0 %v5292_v12  ;;  %3090 = vmatpush3.msra.mxu1 %v3546_v19  ;;  %v6488_v12 = vld [vmem:[#allocation59_spill] sm:$0xff]  ;;  %v6513_v19 = vld [vmem:[#allocation130_spill] sm:$0xff] }
 0x39b   :  { %2601 = vmatpush1.msra.mxu0 %v5296_v55  ;;  %3091 = vmatprep.subr.mxu1 %v3547_v25  ;;  %v3550_v55 = vld [vmem:[%s5926_s9 + $0x60] sm:$0xff]  ;;  %v6514_v25 = vld [vmem:[#allocation131_spill] sm:$0xff] }
 0x39c   :  { %2602 = vmatprep.subr.mxu0 %v5300_v44  ;;  %3092 = vmatpush3.msra.mxu1 %v3548_v29  ;;  %v3553_v44 = vld [vmem:[%s5926_s9 + $0xd0] sm:$0xff]  ;;  %v3575_v29 = vld [vmem:[%s5929_s12] sm:$0xff] }
 0x39d   :  { %2603 = vmatpush1.msra.mxu0 %v5304_v46  ;;  %3093 = vmatprep.subr.mxu1 %v3549_v10  ;;  %v6489_v46 = vld [vmem:[#allocation60_spill] sm:$0xff]  ;;  %vm2810_vm6 = vcmp.eq.s32.totalorder %v3575_v29, 2 }
 0x39e   :  { %2604 = vmatprep.subr.mxu0 %v5308_v48  ;;  %3094 = vmatpush3.msra.mxu1 %v3550_v55  ;;  %v3554_v48 = vld [vmem:[%s5926_s9 + $0x50] sm:$0xff]  ;;  %v6515_v10 = vld [vmem:[#allocation132_spill] sm:$0xff]  ;;  %v6516_v55 = vmov 0.0  }
 0x39f   :  { %2605 = vmatpush1.msra.mxu0 %v5312_v50  ;;  %3095 = vmatprep.subr.mxu1 %v3551_v32  ;;  %v6490_v50 = vld [vmem:[#allocation61_spill] sm:$0xff]  ;;  %v3012_v32 = vsel %vm2810_vm6, 1.0, %v6516_v55  ;;  %v2835_v29 = vld [vmem:[%s5927_s10 + $0x38] sm:$0xff]  ;;  %v2834_v55 = vld [vmem:[%s5927_s10 + $0x30] sm:$0xff] }
 0x3a0   :  { %2606 = vmatprep.subr.mxu0 %v5316_v52  ;;  %3096 = vmatpush3.msra.mxu1 %v3552_v8  ;;  %v3555_v52 = vld [vmem:[%s5926_s9 + $0xc8] sm:$0xff]  ;;  %v6517_v8 = vld [vmem:[#allocation133_spill] sm:$0xff] }
 0x3a1   :  { %2607 = vmatpush1.msra.mxu0 %v6488_v12  ;;  %3097 = vmatprep.subr.mxu1 %v3553_v44  ;;  %v6518_v12 = vld [vmem:[#allocation134_spill] sm:$0xff]  ;;  %v6519_v44 = vld [vmem:[#allocation135_spill] sm:$0xff] }
 0x3a2   :  { %2608 = vmatprep.subr.mxu0 %v6489_v46  ;;  %3098 = vmatpush3.msra.mxu1 %v3554_v48  ;;  %v6520_v46 = vld [vmem:[#allocation136_spill] sm:$0xff]  ;;  %v6521_v48 = vld [vmem:[#allocation137_spill] sm:$0xff] }
 0x3a3   :  { %2609 = vmatpush1.msra.mxu0 %v6490_v50  ;;  %3099 = vmatprep.subr.mxu1 %v3555_v52  ;;  %v6522_v50 = vld [vmem:[#allocation138_spill] sm:$0xff]  ;;  %v6523_v52 = vld [vmem:[#allocation139_spill] sm:$0xff] }
 0x3a4   :  { %2610 = vmatprep.subr.mxu0 %v6491_v14  ;;  %3100 = vmatpush3.msra.mxu1 %v3556_v49  ;;  %v6524_v14 = vld [vmem:[#allocation140_spill] sm:$0xff]  ;;  %v6525_v49 = vld [vmem:[#allocation141_spill] sm:$0xff] }
 0x3a5   :  { %2611 = vmatpush1.msra.mxu0 %v6492_v54  ;;  %3101 = vmatprep.subr.mxu1 %v3557_v58  ;;  %v6526_v54 = vld [vmem:[#allocation142_spill] sm:$0xff]  ;;  %v6527_v58 = vld [vmem:[#allocation143_spill] sm:$0xff] }
 0x3a6   :  { %2612 = vmatprep.subr.mxu0 %v6493_v60  ;;  %3102 = vmatpush3.msra.mxu1 %v3558_v45  ;;  %v6528_v60 = vld [vmem:[#allocation144_spill] sm:$0xff]  ;;  %v6529_v45 = vld [vmem:[#allocation145_spill] sm:$0xff] }
 0x3a7   :  { %2613 = vmatpush1.msra.mxu0 %v6494_v37  ;;  %3103 = vmatprep.subr.mxu1 %v3559_v23  ;;  %v6530_v37 = vld [vmem:[#allocation146_spill] sm:$0xff]  ;;  %v6531_v23 = vld [vmem:[#allocation147_spill] sm:$0xff] }
 0x3a8   :  { %2614 = vmatprep.subr.mxu0 %v6495_v43  ;;  %3104 = vmatpush3.msra.mxu1 %v3560_v39  ;;  %v6532_v43 = vld [vmem:[#allocation148_spill] sm:$0xff]  ;;  %v6533_v39 = vld [vmem:[#allocation149_spill] sm:$0xff] }
 0x3a9   :  { %2615 = vmatpush1.msra.mxu0 %v6496_v28  ;;  %3105 = vmatprep.subr.mxu1 %v3561_v33  ;;  %v6534_v28 = vld [vmem:[#allocation150_spill] sm:$0xff]  ;;  %v3576_v33 = vld [vmem:[#allocation7 + $0x4f0] sm:$0xff] }
 0x3aa   :  { %2616 = vmatprep.subr.mxu0 %v6497_v26  ;;  %3106 = vmatpush3.msra.mxu1 %v3562_v47  ;;  %v3577_v26 = vld [vmem:[#allocation7 + $0x4b8] sm:$0xff]  ;;  %v3578_v47 = vld [vmem:[#allocation7 + $0x4b0] sm:$0xff] }
 0x3ab   :  { %2617 = vmatpush1.msra.mxu0 %v6498_v57  ;;  %3107 = vmatprep.subr.mxu1 %v3563_v5  ;;  %v3579_v57 = vld [vmem:[#allocation7 + $0x478] sm:$0xff]  ;;  %v3580_v5 = vld [vmem:[#allocation7 + $0x470] sm:$0xff] }
 0x3ac   :  { %2618 = vmatprep.subr.mxu0 %v6499_v36  ;;  %3108 = vmatpush3.msra.mxu1 %v3564_v40  ;;  %v3581_v36 = vld [vmem:[#allocation7 + $0x438] sm:$0xff]  ;;  %v3582_v40 = vld [vmem:[#allocation7 + $0x430] sm:$0xff] }
 0x3ad   :  { %2619 = vmatpush1.msra.mxu0 %v6500_v42  ;;  %3109 = vmatprep.subr.mxu1 %v3565_v7 }
 0x3ae   :  { %2620 = vmatprep.subr.mxu0 %v6501_v22  ;;  %3110 = vmatpush3.msra.mxu1 %v3566_v3  ;;  %v6535_v3 = vld [vmem:[#allocation41_spill] sm:$0xff] }
 0x3af   :  { %2621 = vmatpush1.msra.mxu0 %v6502_v9  ;;  %3111 = vmatprep.subr.mxu1 %v3567_v17 }
 0x3b0   :  { %2622 = vmatprep.subr.mxu0 %v6503_v1  ;;  %3112 = vmatpush3.msra.mxu1 %v3568_v18  ;;  %v2859_v1 = vld [vmem:[%s5927_s10 + $0xf8] sm:$0xff] }
 0x3b1   :  { %2623 = vmatpush1.msra.mxu0 %v6504_v6  ;;  %3113 = vmatprep.subr.mxu1 %v3569_v20  ;;  %v2843_v18 = vld [vmem:[%s5927_s10 + $0x78] sm:$0xff]  ;;  %v2858_v6 = vld [vmem:[%s5927_s10 + $0xf0] sm:$0xff] }
 0x3b2   :  { %2624 = vmatprep.subr.mxu0 %v6505_v56  ;;  %3114 = vmatpush3.msra.mxu1 %v3570_v61  ;;  %v2842_v20 = vld [vmem:[%s5927_s10 + $0x70] sm:$0xff]  ;;  %v2857_v56 = vld [vmem:[%s5927_s10 + $0xe8] sm:$0xff] }
 0x3b3   :  { %2625 = vmatpush1.msra.mxu0 %v6506_v0  ;;  %3115 = vmatprep.subr.mxu1 %v3571_v35  ;;  %v2841_v61 = vld [vmem:[%s5927_s10 + $0x68] sm:$0xff]  ;;  %v2856_v0 = vld [vmem:[%s5927_s10 + $0xe0] sm:$0xff] }
 0x3b4   :  { %2626 = vmatprep.subr.mxu0 %v6507_v2  ;;  %3116 = vmatpush3.msra.mxu1 %v3572_v27  ;;  %v2840_v35 = vld [vmem:[%s5927_s10 + $0x60] sm:$0xff]  ;;  %v2855_v2 = vld [vmem:[%s5927_s10 + $0xd8] sm:$0xff] }
 0x3b5   :  { %2627 = vmatpush1.msra.mxu0 %v6508_v15  ;;  %3117 = vmatprep.subr.mxu1 %v3573_v41  ;;  %v2839_v15 = vld [vmem:[%s5927_s10 + $0x58] sm:$0xff] }
 0x3b6   :  { %2628 = vmatprep.subr.mxu0 %v6509_v63  ;;  %3118 = vmatpush3.msra.mxu1 %v3574_v11  ;;  %v2854_v63 = vld [vmem:[%s5927_s10 + $0xd0] sm:$0xff] }
 0x3b7   :  { %2629 = vmatpush2.msra.mxu0 %v6510_v16  ;;  %2817 = vperm.xlu0 %3172, %v3012_v32   ;;  %v2838_v11 = vld [vmem:[%s5927_s10 + $0x50] sm:$0xff]  ;;  %v2853_v16 = vld [vmem:[%s5927_s10 + $0xc8] sm:$0xff] }
 0x3b8   :  { %2630 = vmatprep.subr.mxu0 %v6511_v59  ;;  %v2837_v59 = vld [vmem:[%s5927_s10 + $0x48] sm:$0xff] }
 0x3b9   :  { %2631 = vmatpush2.msra.mxu0 %v6512_v53  ;;  %v2852_v53 = vld [vmem:[%s5927_s10 + $0xc0] sm:$0xff]  ;;  %v2849_v32 = vld [vmem:[%s5927_s10 + $0xa8] sm:$0xff] }
 0x3ba   :  { %2632 = vmatprep.subr.mxu0 %v6513_v19  ;;  %v2836_v19 = vld [vmem:[%s5927_s10 + $0x40] sm:$0xff] }
 0x3bb   :  { %2633 = vmatpush2.msra.mxu0 %v6514_v25  ;;  %v2851_v25 = vld [vmem:[%s5927_s10 + $0xb8] sm:$0xff] }
 0x3bc   :  { %2634 = vmatprep.subr.mxu0 %v6515_v10  ;;  %v2850_v10 = vld [vmem:[%s5927_s10 + $0xb0] sm:$0xff] }
 0x3bd   :  { %2635 = vmatpush2.msra.mxu0 %v6517_v8  ;;  %v2833_v8 = vld [vmem:[%s5927_s10 + $0x28] sm:$0xff] }
 0x3be   :  { %2636 = vmatprep.subr.mxu0 %v6518_v12 }
 0x3bf   :  { %2637 = vmatpush2.msra.mxu0 %v6519_v44  ;;  %v2848_v44 = vld [vmem:[%s5927_s10 + $0xa0] sm:$0xff] }
 0x3c0   :  { %2638 = vmatprep.subr.mxu0 %v6520_v46  ;;  %v3002_v46 = vld [vmem:[%s5928_s11 + $0x8] sm:$0xff] }
 0x3c1   :  { %2639 = vmatpush2.msra.mxu0 %v6521_v48  ;;  %v2832_v48 = vld [vmem:[%s5927_s10 + $0x20] sm:$0xff] }
 0x3c2   :  { %2640 = vmatprep.subr.mxu0 %v6522_v50  ;;  %v6536_v50 = vld [vmem:[#allocation11_spill] sm:$0xff] }
 0x3c3   :  { %2641 = vmatpush2.msra.mxu0 %v6523_v52  ;;  %v6537_v52 = vld [vmem:[#allocation96_spill] sm:$0xff] }
 0x3c4   :  { %2642 = vmatprep.subr.mxu0 %v6524_v14  ;;  %v915_v14 = vadd.f32 %v6537_v52, %v6536_v50 }
 0x3c5   :  { %2643 = vmatpush2.msra.mxu0 %v6525_v49  ;;  %v2847_v49 = vld [vmem:[%s5927_s10 + $0x98] sm:$0xff] }
 0x3c6   :  { %2644 = vmatprep.subr.mxu0 %v6526_v54 }
 0x3c7   :  { %2645 = vmatpush2.msra.mxu0 %v6527_v58 }
 0x3c8   :  { %2646 = vmatprep.subr.mxu0 %v6528_v60  ;;  %v2831_v60 = vld [vmem:[%s5927_s10 + $0x18] sm:$0xff] }
 0x3c9   :  { %2647 = vmatpush2.msra.mxu0 %v6529_v45  ;;  %v6538_v45 = vld [vmem:[#allocation98_spill] sm:$0xff] }
 0x3ca   :  { %2648 = vmatprep.subr.mxu0 %v6530_v37  ;;  %v917_v37 = vadd.f32 %v6538_v45, %v4946_v38  ;;  %v2845_v38 = vld [vmem:[%s5927_s10 + $0x88] sm:$0xff] }
 0x3cb   :  { %2649 = vmatpush2.msra.mxu0 %v6531_v23  ;;  %v6545_v45 = vld [vmem:[#allocation102_spill] sm:$0xff] }
 0x3cc   :  { %2650 = vmatprep.subr.mxu0 %v6532_v43 }
 0x3cd   :  { %2651 = vmatpush2.msra.mxu0 %v6533_v39  ;;  %v2846_v39 = vld [vmem:[%s5927_s10 + $0x90] sm:$0xff] }
 0x3ce   :  { %2652 = vmatprep.subr.mxu0 %v6534_v28  ;;  %v2342_v28 = vld [vmem:[#allocation5] sm:$0xff] }
 0x3cf   :  { %2653 = vmatpush2.msra.mxu0 %v3576_v33  ;;  %v2830_v33 = vld [vmem:[%s5927_s10 + $0x10] sm:$0xff] }
 0x3d0   :  { %2654 = vmatprep.subr.mxu0 %v3577_v26 }
 0x3d1   :  { %2655 = vmatpush2.msra.mxu0 %v3578_v47 }
 0x3d2   :  { %2656 = vmatprep.subr.mxu0 %v3579_v57  ;;  %v2829_v57 = vld [vmem:[%s5927_s10 + $0x8] sm:$0xff] }
 0x3d3   :  { %2657 = vmatpush2.msra.mxu0 %v3580_v5 }
 0x3d4   :  { %2658 = vmatprep.subr.mxu0 %v3581_v36  ;;  %v2844_v36 = vld [vmem:[%s5927_s10 + $0x80] sm:$0xff] }
 0x3d5   :  { %2659 = vmatpush2.msra.mxu0 %v3582_v40  ;;  %v2828_v40 = vld [vmem:[%s5927_s10] sm:$0xff] }
 0x3d6   :  { %2661 = vmatmul.mubr.f32.vlgmr.msra.gmra.mxu0 %v5536_v4  ;;  %3122 = vmatprep.subr.mxu0 %v2859_v1 }
 0x3d7   :  { %3123 = vmatpush3.msra.mxu0 %v2843_v18  ;;  %v6540_v18 = vld [vmem:[#allocation100_spill] sm:$0xff] }
 0x3d8   :  { %3124 = vmatprep.subr.mxu0 %v2858_v6  ;;  %v1057_v6 = vadd.f32 %v6540_v18, %v4959_v62 }
 0x3d9   :  { %3125 = vmatpush3.msra.mxu0 %v2842_v20 }
 0x3da   :  { %3126 = vmatprep.subr.mxu0 %v2857_v56 }
 0x3db   :  { %3127 = vmatpush3.msra.mxu0 %v2841_v61 }
 0x3dc   :  { %3128 = vmatprep.subr.mxu0 %v2856_v0  ;;  %v6541_v0 = vld [vmem:[#allocation13_spill] sm:$0xff] }
 0x3dd   :  { %3129 = vmatpush3.msra.mxu0 %v2840_v35  ;;  %v6542_v35 = vld [vmem:[#allocation99_spill] sm:$0xff] }
 0x3de   :  { %3130 = vmatprep.subr.mxu0 %v2855_v2  ;;  %v988_v2 = vadd.f32 %v6542_v35, %v6541_v0 }
 0x3df   :  { %3131 = vmatpush3.msra.mxu0 %v2839_v15 }
 0x3e0   :  { %3132 = vmatprep.subr.mxu0 %v2854_v63 }
 0x3e1   :  { %3133 = vmatpush3.msra.mxu0 %v2838_v11 }
 0x3e2   :  { %3134 = vmatprep.subr.mxu0 %v2853_v16 }
 0x3e3   :  { %3135 = vmatpush3.msra.mxu0 %v2837_v59 }
 0x3e4   :  { %3136 = vmatprep.subr.mxu0 %v2852_v53 }
 0x3e5   :  { %3137 = vmatpush3.msra.mxu0 %v2836_v19 }
 0x3e6   :  { %3138 = vmatprep.subr.mxu0 %v2851_v25 }
 0x3e7   :  { %3139 = vmatpush3.msra.mxu0 %v2835_v29 }
 0x3e8   :  { %3140 = vmatprep.subr.mxu0 %v2850_v10 }
 0x3e9   :  { %3141 = vmatpush3.msra.mxu0 %v2834_v55 }
 0x3ea   :  { %3142 = vmatprep.subr.mxu0 %v2849_v32 }
 0x3eb   :  { %3143 = vmatpush3.msra.mxu0 %v2833_v8 }
 0x3ec   :  { %3144 = vmatprep.subr.mxu0 %v2848_v44 }
 0x3ed   :  { %3145 = vmatpush3.msra.mxu0 %v2832_v48 }
 0x3ee   :  { %3146 = vmatprep.subr.mxu0 %v2847_v49 }
 0x3ef   :  { %3147 = vmatpush3.msra.mxu0 %v2831_v60 }
 0x3f0   :  { %3148 = vmatprep.subr.mxu0 %v2846_v39 }
 0x3f1   :  { %3149 = vmatpush3.msra.mxu0 %v2830_v33 }
 0x3f2   :  { %3150 = vmatprep.subr.mxu0 %v2845_v38 }
 0x3f3   :  { %3151 = vmatpush3.msra.mxu0 %v2829_v57 }
 0x3f4   :  { %3152 = vmatprep.subr.mxu0 %v2844_v36 }
 0x3f5   :  { %3153 = vmatpush3.msra.mxu0 %v2828_v40 }
 0x414   :  { %v3084_v42 = vpop.f32.mrf.mxu0  ;;  %v2449_v12 = vpop.f32.mrf.mxu1 }
 0x415   :  { %v2667_v23 = vadd.f32 %v2449_v12, %v915_v14 }
 0x416   :  { %v3085_v7 = vpop.f32.mrf.mxu0  ;;  %v2451_v58 = vpop.f32.mrf.mxu1 }
 0x417   :  { %v3086_v22 = vadd.f32 %v3085_v7, %v3084_v42  ;;  %v2668_v47 = vadd.f32 %v2451_v58, %v917_v37  ;;  %v3004_v5 = vmul.f32 -1.442695, %v2667_v23  ;;  %v1130_v37 = vadd.f32 %v6545_v45, %v4967_v51 }
 0x419   :  { %v2343_v9 = vadd.f32 %v3086_v22, %v6535_v3  ;;  %v3005_v42 = vmul.f32 -1.442695, %v2668_v47 }
 0x41b   :  { %v3001_v17 = vmul.f32 -1.442695, %v2343_v9 }
 0x41d   :  { %3246 = vpow2.f32 %v3001_v17  ;;  %v6539_v17 = vld [vmem:[#allocation97_spill] sm:$0xff] }
 0x41e   :  { %v986_v1 = vadd.f32 %v6539_v17, %v4951_v21 }
 0x42a   :  { %v3247_v27 = vpop.eup %3246 }
 0x42b   :  { %v2347_v41 = vadd.f32 1.0, %v3247_v27  ;;  %v6543_v27 = vld [vmem:[#allocation12_spill] sm:$0xff] }
 0x42c   :  { %v1059_v15 = vadd.f32 %v6543_v27, %v4962_v34 }
 0x42d   :  { %3248 = vrcp.f32 %v2347_v41 }
 0x42e   :  { %3250 = vpow2.f32 %v3004_v5 }
 0x42f   :  { %3252 = vpow2.f32 %v3005_v42 }
 0x43a   :  { %v3249_v54 = vpop.eup %3248 }
 0x43b   :  { %v2352_v43 = vmul.f32 %v3249_v54, %v3002_v46  ;;  %v3251_v7 = vpop.eup %3250  ;;  %v6544_v54 = vld [vmem:[#allocation101_spill] sm:$0xff] }
 0x43c   :  { %v3253_v22 = vpop.eup %3252  ;;  %v2681_v9 = vadd.f32 1.0, %v3251_v7  ;;  %v1128_v58 = vadd.f32 %v6544_v54, %v4964_v30  ;;  %v3175_v30 = vpop.permute.xlu0 %3174 }
 0x43d   :  { %v2353_v26 = vadd.f32 %v2352_v43, %v2342_v28  ;;  %v2682_v20 = vadd.f32 1.0, %v3253_v22  ;;  %v3177_v38 = vunpack.i.h.bf16 %v3175_v30  ;;  %v3176_v51 = vunpack.i.l.bf16 %v3175_v30 }
 0x43e   :  { %3254 = vrcp.f32 %v2681_v9  ;;  %v6546_v9 = vld [vmem:[#allocation103_spill] sm:$0xff] }
 0x43f   :  { %2354 = vst.msk [vmem:[#allocation5] sm:$0xff] %vm1169_vm5, %v2353_v26  ;;  %v2366_v40 = vmul.f32 %v3177_v38, %v5534_v13  ;;  %v2365_v22 = vmul.f32 %v3177_v38, %v5536_v4  ;;  %v1911_v17 = vmul.f32 %v3176_v51, %v6546_v9 }
 0x44b   :  { %v3255_v19 = vpop.eup %3254 }
 0x455   :  { %v2520_v56 = vpop.f32.mrf.mxu0  ;;  %v2591_v61 = vpop.f32.mrf.mxu1 }
 0x456   :  { %v2669_v41 = vadd.f32 %v2520_v56, %v986_v1  ;;  %v2671_v63 = vadd.f32 %v2591_v61, %v1057_v6  ;;  %v2818_v1 = vpop.permute.xlu0 %2817  ;;  %v6547_v6 = vld [vmem:[#allocation104_spill] sm:$0xff]  ;;  %v2368_v61 = vadd.f32 %v2366_v40, %v1911_v17 }
 0x457   :  { %v2522_v11 = vpop.f32.mrf.mxu0  ;;  %v2593_v16 = vpop.f32.mrf.mxu1 }
 0x458   :  { %v3006_v59 = vmul.f32 -1.442695, %v2669_v41  ;;  %3256 = vtanh.f32 %v2671_v63  ;;  %v2670_v21 = vadd.f32 %v2522_v11, %v988_v2  ;;  %v2672_v53 = vadd.f32 %v2593_v16, %v1059_v15 }
 0x459   :  { %3258 = vrcp.f32 %v2682_v20  ;;  %v1910_v20 = vmul.f32 %v3176_v51, %v6547_v6 }
 0x45a   :  { %3260 = vpow2.f32 %v3006_v59  ;;  %v3007_v62 = vmul.f32 -1.442695, %v2670_v21  ;;  %v2933_v21 = vpop.permute.xlu1 %2932 }
 0x45b   :  { %3262 = vtanh.f32 %v2672_v53  ;;  %v2367_v35 = vadd.f32 %v2365_v22, %v1910_v20 }
 0x45c   :  { %3264 = vpow2.f32 %v3007_v62 }
 0x465   :  { %v3257_v25 = vpop.eup %3256 }
 0x466   :  { %v3259_v29 = vpop.eup %3258  ;;  %v2715_v10 = vmul.f32 %v3257_v25, %v3255_v19 }
 0x467   :  { %v3261_v55 = vpop.eup %3260 }
 0x468   :  { %v3263_v34 = vpop.eup %3262  ;;  %v2693_v32 = vadd.f32 1.0, %v3261_v55 }
 0x469   :  { %v3265_v8 = vpop.eup %3264  ;;  %v2716_v12 = vmul.f32 %v3263_v34, %v3259_v29  ;;  %v3011_v29 = vld [vmem:[%s5928_s11 + $0x10] sm:$0xff]  ;;  %s3612_s11 = smov 32  }
 0x46a   :  { %3266 = vrcp.f32 %v2693_v32  ;;  %v2694_v44 = vadd.f32 1.0, %v3265_v8 }
 0x46c   :  { %3268 = vrcp.f32 %v2694_v44 }
 0x477   :  { %v3267_v46 = vpop.eup %3266 }
 0x478   :  { %v2713_v48 = vmul.f32 %v3267_v46, %v5523_v24 }
 0x479   :  { %v3269_v50 = vpop.eup %3268 }
 0x47a   :  { %v2717_v52 = vadd.f32 %v2715_v10, %v2713_v48  ;;  %v2714_v14 = vmul.f32 %v3269_v50, %v5526_v31 }
 0x47c   :  { %v2718_v49 = vadd.f32 %v2716_v12, %v2714_v14 }
 0x496   :  { %v2662_v60 = vpop.f32.mrf.mxu0 }
 0x497   :  { %v2673_v23 = vadd.f32 %v2662_v60, %v1128_v58 }
 0x498   :  { %v2664_v43 = vpop.f32.mrf.mxu0 }
 0x499   :  { %v3008_v39 = vmul.f32 -1.442695, %v2673_v23  ;;  %v2674_v28 = vadd.f32 %v2664_v43, %v1130_v37 }
 0x49b   :  { %3270 = vpow2.f32 %v3008_v39  ;;  %v3009_v33 = vmul.f32 -1.442695, %v2674_v28 }
 0x49d   :  { %3272 = vpow2.f32 %v3009_v33 }
 0x49e   :  { %3274 = vtanh.f32 %v2717_v52 }
 0x4a8   :  { %v3271_v24 = vpop.eup %3270 }
 0x4a9   :  { %v2707_v26 = vadd.f32 1.0, %v3271_v24 }
 0x4aa   :  { %v3273_v47 = vpop.eup %3272 }
 0x4ab   :  { %3276 = vrcp.f32 %v2707_v26  ;;  %v2708_v31 = vadd.f32 1.0, %v3273_v47  ;;  %v3275_v57 = vpop.eup %3274 }
 0x4ac   :  { %3278 = vtanh.f32 %v2718_v49 }
 0x4ad   :  { %3280 = vrcp.f32 %v2708_v31 }
 0x4b8   :  { %v3277_v5 = vpop.eup %3276 }
 0x4b9   :  { %v3279_v36 = vpop.eup %3278  ;;  %v2721_v42 = vmul.f32 %v3277_v5, %v3275_v57 }
 0x4ba   :  { %v3281_v7 = vpop.eup %3280 }
 0x4bb   :  { %v2722_v18 = vmul.f32 %v3281_v7, %v3279_v36  ;;  %v2820_v56 = vmul.f32 %v2818_v1, %v2721_v42 }
 0x4bd   :  { %v2821_v0 = vmul.f32 %v2818_v1, %v2722_v18  ;;  %2791 = vmatprep.mubr.f32.mxu1 %v2722_v18  ;;  %v2822_v27 = vadd.f32 %v2820_v56, %v2367_v35 }
 0x4be   :  { %2792 = vmatmul.mubr.f32.vlgmr.msra.gmra.mxu1 %v2721_v42 }
 0x4bf   :  { %v2823_v2 = vadd.f32 %v2821_v0, %v2368_v61 }
 0x4c1   :  { %2924 = vmatprep.mubr.f32.mxu0 %v2823_v2 }
 0x4c2   :  { %2925 = vmatmul.mubr.f32.vlgmr.msra.gmra.mxu0 %v2822_v27 }
 0x57e   :  { %v3119_v13 = vpop.f32.mrf.mxu1 }
 0x580   :  { %v3120_v15 = vpop.f32.mrf.mxu1 }
 0x581   :  { %v3121_v41 = vadd.f32 %v3120_v15, %v3119_v13 }
 0x582   :  { %v3154_v4 = vpop.f32.mrf.mxu0 }
 0x583   :  { %v2798_v63 = vadd.f32 %v3121_v41, %v6535_v3  ;;  %v2797_v3 = vld [vmem:[#allocation5] sm:$0xff] }
 0x584   :  { %v3155_v11 = vpop.f32.mrf.mxu0 }
 0x585   :  { %v3010_v16 = vmul.f32 -1.442695, %v2798_v63  ;;  %v3156_v59 = vadd.f32 %v3155_v11, %v3154_v4 }
 0x587   :  { %3282 = vpow2.f32 %v3010_v16  ;;  %v2935_v53 = vadd.f32 %v3156_v59, %v2933_v21 }
 0x589   :  { %3284 = vtanh.f32 %v2935_v53  ;;  %v3013_v32 = vmul.f32 -1.442695, %v2935_v53 }
 0x594   :  { %v3283_v62 = vpop.eup %3282 }
 0x595   :  { %v2802_v19 = vadd.f32 1.0, %v3283_v62 }
 0x596   :  { %v3285_v25 = vpop.eup %3284 }
 0x597   :  { %3286 = vrcp.f32 %v2802_v19  ;;  %2944 = vrot.lane.b32.xlu1 %v3285_v25, %s3610_s2 }
 0x598   :  { %3288 = vpow2.f32 %v3013_v32 }
 0x5a4   :  { %v3287_v10 = vpop.eup %3286 }
 0x5a5   :  { %v2807_v55 = vmul.f32 %v3287_v10, %v3011_v29  ;;  %v3289_v8 = vpop.eup %3288 }
 0x5a6   :  { %v2939_v12 = vadd.f32 1.0, %v3289_v8 }
 0x5a7   :  { %v2808_v34 = vadd.f32 %v2807_v55, %v2797_v3 }
 0x5a8   :  { %3290 = vrcp.f32 %v2939_v12 }
 0x5a9   :  { %2809 = vst.msk [vmem:[#allocation5] sm:$0xff] %vm1169_vm5, %v2808_v34 }
 0x5b0   :  { %v2930_v50 = vld [vmem:[#allocation5] sm:$0xff] }
 0x5b5   :  { %v3291_v44 = vpop.eup %3290 }
 0x609   :  { %v2945_v46 = vpop.permute.xlu1 %2944 }
 0x60a   :  { %v2947_v48 = vmul.f32 %v3291_v44, %v2945_v46 }
 0x60c   :  { %v2948_v52 = vadd.f32 %v2947_v48, %v2930_v50 }
 0x60e   :  { %3292 = vtanh.f32 %v2948_v52 }
 0x61b   :  { %v3293_v14 = vpop.eup %3292 }
 0x61c   :  { %2951 = vrot.lane.b32.xlu0 %v3293_v14, %s3607_s29 }
 0x620   :  { %2960 = vrot.lane.b32.xlu0 %v2948_v52, %s3612_s11 }
 0x68e   :  { %v2952_v49 = vpop.permute.xlu0 %2951 }
 0x68f   :  { %v2954_v54 = vmul.f32 %v3291_v44, %v2952_v49 }
 0x691   :  { %2956 = vrot.lane.b32.xlu1 %v2954_v54, %s3607_s29 }
 0x692   :  { %v2961_v58 = vpop.permute.xlu0 %2960 }
 0x703   :  { %v2957_v60 = vpop.permute.xlu1 %2956 }
 0x704   :  { %v2963_v45 = vsel %vm1169_vm5, %v2957_v60, %v2961_v58 }
 0x705   :  { %v2964_v37 = vsel %vm249_vm2, %v2963_v45, 0.0 }
 0x706   :  { %2965 = vst [vmem:[%s5930_s13] sm:$0xff] %v2964_v37 }
 0x707   :  { %2970 = vsyncpa [#allocation8], 1 }

</bundles_post_ra>
